<compile_context>
chip_gen: v5e
topology: v5e:2x2
jax: 0.10.0
libtpu: 0.0.40
codegen_flags: <defaults>
</compile_context>

<pallas_src>
import functools

import jax
import jax.numpy as jnp
from jax import lax
from jax.experimental import pallas as pl
from jax.experimental.pallas import tpu as pltpu


# ----------------------------------------------------------------------------
# Kernel
# ----------------------------------------------------------------------------
def _bottleneck_kernel(d, w_true,
                       xm_ref, xb_ref,
                       w1_ref, s1_ref, b1_ref,
                       w2_ref, s2_ref, b2_ref,
                       w3_ref, s3_ref, b3_ref,
                       o_ref, out1_ref):
    """conv1x1 -> BN -> ReLU -> conv3x3(dil d) -> BN -> ReLU -> conv1x1 -> BN -> +res -> ReLU.

    Per grid step (n, h):
      xm_ref  : (bh, W, C)  image rows [h*bh, (h+1)*bh)   (conv path + residual)
      xb_ref  : (ht, W, C)  block starting at (h+1)*bh    (bottom halo, first d rows)
      out1_ref: persistent VMEM scratch (bh + 2d, W + 2d, P) = zero-padded conv1
                output.  The top halo (d rows) is *carried* from the previous h
                step (h axis is sequential), so no top-halo input stream.
      w_true  : un-padded image width (W may be wrapper-padded to a multiple of 8).
    """
    bh, W, C4 = o_ref.shape          # W = wrapper-padded width (multiple of 8)
    C = xm_ref.shape[-1]
    P = w1_ref.shape[1]
    Wp = out1_ref.shape[1]           # W + 2*d
    f32 = jnp.float32
    cdt = xm_ref.dtype

    h = pl.program_id(1)
    is_first = h == 0
    is_last = h == pl.num_programs(1) - 1

    w1 = w1_ref[...]
    s1 = s1_ref[...]
    b1 = b1_ref[...]

    def conv1_bn_relu(x_rows):
        nr = x_rows.shape[0]
        # W % 8 == 0 -> this reshape is layout-free (no relayout before the MXU).
        a = jnp.dot(x_rows.reshape(nr * W, C), w1, preferred_element_type=f32)
        a = jnp.maximum(a * s1 + b1, 0.0)
        return a.reshape(nr, W, P).astype(cdt)

    # ---- top halo rows + zero-pad frame of the scratch ------------------------
    @pl.when(is_first)
    def _init():
        # Top padding rows (full width) + left pad columns.  Written once per
        # image; never touched by the interior stores below, so they persist.
        out1_ref[0:d, :, :] = jnp.zeros((d, Wp, P), cdt)
        out1_ref[:, 0:d, :] = jnp.zeros((bh + 2 * d, d, P), cdt)
        if w_true == W:
            out1_ref[:, d + W:, :] = jnp.zeros((bh + 2 * d, d, P), cdt)

    @pl.when(jnp.logical_not(is_first))
    def _carry():
        # Last d conv1 rows of the previous h step == this step's top halo.
        out1_ref[0:d, :, :] = out1_ref[bh:bh + d, :, :]

    # ---- conv1 + BN1 + ReLU for the main rows and the bottom halo -------------
    out1_ref[d:d + bh, d:d + W, :] = conv1_bn_relu(xm_ref[...])

    @pl.when(is_last)
    def _bottom_pad():
        out1_ref[d + bh:, d:d + W, :] = jnp.zeros((d, W, P), cdt)

    @pl.when(jnp.logical_not(is_last))
    def _bottom_halo():
        out1_ref[d + bh:, d:d + W, :] = conv1_bn_relu(xb_ref[0:d])

    if w_true != W:
        # Columns that came from wrapper W-padding (plus the d conv-pad columns
        # to their right) must be exactly zero for the dilated 3x3.
        out1_ref[:, d + w_true:, :] = jnp.zeros(
            (bh + 2 * d, Wp - d - w_true, P), cdt)

    # ---- conv2 (3x3, dilation d, padding d): 3 H-shifted K=3P matmuls ---------
    # Per-ky im2col slab (bh, W, 3P) built right before its dot; only one slab
    # plus the single f32 accumulator is live at a time.
    acc = None
    for ky in range(3):
        slab = jnp.concatenate(
            [out1_ref[ky * d:ky * d + bh, kx * d:kx * d + W, :]
             for kx in range(3)], axis=-1).reshape(bh * W, 3 * P)
        t = jnp.dot(slab, w2_ref[ky], preferred_element_type=f32)
        acc = t if acc is None else acc + t
    out2 = jnp.maximum(acc * s2_ref[...] + b2_ref[...], 0.0).astype(cdt)

    # ---- conv3 (1x1 expand) + BN3 + residual add + ReLU ------------------------
    out3 = jnp.dot(out2, w3_ref[...], preferred_element_type=f32)
    out3 = (out3 * s3_ref[...] + b3_ref[...]).reshape(bh, W, C4)
    # TODO(synk): with compute_dtype=bf16 the skip connection is the bf16-cast
    # input (PyTorch adds in the original precision); within stated tolerance.
    o_ref[...] = jnp.maximum(out3 + xm_ref[...].astype(f32), 0.0).astype(o_ref.dtype)


# ----------------------------------------------------------------------------
# Tiling helpers
# ----------------------------------------------------------------------------
def _divisors(n):
    return [i for i in range(1, n + 1) if n % i == 0]


def _halo_h(bh, d):
    return min(b for b in _divisors(bh) if b >= d)


def _default_vmem_limit_bytes():
    """~75% of physical VMEM (≈96 MiB on v5e/v6e, ≈48 MiB on v7x)."""
    try:
        cap = int(pltpu.get_tpu_info().vmem_capacity_bytes)
    except Exception:
        cap = 64 * 1024 * 1024       # conservative (v7x-sized) fallback
    return int(min(cap * 3 // 4, cap - (16 << 20)))


def _estimate_vmem_bytes(bh, W, C, P, C4, d, itemsize):
    """Rough per-step working-set estimate for block height `bh`."""
    f32 = 4
    ht = _halo_h(bh, d)
    est = 2 * bh * W * C * itemsize                      # main input (x2 buffers)
    est += 2 * ht * W * C * itemsize                     # bottom-halo input (x2)
    est += 2 * bh * W * C4 * itemsize                    # output (x2)
    est += (bh + 2 * d) * (W + 2 * d) * P * itemsize     # padded conv1 scratch
    est += (C * P + 9 * P * P + P * C4) * itemsize       # weights (single-buffered)
    est += (4 * P + 2 * C4) * f32                        # fused BN scale/shift
    est += bh * W * (3 * P * itemsize + 2 * P * f32 + 2 * C4 * f32)   # live temps
    return est


def _pick_block_h(H, W, C, P, C4, d, itemsize, block_h, vmem_budget):
    if block_h is not None:
        if H % block_h != 0 or block_h < d:
            raise ValueError(
                f"block_h={block_h} must divide H={H} and be >= dilation={d}")
        return int(block_h)
    cands = [b for b in _divisors(H) if b >= d]
    if not cands:
        raise ValueError(f"H={H} must be >= dilation={d}")
    budget = 0.7 * vmem_budget
    for bh in sorted(cands, reverse=True):               # biggest tile that fits
        if _estimate_vmem_bytes(bh, W, C, P, C4, d, itemsize) <= budget:
            return bh
    return min(cands)


# ----------------------------------------------------------------------------
# Wrappers
# ----------------------------------------------------------------------------
def bottleneck_forward_nhwc(x, params, dilation=1, block_h=None,
                            compute_dtype=jnp.bfloat16,
                            vmem_limit_bytes=None):
    """Fused Bottleneck forward on NHWC input (identity-residual path)."""
    w1, w2, w3, s1, b1, s2, b2, s3, b3 = params
    N, H, W, C = x.shape
    P = w1.shape[1]
    C4 = w3.shape[1]
    if C != C4:
        raise NotImplementedError(
            "stride / downsample path not implemented (needs inplanes == 4*planes)")
    d = int(dilation)

    cdt = jnp.dtype(compute_dtype) if compute_dtype is not None else jnp.dtype(x.dtype)
    f32 = jnp.float32

    if vmem_limit_bytes is None:
        vmem_limit_bytes = _default_vmem_limit_bytes()

    # Pad W up to a multiple of 8 so (rows, W, C) <-> (rows*W, C) reshapes are
    # layout-free; padded columns are masked to zero in-kernel and sliced off here.
    Wpad = -(-W // 8) * 8
    xc = x.astype(cdt)
    if Wpad != W:
        xc = jnp.pad(xc, ((0, 0), (0, 0), (0, Wpad - W), (0, 0)))

    bh = _pick_block_h(H, Wpad, C, P, C4, d, cdt.itemsize, block_h,
                       vmem_limit_bytes)                 # output rows per grid step
    Hb = H // bh
    ht = _halo_h(bh, d)                                  # halo block height (>= d)
    r = bh // ht
    nb = H // ht                                         # halo blocks along H

    w1c = jnp.asarray(w1, cdt)
    w2c = jnp.asarray(w2, cdt).reshape(3, 3 * P, P)      # (ky, kx*Cin, Cout)
    w3c = jnp.asarray(w3, cdt)

    def vec(v, c):
        return jnp.asarray(v, f32).reshape(1, c)

    s1c, b1c = vec(s1, P), vec(b1, P)
    s2c, b2c = vec(s2, P), vec(b2, P)
    s3c, b3c = vec(s3, C4), vec(b3, C4)

    kernel = functools.partial(_bottleneck_kernel, d, W)

    def build(single_buffer_weights):
        def const_spec(shape):
            nd = len(shape)
            idx = lambda n, h, _nd=nd: (0,) * _nd
            if single_buffer_weights:
                # Constant index_map => double-buffering only wastes VMEM.
                return pl.BlockSpec(shape, idx, pipeline_mode=pl.Buffered(1))
            return pl.BlockSpec(shape, idx)

        in_specs = [
            # main rows (conv path + residual)
            pl.BlockSpec((None, bh, Wpad, C), lambda n, h: (n, h, 0, 0)),
            # bottom halo: ht rows starting at (h+1)*bh (clamped at bottom edge;
            # ignored on the last h step)
            pl.BlockSpec((None, ht, Wpad, C),
                         lambda n, h: (n, jnp.minimum((h + 1) * r, nb - 1), 0, 0)),
            const_spec((C, P)), const_spec((1, P)), const_spec((1, P)),
            const_spec((3, 3 * P, P)), const_spec((1, P)), const_spec((1, P)),
            const_spec((P, C4)), const_spec((1, C4)), const_spec((1, C4)),
        ]
        out_spec = pl.BlockSpec((None, bh, Wpad, C4), lambda n, h: (n, h, 0, 0))

        return pl.pallas_call(
            kernel,
            out_shape=jax.ShapeDtypeStruct((N, H, Wpad, C4), cdt),
            grid=(N, Hb),
            in_specs=in_specs,
            out_specs=out_spec,
            scratch_shapes=[pltpu.VMEM((bh + 2 * d, Wpad + 2 * d, P), cdt)],
            compiler_params=pltpu.CompilerParams(
                # batch "parallel" (v7x 2-TC megacore); h must stay sequential
                # ("arbitrary") for the top-halo carry in the persistent scratch.
                dimension_semantics=("parallel", "arbitrary"),
                vmem_limit_bytes=int(vmem_limit_bytes)),
        )

    args = (xc, xc, w1c, s1c, b1c, w2c, s2c, b2c, w3c, s3c, b3c)
    try:
        out = build(True)(*args)
    except Exception:
        # Fallback if this JAX build rejects pipeline_mode=pl.Buffered(1).
        out = build(False)(*args)

    if Wpad != W:
        out = out[:, :, :W, :]
    return out


def bottleneck_forward(x_nchw, params, dilation=1, block_h=None,
                       compute_dtype=jnp.bfloat16):
    """PyTorch-parity wrapper (NCHW). Prefer the NHWC entry point in an
    NHWC end-to-end model so these transposes stay off the hot path."""
    x = jnp.transpose(x_nchw, (0, 2, 3, 1))
    out = bottleneck_forward_nhwc(x, params, dilation=dilation,
                                  block_h=block_h, compute_dtype=compute_dtype)
    return jnp.transpose(out, (0, 3, 1, 2))


def make_bottleneck_params(w1_oihw, w2_oihw, w3_oihw, bn1, bn2, bn3, eps=1e-5):
    """Convert PyTorch-layout weights + frozen-BN stats into kernel params."""
    w1 = jnp.transpose(w1_oihw[:, :, 0, 0], (1, 0))        # (Cin, P)
    w2 = jnp.transpose(w2_oihw, (2, 3, 1, 0))               # (ky, kx, ci, co)
    w3 = jnp.transpose(w3_oihw[:, :, 0, 0], (1, 0))        # (P, 4P)

    def fuse(bn):
        gamma, beta, mean, var = bn
        scale = gamma / jnp.sqrt(var + eps)
        shift = beta - mean * scale
        return scale.astype(jnp.float32), shift.astype(jnp.float32)

    s1, b1 = fuse(bn1)
    s2, b2 = fuse(bn2)
    s3, b3 = fuse(bn3)
    return (w1, w2, w3, s1, b1, s2, b2, s3, b3)


# ---------------- reference (plain JAX, NCHW like PyTorch) ----------------
def _bn(y, gamma, beta, mean, var, eps=1e-5):
    inv = gamma / jnp.sqrt(var + eps)
    return (y - mean[None, :, None, None]) * inv[None, :, None, None] \
        + beta[None, :, None, None]


def reference_forward(x, w1_t, w2_t, w3_t, bn1, bn2, bn3, dilation=1):
    dn = ('NCHW', 'OIHW', 'NCHW')
    out = lax.conv_general_dilated(x, w1_t, (1, 1), 'VALID', dimension_numbers=dn)
    out = jax.nn.relu(_bn(out, *bn1))
    out = lax.conv_general_dilated(out, w2_t, (1, 1),
                                   [(dilation, dilation), (dilation, dilation)],
                                   rhs_dilation=(dilation, dilation),
                                   dimension_numbers=dn)
    out = jax.nn.relu(_bn(out, *bn2))
    out = lax.conv_general_dilated(out, w3_t, (1, 1), 'VALID', dimension_numbers=dn)
    out = _bn(out, *bn3)
    return jax.nn.relu(out + x)


if __name__ == "__main__":
    # Small shapes consistent with Bottleneck(inplanes=16, planes=4), identity residual.
    N, H, W = 2, 16, 16
    planes = 4
    inplanes = planes * 4

    key = jax.random.PRNGKey(0)
    ks = jax.random.split(key, 9)

    # PyTorch-layout weights (OIHW), deterministic init.
    w1_t = jax.random.normal(ks[0], (planes, inplanes, 1, 1), jnp.float32) * 0.1
    w2_t = jax.random.normal(ks[1], (planes, planes, 3, 3), jnp.float32) * 0.1
    w3_t = jax.random.normal(ks[2], (inplanes, planes, 1, 1), jnp.float32) * 0.1

    def bn_params(k, c):
        k1, k2, k3, k4 = jax.random.split(k, 4)
        gamma = 1.0 + 0.1 * jax.random.normal(k1, (c,), jnp.float32)
        beta = 0.1 * jax.random.normal(k2, (c,), jnp.float32)
        mean = 0.05 * jax.random.normal(k3, (c,), jnp.float32)
        var = 1.0 + jnp.abs(0.1 * jax.random.normal(k4, (c,), jnp.float32))
        return gamma, beta, mean, var

    bn1 = bn_params(ks[3], planes)
    bn2 = bn_params(ks[4], planes)
    bn3 = bn_params(ks[5], inplanes)

    x = jax.random.normal(ks[6], (N, inplanes, H, W), jnp.float32)
    params = make_bottleneck_params(w1_t, w2_t, w3_t, bn1, bn2, bn3)

    ref_d1 = jax.block_until_ready(
        reference_forward(x, w1_t, w2_t, w3_t, bn1, bn2, bn3, dilation=1))

    # f32, dilation=1, two 8-row H tiles -> exercises the halo carry across tiles.
    out_d1 = jax.block_until_ready(
        bottleneck_forward(x, params, dilation=1, block_h=8,
                           compute_dtype=jnp.float32))
    assert out_d1.shape == ref_d1.shape == (N, inplanes, H, W)
    err = float(jnp.max(jnp.abs(out_d1 - ref_d1)))
    assert jnp.allclose(out_d1, ref_d1, rtol=5e-4, atol=5e-4), \
        f"f32 d=1 bh=8 max abs err = {err}"

    # f32, dilation=1, auto-picked block height (single full-image tile).
    out_auto = jax.block_until_ready(
        bottleneck_forward(x, params, dilation=1, compute_dtype=jnp.float32))
    err = float(jnp.max(jnp.abs(out_auto - ref_d1)))
    assert jnp.allclose(out_auto, ref_d1, rtol=5e-4, atol=5e-4), \
        f"f32 d=1 auto-bh max abs err = {err}"

    # f32, dilation=2 with explicit 4-row tiles (dilated halo + carry path).
    out_d2 = jax.block_until_ready(
        bottleneck_forward(x, params, dilation=2, block_h=4,
                           compute_dtype=jnp.float32))
    ref_d2 = jax.block_until_ready(
        reference_forward(x, w1_t, w2_t, w3_t, bn1, bn2, bn3, dilation=2))
    err = float(jnp.max(jnp.abs(out_d2 - ref_d2)))
    assert jnp.allclose(out_d2, ref_d2, rtol=5e-4, atol=5e-4), \
        f"f32 d=2 max abs err = {err}"

    # Default compute dtype (bf16 matmuls, f32 accumulation) vs f32 reference.
    out_bf16 = jax.block_until_ready(
        bottleneck_forward(x, params, dilation=1, block_h=8))
    err = float(jnp.max(jnp.abs(out_bf16.astype(jnp.float32) - ref_d1)))
    assert err < 0.15, f"bf16 max abs err = {err}"

    # Non-multiple-of-8 width (W=12 -> padded to 16 in the wrapper), f32.
    Wn = 12
    xn = jax.random.normal(ks[7], (N, inplanes, H, Wn), jnp.float32)
    out_w12 = jax.block_until_ready(
        bottleneck_forward(xn, params, dilation=1, block_h=8,
                           compute_dtype=jnp.float32))
    ref_w12 = jax.block_until_ready(
        reference_forward(xn, w1_t, w2_t, w3_t, bn1, bn2, bn3, dilation=1))
    err = float(jnp.max(jnp.abs(out_w12 - ref_w12)))
    assert out_w12.shape == ref_w12.shape == (N, inplanes, H, Wn)
    assert jnp.allclose(out_w12, ref_w12, rtol=5e-4, atol=5e-4), \
        f"f32 W=12 max abs err = {err}"

    print("KERNEL_OK")
</pallas_src>

<mosaic_0001>
module attributes {stable_mosaic.version = 11 : i64} {
  func.func @_bottleneck_kernel(%arg0: i32, %arg1: i32, %arg2: memref<1x8x16x16xf32, #tpu.memory_space<vmem>>, %arg3: memref<1x1x16x16xf32, #tpu.memory_space<vmem>>, %arg4: memref<16x4xf32, #tpu.memory_space<vmem>>, %arg5: memref<1x4xf32, #tpu.memory_space<vmem>>, %arg6: memref<1x4xf32, #tpu.memory_space<vmem>>, %arg7: memref<3x12x4xf32, #tpu.memory_space<vmem>>, %arg8: memref<1x4xf32, #tpu.memory_space<vmem>>, %arg9: memref<1x4xf32, #tpu.memory_space<vmem>>, %arg10: memref<4x16xf32, #tpu.memory_space<vmem>>, %arg11: memref<1x16xf32, #tpu.memory_space<vmem>>, %arg12: memref<1x16xf32, #tpu.memory_space<vmem>>, %arg13: memref<1x8x16x16xf32, #tpu.memory_space<vmem>>, %arg14: memref<10x18x4xf32, #tpu.memory_space<vmem>>) attributes {dimension_semantics = [#tpu.dimension_semantics<parallel>, #tpu.dimension_semantics<arbitrary>], iteration_bounds = array<i64: 2, 2>, scalar_prefetch = 0 : i64, scratch_operands = 1 : i64, tpu.core_type = #tpu.core_type<tc>, window_params = [{transform_indices = @transform_0, window_bounds = array<i64: 1, 8, 16, 16>}, {transform_indices = @transform_1, window_bounds = array<i64: 1, 1, 16, 16>}, {pipeline_mode = #tpu.pipeline_mode<synchronous>, transform_indices = @transform_2, window_bounds = array<i64: 16, 4>}, {pipeline_mode = #tpu.pipeline_mode<synchronous>, transform_indices = @transform_3, window_bounds = array<i64: 1, 4>}, {pipeline_mode = #tpu.pipeline_mode<synchronous>, transform_indices = @transform_4, window_bounds = array<i64: 1, 4>}, {pipeline_mode = #tpu.pipeline_mode<synchronous>, transform_indices = @transform_5, window_bounds = array<i64: 3, 12, 4>}, {pipeline_mode = #tpu.pipeline_mode<synchronous>, transform_indices = @transform_6, window_bounds = array<i64: 1, 4>}, {pipeline_mode = #tpu.pipeline_mode<synchronous>, transform_indices = @transform_7, window_bounds = array<i64: 1, 4>}, {pipeline_mode = #tpu.pipeline_mode<synchronous>, transform_indices = @transform_8, window_bounds = array<i64: 4, 16>}, {pipeline_mode = #tpu.pipeline_mode<synchronous>, transform_indices = @transform_9, window_bounds = array<i64: 1, 16>}, {pipeline_mode = #tpu.pipeline_mode<synchronous>, transform_indices = @transform_10, window_bounds = array<i64: 1, 16>}, {transform_indices = @transform_11, window_bounds = array<i64: 1, 8, 16, 16>}]} {
    %c0_i32 = arith.constant 0 : i32
    %0 = arith.cmpi eq, %arg1, %c0_i32 : i32
    %c1_i32 = arith.constant 1 : i32
    %1 = arith.cmpi eq, %arg1, %c1_i32 : i32
    %c0 = arith.constant 0 : index
    %c0_0 = arith.constant 0 : index
    %2 = vector.load %arg4[%c0, %c0_0] : memref<16x4xf32, #tpu.memory_space<vmem>>, vector<16x4xf32>
    %c0_1 = arith.constant 0 : index
    %c0_2 = arith.constant 0 : index
    %3 = vector.load %arg5[%c0_1, %c0_2] : memref<1x4xf32, #tpu.memory_space<vmem>>, vector<1x4xf32>
    %c0_3 = arith.constant 0 : index
    %c0_4 = arith.constant 0 : index
    %4 = vector.load %arg6[%c0_3, %c0_4] : memref<1x4xf32, #tpu.memory_space<vmem>>, vector<1x4xf32>
    %5 = arith.extui %0 : i1 to i32
    %c0_i32_5 = arith.constant 0 : i32
    %6 = arith.cmpi ne, %5, %c0_i32_5 : i32
    scf.if %6 {
      %cst_76 = arith.constant 0.000000e+00 : f32
      %78 = vector.broadcast %cst_76 : f32 to vector<1x18x4xf32>
      %c0_77 = arith.constant 0 : index
      %c0_78 = arith.constant 0 : index
      %c0_79 = arith.constant 0 : index
      %79 = vector.load %arg14[%c0_77, %c0_78, %c0_79] : memref<10x18x4xf32, #tpu.memory_space<vmem>>, vector<1x18x4xf32>
      tpu.vector_store %arg14[%c0_77, %c0_78, %c0_79], %78 {strides = array<i32>} : memref<10x18x4xf32, #tpu.memory_space<vmem>>, vector<1x18x4xf32>,
      %cst_80 = arith.constant 0.000000e+00 : f32
      %80 = vector.broadcast %cst_80 : f32 to vector<10x1x4xf32>
      %c0_81 = arith.constant 0 : index
      %c0_82 = arith.constant 0 : index
      %c0_83 = arith.constant 0 : index
      %81 = vector.load %arg14[%c0_81, %c0_82, %c0_83] : memref<10x18x4xf32, #tpu.memory_space<vmem>>, vector<10x1x4xf32>
      tpu.vector_store %arg14[%c0_81, %c0_82, %c0_83], %80 {strides = array<i32>} : memref<10x18x4xf32, #tpu.memory_space<vmem>>, vector<10x1x4xf32>,
      %cst_84 = arith.constant 0.000000e+00 : f32
      %82 = vector.broadcast %cst_84 : f32 to vector<10x1x4xf32>
      %c0_85 = arith.constant 0 : index
      %c17 = arith.constant 17 : index
      %c0_86 = arith.constant 0 : index
      %83 = vector.load %arg14[%c0_85, %c17, %c0_86] : memref<10x18x4xf32, #tpu.memory_space<vmem>>, vector<10x1x4xf32>
      tpu.vector_store %arg14[%c0_85, %c17, %c0_86], %82 {strides = array<i32>} : memref<10x18x4xf32, #tpu.memory_space<vmem>>, vector<10x1x4xf32>,
    } else {
    }
    %true = arith.constant true
    %7 = arith.xori %0, %true : i1
    %8 = arith.extui %7 : i1 to i32
    %c0_i32_6 = arith.constant 0 : i32
    %9 = arith.cmpi ne, %8, %c0_i32_6 : i32
    scf.if %9 {
      %c8 = arith.constant 8 : index
      %c0_76 = arith.constant 0 : index
      %c0_77 = arith.constant 0 : index
      %78 = vector.load %arg14[%c8, %c0_76, %c0_77] : memref<10x18x4xf32, #tpu.memory_space<vmem>>, vector<1x18x4xf32>
      %c0_78 = arith.constant 0 : index
      %c0_79 = arith.constant 0 : index
      %c0_80 = arith.constant 0 : index
      %79 = vector.load %arg14[%c0_78, %c0_79, %c0_80] : memref<10x18x4xf32, #tpu.memory_space<vmem>>, vector<1x18x4xf32>
      tpu.vector_store %arg14[%c0_78, %c0_79, %c0_80], %78 {strides = array<i32>} : memref<10x18x4xf32, #tpu.memory_space<vmem>>, vector<1x18x4xf32>,
    } else {
    }
    %c0_7 = arith.constant 0 : index
    %c0_8 = arith.constant 0 : index
    %c0_9 = arith.constant 0 : index
    %c0_10 = arith.constant 0 : index
    %10 = vector.load %arg2[%c0_7, %c0_8, %c0_9, %c0_10] : memref<1x8x16x16xf32, #tpu.memory_space<vmem>>, vector<1x8x16x16xf32>
    %11 = vector.shape_cast %10 : vector<1x8x16x16xf32> to vector<8x16x16xf32>
    %12 = vector.shape_cast %11 : vector<8x16x16xf32> to vector<128x16xf32>
    %cst = arith.constant dense<0.000000e+00> : vector<128x4xf32>
    %13 = tpu.matmul %12, %2, %cst {dimension_numbers = #tpu.dot_dimension_numbers<[1], [0], [0], [1], [0, 0, 1, 1], [], []>} : vector<128x16xf32>, vector<16x4xf32>, vector<128x4xf32> -> vector<128x4xf32>
    %14 = vector.broadcast %3 : vector<1x4xf32> to vector<128x4xf32>
    %15 = arith.mulf %13, %14 : vector<128x4xf32>
    %16 = vector.broadcast %4 : vector<1x4xf32> to vector<128x4xf32>
    %17 = arith.addf %15, %16 : vector<128x4xf32>
    %cst_11 = arith.constant 0.000000e+00 : f32
    %18 = vector.broadcast %cst_11 : f32 to vector<128x4xf32>
    %19 = arith.maximumf %17, %18 : vector<128x4xf32>
    %20 = vector.shape_cast %19 : vector<128x4xf32> to vector<8x16x4xf32>
    %c1 = arith.constant 1 : index
    %c1_12 = arith.constant 1 : index
    %c0_13 = arith.constant 0 : index
    %21 = vector.load %arg14[%c1, %c1_12, %c0_13] : memref<10x18x4xf32, #tpu.memory_space<vmem>>, vector<8x16x4xf32>
    tpu.vector_store %arg14[%c1, %c1_12, %c0_13], %20 {strides = array<i32>} : memref<10x18x4xf32, #tpu.memory_space<vmem>>, vector<8x16x4xf32>,
    %22 = arith.extui %1 : i1 to i32
    %c0_i32_14 = arith.constant 0 : i32
    %23 = arith.cmpi ne, %22, %c0_i32_14 : i32
    scf.if %23 {
      %cst_76 = arith.constant 0.000000e+00 : f32
      %78 = vector.broadcast %cst_76 : f32 to vector<1x16x4xf32>
      %c9 = arith.constant 9 : index
      %c1_77 = arith.constant 1 : index
      %c0_78 = arith.constant 0 : index
      %79 = vector.load %arg14[%c9, %c1_77, %c0_78] : memref<10x18x4xf32, #tpu.memory_space<vmem>>, vector<1x16x4xf32>
      tpu.vector_store %arg14[%c9, %c1_77, %c0_78], %78 {strides = array<i32>} : memref<10x18x4xf32, #tpu.memory_space<vmem>>, vector<1x16x4xf32>,
    } else {
    }
    %true_15 = arith.constant true
    %24 = arith.xori %1, %true_15 : i1
    %25 = arith.extui %24 : i1 to i32
    %c0_i32_16 = arith.constant 0 : i32
    %26 = arith.cmpi ne, %25, %c0_i32_16 : i32
    scf.if %26 {
      %c0_76 = arith.constant 0 : index
      %c0_77 = arith.constant 0 : index
      %c0_78 = arith.constant 0 : index
      %c0_79 = arith.constant 0 : index
      %78 = vector.load %arg3[%c0_76, %c0_77, %c0_78, %c0_79] : memref<1x1x16x16xf32, #tpu.memory_space<vmem>>, vector<1x1x16x16xf32>
      %79 = vector.shape_cast %78 : vector<1x1x16x16xf32> to vector<1x16x16xf32>
      %80 = vector.shape_cast %79 : vector<1x16x16xf32> to vector<16x16xf32>
      %cst_80 = arith.constant dense<0.000000e+00> : vector<16x4xf32>
      %81 = tpu.matmul %80, %2, %cst_80 {dimension_numbers = #tpu.dot_dimension_numbers<[1], [0], [0], [1], [0, 0, 1, 1], [], []>} : vector<16x16xf32>, vector<16x4xf32>, vector<16x4xf32> -> vector<16x4xf32>
      %82 = vector.broadcast %3 : vector<1x4xf32> to vector<16x4xf32>
      %83 = arith.mulf %81, %82 : vector<16x4xf32>
      %84 = vector.broadcast %4 : vector<1x4xf32> to vector<16x4xf32>
      %85 = arith.addf %83, %84 : vector<16x4xf32>
      %cst_81 = arith.constant 0.000000e+00 : f32
      %86 = vector.broadcast %cst_81 : f32 to vector<16x4xf32>
      %87 = arith.maximumf %85, %86 : vector<16x4xf32>
      %88 = vector.shape_cast %87 : vector<16x4xf32> to vector<1x16x4xf32>
      %c9 = arith.constant 9 : index
      %c1_82 = arith.constant 1 : index
      %c0_83 = arith.constant 0 : index
      %89 = vector.load %arg14[%c9, %c1_82, %c0_83] : memref<10x18x4xf32, #tpu.memory_space<vmem>>, vector<1x16x4xf32>
      tpu.vector_store %arg14[%c9, %c1_82, %c0_83], %88 {strides = array<i32>} : memref<10x18x4xf32, #tpu.memory_space<vmem>>, vector<1x16x4xf32>,
    } else {
    }
    %c0_17 = arith.constant 0 : index
    %c0_18 = arith.constant 0 : index
    %c0_19 = arith.constant 0 : index
    %27 = vector.load %arg14[%c0_17, %c0_18, %c0_19] : memref<10x18x4xf32, #tpu.memory_space<vmem>>, vector<8x16x4xf32>
    %c0_20 = arith.constant 0 : index
    %c1_21 = arith.constant 1 : index
    %c0_22 = arith.constant 0 : index
    %28 = vector.load %arg14[%c0_20, %c1_21, %c0_22] : memref<10x18x4xf32, #tpu.memory_space<vmem>>, vector<8x16x4xf32>
    %c0_23 = arith.constant 0 : index
    %c2 = arith.constant 2 : index
    %c0_24 = arith.constant 0 : index
    %29 = vector.load %arg14[%c0_23, %c2, %c0_24] : memref<10x18x4xf32, #tpu.memory_space<vmem>>, vector<8x16x4xf32>
    %30 = tpu.concatenate %27, %28, %29 in 2 : vector<8x16x4xf32>, vector<8x16x4xf32>, vector<8x16x4xf32> -> vector<8x16x12xf32>
    %31 = vector.shape_cast %30 : vector<8x16x12xf32> to vector<128x12xf32>
    %c0_25 = arith.constant 0 : index
    %c0_26 = arith.constant 0 : index
    %c0_27 = arith.constant 0 : index
    %32 = vector.load %arg7[%c0_25, %c0_26, %c0_27] : memref<3x12x4xf32, #tpu.memory_space<vmem>>, vector<1x12x4xf32>
    %33 = vector.shape_cast %32 : vector<1x12x4xf32> to vector<12x4xf32>
    %cst_28 = arith.constant dense<0.000000e+00> : vector<128x4xf32>
    %34 = tpu.matmul %31, %33, %cst_28 {dimension_numbers = #tpu.dot_dimension_numbers<[1], [0], [0], [1], [0, 0, 1, 1], [], []>} : vector<128x12xf32>, vector<12x4xf32>, vector<128x4xf32> -> vector<128x4xf32>
    %c1_29 = arith.constant 1 : index
    %c0_30 = arith.constant 0 : index
    %c0_31 = arith.constant 0 : index
    %35 = vector.load %arg14[%c1_29, %c0_30, %c0_31] : memref<10x18x4xf32, #tpu.memory_space<vmem>>, vector<8x16x4xf32>
    %c1_32 = arith.constant 1 : index
    %c1_33 = arith.constant 1 : index
    %c0_34 = arith.constant 0 : index
    %36 = vector.load %arg14[%c1_32, %c1_33, %c0_34] : memref<10x18x4xf32, #tpu.memory_space<vmem>>, vector<8x16x4xf32>
    %c1_35 = arith.constant 1 : index
    %c2_36 = arith.constant 2 : index
    %c0_37 = arith.constant 0 : index
    %37 = vector.load %arg14[%c1_35, %c2_36, %c0_37] : memref<10x18x4xf32, #tpu.memory_space<vmem>>, vector<8x16x4xf32>
    %38 = tpu.concatenate %35, %36, %37 in 2 : vector<8x16x4xf32>, vector<8x16x4xf32>, vector<8x16x4xf32> -> vector<8x16x12xf32>
    %39 = vector.shape_cast %38 : vector<8x16x12xf32> to vector<128x12xf32>
    %c1_38 = arith.constant 1 : index
    %c0_39 = arith.constant 0 : index
    %c0_40 = arith.constant 0 : index
    %40 = vector.load %arg7[%c1_38, %c0_39, %c0_40] : memref<3x12x4xf32, #tpu.memory_space<vmem>>, vector<1x12x4xf32>
    %41 = vector.shape_cast %40 : vector<1x12x4xf32> to vector<12x4xf32>
    %cst_41 = arith.constant dense<0.000000e+00> : vector<128x4xf32>
    %42 = tpu.matmul %39, %41, %cst_41 {dimension_numbers = #tpu.dot_dimension_numbers<[1], [0], [0], [1], [0, 0, 1, 1], [], []>} : vector<128x12xf32>, vector<12x4xf32>, vector<128x4xf32> -> vector<128x4xf32>
    %43 = arith.addf %34, %42 : vector<128x4xf32>
    %c2_42 = arith.constant 2 : index
    %c0_43 = arith.constant 0 : index
    %c0_44 = arith.constant 0 : index
    %44 = vector.load %arg14[%c2_42, %c0_43, %c0_44] : memref<10x18x4xf32, #tpu.memory_space<vmem>>, vector<8x16x4xf32>
    %c2_45 = arith.constant 2 : index
    %c1_46 = arith.constant 1 : index
    %c0_47 = arith.constant 0 : index
    %45 = vector.load %arg14[%c2_45, %c1_46, %c0_47] : memref<10x18x4xf32, #tpu.memory_space<vmem>>, vector<8x16x4xf32>
    %c2_48 = arith.constant 2 : index
    %c2_49 = arith.constant 2 : index
    %c0_50 = arith.constant 0 : index
    %46 = vector.load %arg14[%c2_48, %c2_49, %c0_50] : memref<10x18x4xf32, #tpu.memory_space<vmem>>, vector<8x16x4xf32>
    %47 = tpu.concatenate %44, %45, %46 in 2 : vector<8x16x4xf32>, vector<8x16x4xf32>, vector<8x16x4xf32> -> vector<8x16x12xf32>
    %48 = vector.shape_cast %47 : vector<8x16x12xf32> to vector<128x12xf32>
    %c2_51 = arith.constant 2 : index
    %c0_52 = arith.constant 0 : index
    %c0_53 = arith.constant 0 : index
    %49 = vector.load %arg7[%c2_51, %c0_52, %c0_53] : memref<3x12x4xf32, #tpu.memory_space<vmem>>, vector<1x12x4xf32>
    %50 = vector.shape_cast %49 : vector<1x12x4xf32> to vector<12x4xf32>
    %cst_54 = arith.constant dense<0.000000e+00> : vector<128x4xf32>
    %51 = tpu.matmul %48, %50, %cst_54 {dimension_numbers = #tpu.dot_dimension_numbers<[1], [0], [0], [1], [0, 0, 1, 1], [], []>} : vector<128x12xf32>, vector<12x4xf32>, vector<128x4xf32> -> vector<128x4xf32>
    %52 = arith.addf %43, %51 : vector<128x4xf32>
    %c0_55 = arith.constant 0 : index
    %c0_56 = arith.constant 0 : index
    %53 = vector.load %arg8[%c0_55, %c0_56] : memref<1x4xf32, #tpu.memory_space<vmem>>, vector<1x4xf32>
    %54 = vector.broadcast %53 : vector<1x4xf32> to vector<128x4xf32>
    %55 = arith.mulf %52, %54 : vector<128x4xf32>
    %c0_57 = arith.constant 0 : index
    %c0_58 = arith.constant 0 : index
    %56 = vector.load %arg9[%c0_57, %c0_58] : memref<1x4xf32, #tpu.memory_space<vmem>>, vector<1x4xf32>
    %57 = vector.broadcast %56 : vector<1x4xf32> to vector<128x4xf32>
    %58 = arith.addf %55, %57 : vector<128x4xf32>
    %cst_59 = arith.constant 0.000000e+00 : f32
    %59 = vector.broadcast %cst_59 : f32 to vector<128x4xf32>
    %60 = arith.maximumf %58, %59 : vector<128x4xf32>
    %c0_60 = arith.constant 0 : index
    %c0_61 = arith.constant 0 : index
    %61 = vector.load %arg10[%c0_60, %c0_61] : memref<4x16xf32, #tpu.memory_space<vmem>>, vector<4x16xf32>
    %cst_62 = arith.constant dense<0.000000e+00> : vector<128x16xf32>
    %62 = tpu.matmul %60, %61, %cst_62 {dimension_numbers = #tpu.dot_dimension_numbers<[1], [0], [0], [1], [0, 0, 1, 1], [], []>} : vector<128x4xf32>, vector<4x16xf32>, vector<128x16xf32> -> vector<128x16xf32>
    %c0_63 = arith.constant 0 : index
    %c0_64 = arith.constant 0 : index
    %63 = vector.load %arg11[%c0_63, %c0_64] : memref<1x16xf32, #tpu.memory_space<vmem>>, vector<1x16xf32>
    %64 = vector.broadcast %63 : vector<1x16xf32> to vector<128x16xf32>
    %65 = arith.mulf %62, %64 : vector<128x16xf32>
    %c0_65 = arith.constant 0 : index
    %c0_66 = arith.constant 0 : index
    %66 = vector.load %arg12[%c0_65, %c0_66] : memref<1x16xf32, #tpu.memory_space<vmem>>, vector<1x16xf32>
    %67 = vector.broadcast %66 : vector<1x16xf32> to vector<128x16xf32>
    %68 = arith.addf %65, %67 : vector<128x16xf32>
    %69 = vector.shape_cast %68 : vector<128x16xf32> to vector<8x16x16xf32>
    %c0_67 = arith.constant 0 : index
    %c0_68 = arith.constant 0 : index
    %c0_69 = arith.constant 0 : index
    %c0_70 = arith.constant 0 : index
    %70 = vector.load %arg2[%c0_67, %c0_68, %c0_69, %c0_70] : memref<1x8x16x16xf32, #tpu.memory_space<vmem>>, vector<1x8x16x16xf32>
    %71 = vector.shape_cast %70 : vector<1x8x16x16xf32> to vector<8x16x16xf32>
    %72 = arith.addf %69, %71 : vector<8x16x16xf32>
    %cst_71 = arith.constant 0.000000e+00 : f32
    %73 = vector.broadcast %cst_71 : f32 to vector<8x16x16xf32>
    %74 = arith.maximumf %72, %73 : vector<8x16x16xf32>
    %c0_72 = arith.constant 0 : index
    %c0_73 = arith.constant 0 : index
    %c0_74 = arith.constant 0 : index
    %c0_75 = arith.constant 0 : index
    %75 = vector.load %arg13[%c0_72, %c0_73, %c0_74, %c0_75] : memref<1x8x16x16xf32, #tpu.memory_space<vmem>>, vector<1x8x16x16xf32>
    %76 = vector.shape_cast %75 : vector<1x8x16x16xf32> to vector<8x16x16xf32>
    %77 = vector.shape_cast %74 : vector<8x16x16xf32> to vector<1x8x16x16xf32>
    tpu.vector_store %arg13[%c0_72, %c0_73, %c0_74, %c0_75], %77 {strides = array<i32>} : memref<1x8x16x16xf32, #tpu.memory_space<vmem>>, vector<1x8x16x16xf32>,
    return
  }
  func.func @transform_0(%arg0: i32, %arg1: i32) -> (i32, i32, i32, i32) {
    %c0_i32 = arith.constant 0 : i32
    %c0_i32_0 = arith.constant 0 : i32
    %c0_i32_1 = arith.constant 0 : i32
    return %arg0, %arg1, %c0_i32, %c0_i32_0 : i32, i32, i32, i32
  }
  func.func @transform_1(%arg0: i32, %arg1: i32) -> (i32, i32, i32, i32) {
    %c1_i32 = arith.constant 1 : i32
    %0 = arith.addi %arg1, %c1_i32 : i32
    %c8_i32 = arith.constant 8 : i32
    %1 = arith.muli %0, %c8_i32 : i32
    %c15_i32 = arith.constant 15 : i32
    %2 = arith.minsi %1, %c15_i32 : i32
    %c0_i32 = arith.constant 0 : i32
    %c0_i32_0 = arith.constant 0 : i32
    %c0_i32_1 = arith.constant 0 : i32
    return %arg0, %2, %c0_i32, %c0_i32_0 : i32, i32, i32, i32
  }
  func.func @transform_2(%arg0: i32, %arg1: i32) -> (i32, i32) {
    %c0_i32 = arith.constant 0 : i32
    %c0_i32_0 = arith.constant 0 : i32
    %c0_i32_1 = arith.constant 0 : i32
    return %c0_i32, %c0_i32_0 : i32, i32
  }
  func.func @transform_3(%arg0: i32, %arg1: i32) -> (i32, i32) {
    %c0_i32 = arith.constant 0 : i32
    %c0_i32_0 = arith.constant 0 : i32
    %c0_i32_1 = arith.constant 0 : i32
    return %c0_i32, %c0_i32_0 : i32, i32
  }
  func.func @transform_4(%arg0: i32, %arg1: i32) -> (i32, i32) {
    %c0_i32 = arith.constant 0 : i32
    %c0_i32_0 = arith.constant 0 : i32
    %c0_i32_1 = arith.constant 0 : i32
    return %c0_i32, %c0_i32_0 : i32, i32
  }
  func.func @transform_5(%arg0: i32, %arg1: i32) -> (i32, i32, i32) {
    %c0_i32 = arith.constant 0 : i32
    %c0_i32_0 = arith.constant 0 : i32
    %c0_i32_1 = arith.constant 0 : i32
    %c0_i32_2 = arith.constant 0 : i32
    return %c0_i32, %c0_i32_0, %c0_i32_1 : i32, i32, i32
  }
  func.func @transform_6(%arg0: i32, %arg1: i32) -> (i32, i32) {
    %c0_i32 = arith.constant 0 : i32
    %c0_i32_0 = arith.constant 0 : i32
    %c0_i32_1 = arith.constant 0 : i32
    return %c0_i32, %c0_i32_0 : i32, i32
  }
  func.func @transform_7(%arg0: i32, %arg1: i32) -> (i32, i32) {
    %c0_i32 = arith.constant 0 : i32
    %c0_i32_0 = arith.constant 0 : i32
    %c0_i32_1 = arith.constant 0 : i32
    return %c0_i32, %c0_i32_0 : i32, i32
  }
  func.func @transform_8(%arg0: i32, %arg1: i32) -> (i32, i32) {
    %c0_i32 = arith.constant 0 : i32
    %c0_i32_0 = arith.constant 0 : i32
    %c0_i32_1 = arith.constant 0 : i32
    return %c0_i32, %c0_i32_0 : i32, i32
  }
  func.func @transform_9(%arg0: i32, %arg1: i32) -> (i32, i32) {
    %c0_i32 = arith.constant 0 : i32
    %c0_i32_0 = arith.constant 0 : i32
    %c0_i32_1 = arith.constant 0 : i32
    return %c0_i32, %c0_i32_0 : i32, i32
  }
  func.func @transform_10(%arg0: i32, %arg1: i32) -> (i32, i32) {
    %c0_i32 = arith.constant 0 : i32
    %c0_i32_0 = arith.constant 0 : i32
    %c0_i32_1 = arith.constant 0 : i32
    return %c0_i32, %c0_i32_0 : i32, i32
  }
  func.func @transform_11(%arg0: i32, %arg1: i32) -> (i32, i32, i32, i32) {
    %c0_i32 = arith.constant 0 : i32
    %c0_i32_0 = arith.constant 0 : i32
    %c0_i32_1 = arith.constant 0 : i32
    return %arg0, %arg1, %c0_i32, %c0_i32_0 : i32, i32, i32, i32
  }
}

module attributes {stable_mosaic.version = 11 : i64} {
  func.func @_bottleneck_kernel(%arg0: i32, %arg1: i32, %arg2: memref<1x8x16x16xf32, #tpu.memory_space<vmem>>, %arg3: memref<1x1x16x16xf32, #tpu.memory_space<vmem>>, %arg4: memref<16x4xf32, #tpu.memory_space<vmem>>, %arg5: memref<1x4xf32, #tpu.memory_space<vmem>>, %arg6: memref<1x4xf32, #tpu.memory_space<vmem>>, %arg7: memref<3x12x4xf32, #tpu.memory_space<vmem>>, %arg8: memref<1x4xf32, #tpu.memory_space<vmem>>, %arg9: memref<1x4xf32, #tpu.memory_space<vmem>>, %arg10: memref<4x16xf32, #tpu.memory_space<vmem>>, %arg11: memref<1x16xf32, #tpu.memory_space<vmem>>, %arg12: memref<1x16xf32, #tpu.memory_space<vmem>>, %arg13: memref<1x8x16x16xf32, #tpu.memory_space<vmem>>, %arg14: memref<10x18x4xf32, #tpu.memory_space<vmem>>) attributes {dimension_semantics = [#tpu.dimension_semantics<parallel>, #tpu.dimension_semantics<arbitrary>], iteration_bounds = array<i64: 2, 2>, scalar_prefetch = 0 : i64, scratch_operands = 1 : i64, tpu.core_type = #tpu.core_type<tc>, window_params = [{transform_indices = @transform_0, window_bounds = array<i64: 1, 8, 16, 16>}, {transform_indices = @transform_1, window_bounds = array<i64: 1, 1, 16, 16>}, {pipeline_mode = #tpu.pipeline_mode<synchronous>, transform_indices = @transform_2, window_bounds = array<i64: 16, 4>}, {pipeline_mode = #tpu.pipeline_mode<synchronous>, transform_indices = @transform_3, window_bounds = array<i64: 1, 4>}, {pipeline_mode = #tpu.pipeline_mode<synchronous>, transform_indices = @transform_4, window_bounds = array<i64: 1, 4>}, {pipeline_mode = #tpu.pipeline_mode<synchronous>, transform_indices = @transform_5, window_bounds = array<i64: 3, 12, 4>}, {pipeline_mode = #tpu.pipeline_mode<synchronous>, transform_indices = @transform_6, window_bounds = array<i64: 1, 4>}, {pipeline_mode = #tpu.pipeline_mode<synchronous>, transform_indices = @transform_7, window_bounds = array<i64: 1, 4>}, {pipeline_mode = #tpu.pipeline_mode<synchronous>, transform_indices = @transform_8, window_bounds = array<i64: 4, 16>}, {pipeline_mode = #tpu.pipeline_mode<synchronous>, transform_indices = @transform_9, window_bounds = array<i64: 1, 16>}, {pipeline_mode = #tpu.pipeline_mode<synchronous>, transform_indices = @transform_10, window_bounds = array<i64: 1, 16>}, {transform_indices = @transform_11, window_bounds = array<i64: 1, 8, 16, 16>}]} {
    %c0_i32 = arith.constant 0 : i32
    %0 = arith.cmpi eq, %arg1, %c0_i32 : i32
    %c1_i32 = arith.constant 1 : i32
    %1 = arith.cmpi eq, %arg1, %c1_i32 : i32
    %c0 = arith.constant 0 : index
    %c0_0 = arith.constant 0 : index
    %2 = vector.load %arg4[%c0, %c0_0] : memref<16x4xf32, #tpu.memory_space<vmem>>, vector<16x4xf32>
    %c0_1 = arith.constant 0 : index
    %c0_2 = arith.constant 0 : index
    %3 = vector.load %arg5[%c0_1, %c0_2] : memref<1x4xf32, #tpu.memory_space<vmem>>, vector<1x4xf32>
    %c0_3 = arith.constant 0 : index
    %c0_4 = arith.constant 0 : index
    %4 = vector.load %arg6[%c0_3, %c0_4] : memref<1x4xf32, #tpu.memory_space<vmem>>, vector<1x4xf32>
    %5 = arith.extui %0 : i1 to i32
    %c0_i32_5 = arith.constant 0 : i32
    %6 = arith.cmpi ne, %5, %c0_i32_5 : i32
    scf.if %6 {
      %cst_76 = arith.constant 0.000000e+00 : f32
      %78 = vector.broadcast %cst_76 : f32 to vector<1x18x4xf32>
      %c0_77 = arith.constant 0 : index
      %c0_78 = arith.constant 0 : index
      %c0_79 = arith.constant 0 : index
      %79 = vector.load %arg14[%c0_77, %c0_78, %c0_79] : memref<10x18x4xf32, #tpu.memory_space<vmem>>, vector<1x18x4xf32>
      tpu.vector_store %arg14[%c0_77, %c0_78, %c0_79], %78 {strides = array<i32>} : memref<10x18x4xf32, #tpu.memory_space<vmem>>, vector<1x18x4xf32>,
      %cst_80 = arith.constant 0.000000e+00 : f32
      %80 = vector.broadcast %cst_80 : f32 to vector<10x1x4xf32>
      %c0_81 = arith.constant 0 : index
      %c0_82 = arith.constant 0 : index
      %c0_83 = arith.constant 0 : index
      %81 = vector.load %arg14[%c0_81, %c0_82, %c0_83] : memref<10x18x4xf32, #tpu.memory_space<vmem>>, vector<10x1x4xf32>
      tpu.vector_store %arg14[%c0_81, %c0_82, %c0_83], %80 {strides = array<i32>} : memref<10x18x4xf32, #tpu.memory_space<vmem>>, vector<10x1x4xf32>,
      %cst_84 = arith.constant 0.000000e+00 : f32
      %82 = vector.broadcast %cst_84 : f32 to vector<10x1x4xf32>
      %c0_85 = arith.constant 0 : index
      %c17 = arith.constant 17 : index
      %c0_86 = arith.constant 0 : index
      %83 = vector.load %arg14[%c0_85, %c17, %c0_86] : memref<10x18x4xf32, #tpu.memory_space<vmem>>, vector<10x1x4xf32>
      tpu.vector_store %arg14[%c0_85, %c17, %c0_86], %82 {strides = array<i32>} : memref<10x18x4xf32, #tpu.memory_space<vmem>>, vector<10x1x4xf32>,
    } else {
    }
    %true = arith.constant true
    %7 = arith.xori %0, %true : i1
    %8 = arith.extui %7 : i1 to i32
    %c0_i32_6 = arith.constant 0 : i32
    %9 = arith.cmpi ne, %8, %c0_i32_6 : i32
    scf.if %9 {
      %c8 = arith.constant 8 : index
      %c0_76 = arith.constant 0 : index
      %c0_77 = arith.constant 0 : index
      %78 = vector.load %arg14[%c8, %c0_76, %c0_77] : memref<10x18x4xf32, #tpu.memory_space<vmem>>, vector<1x18x4xf32>
      %c0_78 = arith.constant 0 : index
      %c0_79 = arith.constant 0 : index
      %c0_80 = arith.constant 0 : index
      %79 = vector.load %arg14[%c0_78, %c0_79, %c0_80] : memref<10x18x4xf32, #tpu.memory_space<vmem>>, vector<1x18x4xf32>
      tpu.vector_store %arg14[%c0_78, %c0_79, %c0_80], %78 {strides = array<i32>} : memref<10x18x4xf32, #tpu.memory_space<vmem>>, vector<1x18x4xf32>,
    } else {
    }
    %c0_7 = arith.constant 0 : index
    %c0_8 = arith.constant 0 : index
    %c0_9 = arith.constant 0 : index
    %c0_10 = arith.constant 0 : index
    %10 = vector.load %arg2[%c0_7, %c0_8, %c0_9, %c0_10] : memref<1x8x16x16xf32, #tpu.memory_space<vmem>>, vector<1x8x16x16xf32>
    %11 = vector.shape_cast %10 : vector<1x8x16x16xf32> to vector<8x16x16xf32>
    %12 = vector.shape_cast %11 : vector<8x16x16xf32> to vector<128x16xf32>
    %cst = arith.constant dense<0.000000e+00> : vector<128x4xf32>
    %13 = tpu.matmul %12, %2, %cst {dimension_numbers = #tpu.dot_dimension_numbers<[1], [0], [0], [1], [0, 0, 1, 1], [], []>} : vector<128x16xf32>, vector<16x4xf32>, vector<128x4xf32> -> vector<128x4xf32>
    %14 = vector.broadcast %3 : vector<1x4xf32> to vector<128x4xf32>
    %15 = arith.mulf %13, %14 : vector<128x4xf32>
    %16 = vector.broadcast %4 : vector<1x4xf32> to vector<128x4xf32>
    %17 = arith.addf %15, %16 : vector<128x4xf32>
    %cst_11 = arith.constant 0.000000e+00 : f32
    %18 = vector.broadcast %cst_11 : f32 to vector<128x4xf32>
    %19 = arith.maximumf %17, %18 : vector<128x4xf32>
    %20 = vector.shape_cast %19 : vector<128x4xf32> to vector<8x16x4xf32>
    %c1 = arith.constant 1 : index
    %c1_12 = arith.constant 1 : index
    %c0_13 = arith.constant 0 : index
    %21 = vector.load %arg14[%c1, %c1_12, %c0_13] : memref<10x18x4xf32, #tpu.memory_space<vmem>>, vector<8x16x4xf32>
    tpu.vector_store %arg14[%c1, %c1_12, %c0_13], %20 {strides = array<i32>} : memref<10x18x4xf32, #tpu.memory_space<vmem>>, vector<8x16x4xf32>,
    %22 = arith.extui %1 : i1 to i32
    %c0_i32_14 = arith.constant 0 : i32
    %23 = arith.cmpi ne, %22, %c0_i32_14 : i32
    scf.if %23 {
      %cst_76 = arith.constant 0.000000e+00 : f32
      %78 = vector.broadcast %cst_76 : f32 to vector<1x16x4xf32>
      %c9 = arith.constant 9 : index
      %c1_77 = arith.constant 1 : index
      %c0_78 = arith.constant 0 : index
      %79 = vector.load %arg14[%c9, %c1_77, %c0_78] : memref<10x18x4xf32, #tpu.memory_space<vmem>>, vector<1x16x4xf32>
      tpu.vector_store %arg14[%c9, %c1_77, %c0_78], %78 {strides = array<i32>} : memref<10x18x4xf32, #tpu.memory_space<vmem>>, vector<1x16x4xf32>,
    } else {
    }
    %true_15 = arith.constant true
    %24 = arith.xori %1, %true_15 : i1
    %25 = arith.extui %24 : i1 to i32
    %c0_i32_16 = arith.constant 0 : i32
    %26 = arith.cmpi ne, %25, %c0_i32_16 : i32
    scf.if %26 {
      %c0_76 = arith.constant 0 : index
      %c0_77 = arith.constant 0 : index
      %c0_78 = arith.constant 0 : index
      %c0_79 = arith.constant 0 : index
      %78 = vector.load %arg3[%c0_76, %c0_77, %c0_78, %c0_79] : memref<1x1x16x16xf32, #tpu.memory_space<vmem>>, vector<1x1x16x16xf32>
      %79 = vector.shape_cast %78 : vector<1x1x16x16xf32> to vector<1x16x16xf32>
      %80 = vector.shape_cast %79 : vector<1x16x16xf32> to vector<16x16xf32>
      %cst_80 = arith.constant dense<0.000000e+00> : vector<16x4xf32>
      %81 = tpu.matmul %80, %2, %cst_80 {dimension_numbers = #tpu.dot_dimension_numbers<[1], [0], [0], [1], [0, 0, 1, 1], [], []>} : vector<16x16xf32>, vector<16x4xf32>, vector<16x4xf32> -> vector<16x4xf32>
      %82 = vector.broadcast %3 : vector<1x4xf32> to vector<16x4xf32>
      %83 = arith.mulf %81, %82 : vector<16x4xf32>
      %84 = vector.broadcast %4 : vector<1x4xf32> to vector<16x4xf32>
      %85 = arith.addf %83, %84 : vector<16x4xf32>
      %cst_81 = arith.constant 0.000000e+00 : f32
      %86 = vector.broadcast %cst_81 : f32 to vector<16x4xf32>
      %87 = arith.maximumf %85, %86 : vector<16x4xf32>
      %88 = vector.shape_cast %87 : vector<16x4xf32> to vector<1x16x4xf32>
      %c9 = arith.constant 9 : index
      %c1_82 = arith.constant 1 : index
      %c0_83 = arith.constant 0 : index
      %89 = vector.load %arg14[%c9, %c1_82, %c0_83] : memref<10x18x4xf32, #tpu.memory_space<vmem>>, vector<1x16x4xf32>
      tpu.vector_store %arg14[%c9, %c1_82, %c0_83], %88 {strides = array<i32>} : memref<10x18x4xf32, #tpu.memory_space<vmem>>, vector<1x16x4xf32>,
    } else {
    }
    %c0_17 = arith.constant 0 : index
    %c0_18 = arith.constant 0 : index
    %c0_19 = arith.constant 0 : index
    %27 = vector.load %arg14[%c0_17, %c0_18, %c0_19] : memref<10x18x4xf32, #tpu.memory_space<vmem>>, vector<8x16x4xf32>
    %c0_20 = arith.constant 0 : index
    %c1_21 = arith.constant 1 : index
    %c0_22 = arith.constant 0 : index
    %28 = vector.load %arg14[%c0_20, %c1_21, %c0_22] : memref<10x18x4xf32, #tpu.memory_space<vmem>>, vector<8x16x4xf32>
    %c0_23 = arith.constant 0 : index
    %c2 = arith.constant 2 : index
    %c0_24 = arith.constant 0 : index
    %29 = vector.load %arg14[%c0_23, %c2, %c0_24] : memref<10x18x4xf32, #tpu.memory_space<vmem>>, vector<8x16x4xf32>
    %30 = tpu.concatenate %27, %28, %29 in 2 : vector<8x16x4xf32>, vector<8x16x4xf32>, vector<8x16x4xf32> -> vector<8x16x12xf32>
    %31 = vector.shape_cast %30 : vector<8x16x12xf32> to vector<128x12xf32>
    %c0_25 = arith.constant 0 : index
    %c0_26 = arith.constant 0 : index
    %c0_27 = arith.constant 0 : index
    %32 = vector.load %arg7[%c0_25, %c0_26, %c0_27] : memref<3x12x4xf32, #tpu.memory_space<vmem>>, vector<1x12x4xf32>
    %33 = vector.shape_cast %32 : vector<1x12x4xf32> to vector<12x4xf32>
    %cst_28 = arith.constant dense<0.000000e+00> : vector<128x4xf32>
    %34 = tpu.matmul %31, %33, %cst_28 {dimension_numbers = #tpu.dot_dimension_numbers<[1], [0], [0], [1], [0, 0, 1, 1], [], []>} : vector<128x12xf32>, vector<12x4xf32>, vector<128x4xf32> -> vector<128x4xf32>
    %c1_29 = arith.constant 1 : index
    %c0_30 = arith.constant 0 : index
    %c0_31 = arith.constant 0 : index
    %35 = vector.load %arg14[%c1_29, %c0_30, %c0_31] : memref<10x18x4xf32, #tpu.memory_space<vmem>>, vector<8x16x4xf32>
    %c1_32 = arith.constant 1 : index
    %c1_33 = arith.constant 1 : index
    %c0_34 = arith.constant 0 : index
    %36 = vector.load %arg14[%c1_32, %c1_33, %c0_34] : memref<10x18x4xf32, #tpu.memory_space<vmem>>, vector<8x16x4xf32>
    %c1_35 = arith.constant 1 : index
    %c2_36 = arith.constant 2 : index
    %c0_37 = arith.constant 0 : index
    %37 = vector.load %arg14[%c1_35, %c2_36, %c0_37] : memref<10x18x4xf32, #tpu.memory_space<vmem>>, vector<8x16x4xf32>
    %38 = tpu.concatenate %35, %36, %37 in 2 : vector<8x16x4xf32>, vector<8x16x4xf32>, vector<8x16x4xf32> -> vector<8x16x12xf32>
    %39 = vector.shape_cast %38 : vector<8x16x12xf32> to vector<128x12xf32>
    %c1_38 = arith.constant 1 : index
    %c0_39 = arith.constant 0 : index
    %c0_40 = arith.constant 0 : index
    %40 = vector.load %arg7[%c1_38, %c0_39, %c0_40] : memref<3x12x4xf32, #tpu.memory_space<vmem>>, vector<1x12x4xf32>
    %41 = vector.shape_cast %40 : vector<1x12x4xf32> to vector<12x4xf32>
    %cst_41 = arith.constant dense<0.000000e+00> : vector<128x4xf32>
    %42 = tpu.matmul %39, %41, %cst_41 {dimension_numbers = #tpu.dot_dimension_numbers<[1], [0], [0], [1], [0, 0, 1, 1], [], []>} : vector<128x12xf32>, vector<12x4xf32>, vector<128x4xf32> -> vector<128x4xf32>
    %43 = arith.addf %34, %42 : vector<128x4xf32>
    %c2_42 = arith.constant 2 : index
    %c0_43 = arith.constant 0 : index
    %c0_44 = arith.constant 0 : index
    %44 = vector.load %arg14[%c2_42, %c0_43, %c0_44] : memref<10x18x4xf32, #tpu.memory_space<vmem>>, vector<8x16x4xf32>
    %c2_45 = arith.constant 2 : index
    %c1_46 = arith.constant 1 : index
    %c0_47 = arith.constant 0 : index
    %45 = vector.load %arg14[%c2_45, %c1_46, %c0_47] : memref<10x18x4xf32, #tpu.memory_space<vmem>>, vector<8x16x4xf32>
    %c2_48 = arith.constant 2 : index
    %c2_49 = arith.constant 2 : index
    %c0_50 = arith.constant 0 : index
    %46 = vector.load %arg14[%c2_48, %c2_49, %c0_50] : memref<10x18x4xf32, #tpu.memory_space<vmem>>, vector<8x16x4xf32>
    %47 = tpu.concatenate %44, %45, %46 in 2 : vector<8x16x4xf32>, vector<8x16x4xf32>, vector<8x16x4xf32> -> vector<8x16x12xf32>
    %48 = vector.shape_cast %47 : vector<8x16x12xf32> to vector<128x12xf32>
    %c2_51 = arith.constant 2 : index
    %c0_52 = arith.constant 0 : index
    %c0_53 = arith.constant 0 : index
    %49 = vector.load %arg7[%c2_51, %c0_52, %c0_53] : memref<3x12x4xf32, #tpu.memory_space<vmem>>, vector<1x12x4xf32>
    %50 = vector.shape_cast %49 : vector<1x12x4xf32> to vector<12x4xf32>
    %cst_54 = arith.constant dense<0.000000e+00> : vector<128x4xf32>
    %51 = tpu.matmul %48, %50, %cst_54 {dimension_numbers = #tpu.dot_dimension_numbers<[1], [0], [0], [1], [0, 0, 1, 1], [], []>} : vector<128x12xf32>, vector<12x4xf32>, vector<128x4xf32> -> vector<128x4xf32>
    %52 = arith.addf %43, %51 : vector<128x4xf32>
    %c0_55 = arith.constant 0 : index
    %c0_56 = arith.constant 0 : index
    %53 = vector.load %arg8[%c0_55, %c0_56] : memref<1x4xf32, #tpu.memory_space<vmem>>, vector<1x4xf32>
    %54 = vector.broadcast %53 : vector<1x4xf32> to vector<128x4xf32>
    %55 = arith.mulf %52, %54 : vector<128x4xf32>
    %c0_57 = arith.constant 0 : index
    %c0_58 = arith.constant 0 : index
    %56 = vector.load %arg9[%c0_57, %c0_58] : memref<1x4xf32, #tpu.memory_space<vmem>>, vector<1x4xf32>
    %57 = vector.broadcast %56 : vector<1x4xf32> to vector<128x4xf32>
    %58 = arith.addf %55, %57 : vector<128x4xf32>
    %cst_59 = arith.constant 0.000000e+00 : f32
    %59 = vector.broadcast %cst_59 : f32 to vector<128x4xf32>
    %60 = arith.maximumf %58, %59 : vector<128x4xf32>
    %c0_60 = arith.constant 0 : index
    %c0_61 = arith.constant 0 : index
    %61 = vector.load %arg10[%c0_60, %c0_61] : memref<4x16xf32, #tpu.memory_space<vmem>>, vector<4x16xf32>
    %cst_62 = arith.constant dense<0.000000e+00> : vector<128x16xf32>
    %62 = tpu.matmul %60, %61, %cst_62 {dimension_numbers = #tpu.dot_dimension_numbers<[1], [0], [0], [1], [0, 0, 1, 1], [], []>} : vector<128x4xf32>, vector<4x16xf32>, vector<128x16xf32> -> vector<128x16xf32>
    %c0_63 = arith.constant 0 : index
    %c0_64 = arith.constant 0 : index
    %63 = vector.load %arg11[%c0_63, %c0_64] : memref<1x16xf32, #tpu.memory_space<vmem>>, vector<1x16xf32>
    %64 = vector.broadcast %63 : vector<1x16xf32> to vector<128x16xf32>
    %65 = arith.mulf %62, %64 : vector<128x16xf32>
    %c0_65 = arith.constant 0 : index
    %c0_66 = arith.constant 0 : index
    %66 = vector.load %arg12[%c0_65, %c0_66] : memref<1x16xf32, #tpu.memory_space<vmem>>, vector<1x16xf32>
    %67 = vector.broadcast %66 : vector<1x16xf32> to vector<128x16xf32>
    %68 = arith.addf %65, %67 : vector<128x16xf32>
    %69 = vector.shape_cast %68 : vector<128x16xf32> to vector<8x16x16xf32>
    %c0_67 = arith.constant 0 : index
    %c0_68 = arith.constant 0 : index
    %c0_69 = arith.constant 0 : index
    %c0_70 = arith.constant 0 : index
    %70 = vector.load %arg2[%c0_67, %c0_68, %c0_69, %c0_70] : memref<1x8x16x16xf32, #tpu.memory_space<vmem>>, vector<1x8x16x16xf32>
    %71 = vector.shape_cast %70 : vector<1x8x16x16xf32> to vector<8x16x16xf32>
    %72 = arith.addf %69, %71 : vector<8x16x16xf32>
    %cst_71 = arith.constant 0.000000e+00 : f32
    %73 = vector.broadcast %cst_71 : f32 to vector<8x16x16xf32>
    %74 = arith.maximumf %72, %73 : vector<8x16x16xf32>
    %c0_72 = arith.constant 0 : index
    %c0_73 = arith.constant 0 : index
    %c0_74 = arith.constant 0 : index
    %c0_75 = arith.constant 0 : index
    %75 = vector.load %arg13[%c0_72, %c0_73, %c0_74, %c0_75] : memref<1x8x16x16xf32, #tpu.memory_space<vmem>>, vector<1x8x16x16xf32>
    %76 = vector.shape_cast %75 : vector<1x8x16x16xf32> to vector<8x16x16xf32>
    %77 = vector.shape_cast %74 : vector<8x16x16xf32> to vector<1x8x16x16xf32>
    tpu.vector_store %arg13[%c0_72, %c0_73, %c0_74, %c0_75], %77 {strides = array<i32>} : memref<1x8x16x16xf32, #tpu.memory_space<vmem>>, vector<1x8x16x16xf32>,
    return
  }
  func.func @transform_0(%arg0: i32, %arg1: i32) -> (i32, i32, i32, i32) {
    %c0_i32 = arith.constant 0 : i32
    %c0_i32_0 = arith.constant 0 : i32
    %c0_i32_1 = arith.constant 0 : i32
    return %arg0, %arg1, %c0_i32, %c0_i32_0 : i32, i32, i32, i32
  }
  func.func @transform_1(%arg0: i32, %arg1: i32) -> (i32, i32, i32, i32) {
    %c1_i32 = arith.constant 1 : i32
    %0 = arith.addi %arg1, %c1_i32 : i32
    %c8_i32 = arith.constant 8 : i32
    %1 = arith.muli %0, %c8_i32 : i32
    %c15_i32 = arith.constant 15 : i32
    %2 = arith.minsi %1, %c15_i32 : i32
    %c0_i32 = arith.constant 0 : i32
    %c0_i32_0 = arith.constant 0 : i32
    %c0_i32_1 = arith.constant 0 : i32
    return %arg0, %2, %c0_i32, %c0_i32_0 : i32, i32, i32, i32
  }
  func.func @transform_2(%arg0: i32, %arg1: i32) -> (i32, i32) {
    %c0_i32 = arith.constant 0 : i32
    %c0_i32_0 = arith.constant 0 : i32
    %c0_i32_1 = arith.constant 0 : i32
    return %c0_i32, %c0_i32_0 : i32, i32
  }
  func.func @transform_3(%arg0: i32, %arg1: i32) -> (i32, i32) {
    %c0_i32 = arith.constant 0 : i32
    %c0_i32_0 = arith.constant 0 : i32
    %c0_i32_1 = arith.constant 0 : i32
    return %c0_i32, %c0_i32_0 : i32, i32
  }
  func.func @transform_4(%arg0: i32, %arg1: i32) -> (i32, i32) {
    %c0_i32 = arith.constant 0 : i32
    %c0_i32_0 = arith.constant 0 : i32
    %c0_i32_1 = arith.constant 0 : i32
    return %c0_i32, %c0_i32_0 : i32, i32
  }
  func.func @transform_5(%arg0: i32, %arg1: i32) -> (i32, i32, i32) {
    %c0_i32 = arith.constant 0 : i32
    %c0_i32_0 = arith.constant 0 : i32
    %c0_i32_1 = arith.constant 0 : i32
    %c0_i32_2 = arith.constant 0 : i32
    return %c0_i32, %c0_i32_0, %c0_i32_1 : i32, i32, i32
  }
  func.func @transform_6(%arg0: i32, %arg1: i32) -> (i32, i32) {
    %c0_i32 = arith.constant 0 : i32
    %c0_i32_0 = arith.constant 0 : i32
    %c0_i32_1 = arith.constant 0 : i32
    return %c0_i32, %c0_i32_0 : i32, i32
  }
  func.func @transform_7(%arg0: i32, %arg1: i32) -> (i32, i32) {
    %c0_i32 = arith.constant 0 : i32
    %c0_i32_0 = arith.constant 0 : i32
    %c0_i32_1 = arith.constant 0 : i32
    return %c0_i32, %c0_i32_0 : i32, i32
  }
  func.func @transform_8(%arg0: i32, %arg1: i32) -> (i32, i32) {
    %c0_i32 = arith.constant 0 : i32
    %c0_i32_0 = arith.constant 0 : i32
    %c0_i32_1 = arith.constant 0 : i32
    return %c0_i32, %c0_i32_0 : i32, i32
  }
  func.func @transform_9(%arg0: i32, %arg1: i32) -> (i32, i32) {
    %c0_i32 = arith.constant 0 : i32
    %c0_i32_0 = arith.constant 0 : i32
    %c0_i32_1 = arith.constant 0 : i32
    return %c0_i32, %c0_i32_0 : i32, i32
  }
  func.func @transform_10(%arg0: i32, %arg1: i32) -> (i32, i32) {
    %c0_i32 = arith.constant 0 : i32
    %c0_i32_0 = arith.constant 0 : i32
    %c0_i32_1 = arith.constant 0 : i32
    return %c0_i32, %c0_i32_0 : i32, i32
  }
  func.func @transform_11(%arg0: i32, %arg1: i32) -> (i32, i32, i32, i32) {
    %c0_i32 = arith.constant 0 : i32
    %c0_i32_0 = arith.constant 0 : i32
    %c0_i32_1 = arith.constant 0 : i32
    return %arg0, %arg1, %c0_i32, %c0_i32_0 : i32, i32, i32, i32
  }
}

</mosaic_0001>

<bundles_post_ra>
// kernel: tpu_custom_call.1
= control target key start
LH: loop header
LB: loop body
LE: loop exit
PB: predicated region body
PF: predicated region fallthrough
CT: control target
= control target key end

     0   :  { %s3673_s0 = inlined_call_operand.hbm [shape: f32[2,16,16,16], index: 0, kind: input, shape index: {}]   ;;  %s3674_s1 = inlined_call_operand.hbm [shape: f32[2,16,16,16], index: 1, kind: input, shape index: {}]   ;;  %s3675_s2 = inlined_call_operand.vmem [shape: f32[16,4], index: 2, kind: input, shape index: {}]   ;;  %s3676_s3 = inlined_call_operand.vmem [shape: f32[1,4], index: 3, kind: input, shape index: {}]   ;;  %s3677_s4 = inlined_call_operand.vmem [shape: f32[1,4], index: 4, kind: input, shape index: {}]   ;;  %s3678_s5 = inlined_call_operand.vmem [shape: f32[3,12,4], index: 5, kind: input, shape index: {}]   ;;  %s3679_s6 = inlined_call_operand.vmem [shape: f32[1,4], index: 6, kind: input, shape index: {}]   ;;  %s3680_s7 = inlined_call_operand.vmem [shape: f32[1,4], index: 7, kind: input, shape index: {}]   ;;  %s3681_s8 = inlined_call_operand.vmem [shape: f32[4,16], index: 8, kind: input, shape index: {}]   ;;  %s3682_s9 = inlined_call_operand.vmem [shape: f32[1,16], index: 9, kind: input, shape index: {}]   ;;  %s3683_s10 = inlined_call_operand.vmem [shape: f32[1,16], index: 10, kind: input, shape index: {}]   ;;  %s3684_s11 = inlined_call_operand.hbm [shape: f32[2,16,16,16], index: 11, kind: output, shape index: {}]  }
   0x1   :  { %3699 = sst [smem:[#allocation21_spill]] %s3673_s0 }
   0x2   :  { %3700 = sst [smem:[#allocation22_spill]] %s3678_s5 }
   0x3   :  { %3701 = sst [smem:[#allocation23_spill]] %s3679_s6 }
   0x4   :  { %3702 = sst [smem:[#allocation24_spill]] %s3680_s7 }
   0x5   :  { %3703 = sst [smem:[#allocation25_spill]] %s3681_s8 }
   0x6   :  { %3704 = sst [smem:[#allocation26_spill]] %s3682_s9 }
   0x7   :  { %3705 = sst [smem:[#allocation27_spill]] %s3683_s10 }
   0x8   :  { %3706 = sst [smem:[#allocation28_spill]] %s3684_s11 }
   0x9   :  { %16 = vsyncpa [#allocation4], 0 }
   0xa   :  { %18 = vsyncpa [#allocation4 + $0x1], 0 }
   0xb   :  { %19 = vsyncpa [#allocation7], 0 }
   0xc   :  { %21 = vsyncpa [#allocation7 + $0x1], 0 }
   0xd   :  { %22 = vsyncpa [#allocation5], 0 }
   0xe   :  { %24 = vsyncpa [#allocation5 + $0x1], 0  ;;  %s2712_s17 = smov 0   ;;  %s2714_s18 = smov 0  }
   0xf   :  { %s2716_s19 = smov 0   ;;  %s2718_s20 = smov 0  }
  0x10   :  { %s2720_s21 = smov 0   ;;  %s2722_s22 = smov 0  }
  0x11   :  { %s2724_s23 = smov 0   ;;  %s2726_s24 = smov 0  }
  0x12   :  { %s2728_s25 = smov 0   ;;  %s2730_s26 = smov 0  }
  0x13   :  { %s2732_s27 = smov 0  }
  0x14 LB: > { %3707 = sst [smem:[#allocation12_spill]] %s2615_s20  ;;  %s2202_s28 = sadd.s32 4294967295, %s2643_s27   ;;  %s2643_s27 = sphi %s2732_s27, %s30_s27   ;;  %s2639_s26 = sphi %s2730_s26, %s3752_s26   ;;  %s2635_s25 = sphi %s2728_s25, %s3744_s25   ;;  %s2631_s24 = sphi %s2726_s24, %s3751_s24   ;;  %s2627_s23 = sphi %s2724_s23, %s3743_s23   ;;  %s2623_s22 = sphi %s2722_s22, %s3742_s22   ;;  %s2619_s21 = sphi %s2720_s21, %s3750_s21   ;;  %s2615_s20 = sphi %s2718_s20, %s3749_s20   ;;  %s2611_s19 = sphi %s2716_s19, %s3748_s19   ;;  %s2607_s18 = sphi %s2714_s18, %s3747_s18   ;;  %s2603_s17 = sphi %s2712_s17, %s3746_s17  }
  0x15   : > { %3708 = sst [smem:[#allocation13_spill]] %s2623_s22  ;;  %s2203_s29 = sadd.s32 4294967294, %s2643_s27  }
  0x16   : > { %3709 = sst [smem:[#allocation14_spill]] %s2631_s24  ;;  %s39_s30 = sadd.s32 1, %s2635_s25 }
  0x17   : > { %3710 = sst [smem:[#allocation15_spill]] %s2635_s25  ;;  %s42_s12 = sadd.s32 1, %s2639_s26 }
  0x18   : > { %p40_p0 = scmp.ge.s32.totalorder %s39_s30, 2  ;;  %p58_p1 = scmp.ne.s32.totalorder %s2623_s22, %s2619_s21 }
  0x19   : > { %p59_p2 = scmp.eq.s32.totalorder %s2643_s27, 0  ;;  %p64_p4 = scmp.ne.s32.totalorder %s2619_s21, %s2615_s20 }
  0x1a   : > { %s3754_s30 = smov (%p40_p0, %s39_s30), 0  ;;  %s3756_s12 = smov (!%p40_p0, %s42_s12), %s2639_s26 }
  0x1b   : > { %3711 = sst [smem:[#allocation16_spill]] %s3754_s30  ;;  %p2782_p3 = por %p59_p2, %p58_p1 }
  0x1c   : > { %p2788_p5 = scmp.eq.s32.totalorder %s2202_s28, 0  ;;  %p315_p6 = scmp.eq.s32.totalorder %s2202_s28, 3 }
  0x1d   : > { %p321_p7 = scmp.eq.s32.totalorder %s2203_s29, 3  ;;  %p3693_p11 = scmp.lt.s32.totalorder %s2643_s27, 4 }
  0x1e   : > { %p2794_p8 = por %p2788_p5, %p64_p4  ;;  %p2798_p9 = por %p315_p6, %p58_p1 }
  0x1f   : > { %p2802_p10 = por %p321_p7, %p64_p4  ;;  %s368_s11 = sand.u32 1, %s2623_s22  }
  0x20   : > { %s3715_s13 = scalar_select %p2798_p9, 1, 0 }
  0x21   : > { %s3717_s20 = scalar_select %p2802_p10, 1, 0 }
  0x22   : > { %3716 = sst [smem:[#allocation17_spill]] %s3715_s13  ;;  %s2327_s28 = sshll.u32 %s2635_s25, 4 }
  0x23   : > { %3718 = sst [smem:[#allocation18_spill]] %s3717_s20  ;;  %s2208_s24 = sshll.u32 %s368_s11, 7 }
  0x24   : > { %s3691_s29 = sshll.u32 %s2639_s26, 5  ;;  %s372_s9 = scalar_lea.vmem [#allocation3], %s2208_s24 }
  0x25   : > { %s378_s10 = sadd.s32 %s2327_s28, %s3691_s29  ;;  %s383_s7 = sshll.u32 %s372_s9, 4  ;;  %s384_s7 = int_to_ptr.vmem [resolvable:$true] %s383_s7 }
  0x26   : > { %s2212_s13 = sshll.u32 %s378_s10, 3  ;;  %s3719_s0 = sld [smem:[#allocation21_spill]] }
  0x27   : > { %p2346_p12 = pnand %p3693_p11, %p2782_p3  ;;  %p2218_p13 = scmp.ge.s32.totalorder %s2643_s27, 1 }
  0x28   : > { %s369_s24 = scalar_lea.sflag [#allocation4], %s368_s11  ;;  %s3692_s28 = smov 128  }
  0x29   : > { %s3694_s29 = smov 8   ;;  %p419_p0 = scmp.lt.s32.totalorder %s2643_s27, 5 }
  0x2a   : > { %p44_p3 = scmp.ge.s32.totalorder %s3756_s12, 2  ;;  %s47_s8 = ssub.s32 %s2635_s25, %s3754_s30 }
  0x2b   : > { %p2824_p1 = pnand %p2218_p13, %p419_p0  ;;  %s2323_s9 = sshll.u32 %s2635_s25, 3 }
  0x2c   : > { %s380_s20 = scalar_lea.hbm %s3719_s0, %s2212_s13  ;;  %s2325_s10 = sshll.u32 %s3754_s30, 3 }
  0x2d   : > { %s381_s5 = sshll.u32 %s380_s20, 4  ;;  %s3758_s12 = smov (%p44_p3, %s3756_s12), 0  ;;  %s382_s5 = int_to_ptr.hbm [resolvable:$true] %s381_s5 }
  0x2e   : > { %2348 = dma.hbm_to_vmem [thread:$0]  (!%p2346_p12), %s382_s5, 2048, %s384_s7, %s369_s24, %s3692_s28, %s3692_s28, %s3694_s29  }
  0x2f   : > { %3721 = sst [smem:[#allocation19_spill]] %s3758_s12  ;;  %s2324_s5 = sadd.s32 8, %s2323_s9 }
  0x30   : > { %s2326_s7 = sadd.s32 8, %s2325_s10  ;;  %s46_s11 = ssub.s32 %s2639_s26, %s3758_s12 }
  0x31   : > { %p76_p4 = scmp.lt.s32.totalorder %s2324_s5, 15  ;;  %s48_s20 = sor.u32 %s47_s8, %s46_s11 }
  0x32   : > { %p80_p6 = scmp.lt.s32.totalorder %s2326_s7, 15  ;;  %p49_p7 = scmp.eq.s32.totalorder %s48_s20, 0 }
  0x33   : > { %s87_s13 = sadd.s32 1, %s2611_s19  ;;  %s3760_s5 = smov (!%p76_p4, %s2324_s5), 15 }
  0x34   : > { %s3722_s14 = sadd.s32 1, %s2623_s22  ;;  %s3762_s7 = smov (!%p80_p6, %s2326_s7), 15 }
  0x35   : > { %s2842_s24 = scalar_select %p49_p7, %s2623_s22, %s3722_s14  }
  0x36   : > { %p94_p12 = scmp.ne.s32.totalorder %s2611_s19, %s2607_s18  ;;  %p100_p13 = scmp.ne.s32.totalorder %s2607_s18, %s2603_s17 }
  0x37   : > { %3723 = sst [smem:[#allocation20_spill]] %s2842_s24  ;;  %s83_s9 = ssub.s32 %s3760_s5, %s3762_s7 }
  0x38   : > { %s393_s28 = sand.u32 1, %s2611_s19   ;;  %s84_s10 = sor.u32 %s83_s9, %s46_s11 }
  0x39   : > { %p96_p0 = por %p94_p12, %p59_p2  ;;  %p85_p3 = scmp.eq.s32.totalorder %s84_s10, 0 }
  0x3a   : > { %p2853_p11 = por %p100_p13, %p2788_p5  ;;  %s2213_s20 = sshll.u32 %s393_s28, 4 }
  0x3b   : > { %s2858_s29 = scalar_select %p85_p3, %s2611_s19, %s87_s13  }
  0x3c   : > { %s2215_s14 = sshll.u32 %s3760_s5, 1  ;;  %s3725_s0 = sshll.u32 %s2639_s26, 5 }
  0x3d   : > { %s406_s12 = sadd.s32 %s2215_s14, %s3725_s0  ;;  %s397_s30 = scalar_lea.vmem [#allocation6], %s2213_s20 }
  0x3e   : > { %s411_s17 = sshll.u32 %s397_s30, 4  ;;  %s2217_s25 = sshll.u32 %s406_s12, 3  ;;  %s412_s17 = int_to_ptr.vmem [resolvable:$true] %s411_s17 }
  0x3f   : > { %s408_s9 = scalar_lea.hbm %s3674_s1, %s2217_s25  ;;  %p3726_p2 = scmp.lt.s32.totalorder %s2643_s27, 4 }
  0x40   : > { %s409_s15 = sshll.u32 %s408_s9, 4  ;;  %s394_s10 = scalar_lea.sflag [#allocation7], %s393_s28  ;;  %s410_s15 = int_to_ptr.hbm [resolvable:$true] %s409_s15 }
  0x41   : > { %p2349_p4 = pnand %p3726_p2, %p96_p0  ;;  %s3727_s24 = smov 8  }
  0x42   : > { %s3728_s22 = smov 128   ;;  %423 = sbr.rel (%p2824_p1) target bundleno = 1078 (0x436), region = 64 }
  0x43   : > { %2351 = dma.hbm_to_vmem [thread:$0]  (!%p2349_p4), %s410_s15, 256, %s412_s17, %s394_s10, %s3728_s22, %s3728_s22, %s3727_s24  }
  0x44   : > { %s2873_s0 = sand.u32 (!%p2824_p1), 1, %s2619_s21  }
  0x45   : > { %s2219_s30 = sshll.u32 (!%p2824_p1), %s2873_s0, 7  ;;  %s426_s25 = scalar_lea.sflag (!%p2824_p1), [#allocation4], %s2873_s0 }
  0x46   : > { %s2877_s12 = scalar_lea.vmem (!%p2824_p1), [#allocation3], %s2219_s30 }
  0x47   : > { %2590 = dma.done.wait (%p2794_p8), %s426_s25, 2048  }
  0x48   : > { %2592 = vsyncadd (%p2794_p8), %s426_s25, 4294965248  ;;  %s435_s22 = sand.u32 1, %s2607_s18  }
  0x49   : > { %s2884_s28 = sshll.u32 %s435_s22, 4  ;;  %s436_s6 = scalar_lea.sflag [#allocation7], %s435_s22 }
  0x4a   : > { %s439_s5 = scalar_lea.vmem [#allocation6], %s2884_s28 }
  0x4b   : > { %2594 = dma.done.wait (%p2853_p11), %s436_s6, 256  }
  0x4c   : > { %2596 = vsyncadd (%p2853_p11), %s436_s6, 4294967040  ;;  %v2894_v0 = vld [vmem:[%s3675_s2] sm:$0xff]  ;;  %v2899_v1 = vld [vmem:[%s3675_s2 + $0x8] sm:$0xff]  ;;  %s2911_s8 = scalar_lea.vmem [#allocation8], %s2219_s30  ;;  %p2222_p5 = scmp.ne.s32.totalorder %s2627_s23, 0 }
  0x4d   : > { %v2904_v2 = vld [vmem:[%s3676_s3] sm:$0x1] }
  0x4e   : > { %v2909_v3 = vld [vmem:[%s3677_s4] sm:$0x1]  ;;  %498 = sbr.rel (%p2222_p5) target bundleno = 107 (0x6b), region = 76 }
  0x53   : > { %vm499_vm0 = vcmask 31744   ;;  %vm502_vm1 = vcmask 25600   ;;  %v2647_v4 = vmov 0.0   ;;  %vm504_vm2 = vcmask 24576  }
  0x54   : > { %500 = vst.msk [vmem:[#allocation2] sm:$0xff] %vm499_vm0, %v2647_v4 }
  0x55   : > { %501 = vst.msk [vmem:[#allocation2 + $0x8] sm:$0xff] %vm499_vm0, %v2647_v4 }
  0x56   : > { %503 = vst.msk [vmem:[#allocation2 + $0x10] sm:$0x3] %vm502_vm1, %v2647_v4 }
  0x57   : > { %505 = vst.msk [vmem:[#allocation2] sm:$0x1] %vm504_vm2, %v2647_v4 }
  0x58   : > { %506 = vst.msk [vmem:[#allocation2 + $0x18] sm:$0x1] %vm504_vm2, %v2647_v4 }
  0x59   : > { %507 = vst.msk [vmem:[#allocation2 + $0x30] sm:$0x1] %vm504_vm2, %v2647_v4 }
  0x5a   : > { %508 = vst.msk [vmem:[#allocation2 + $0x48] sm:$0x1] %vm504_vm2, %v2647_v4 }
  0x5b   : > { %509 = vst.msk [vmem:[#allocation2 + $0x60] sm:$0x1] %vm504_vm2, %v2647_v4 }
  0x5c   : > { %510 = vst.msk [vmem:[#allocation2 + $0x78] sm:$0x1] %vm504_vm2, %v2647_v4 }
  0x5d   : > { %511 = vst.msk [vmem:[#allocation2 + $0x90] sm:$0x1] %vm504_vm2, %v2647_v4 }
  0x5e   : > { %512 = vst.msk [vmem:[#allocation2 + $0xa8] sm:$0x1] %vm504_vm2, %v2647_v4 }
  0x5f   : > { %513 = vst.msk [vmem:[#allocation2 + $0xc0] sm:$0x1] %vm504_vm2, %v2647_v4 }
  0x60   : > { %514 = vst.msk [vmem:[#allocation2 + $0xd8] sm:$0x1] %vm504_vm2, %v2647_v4 }
  0x61   : > { %515 = vst.msk [vmem:[#allocation2 + $0x11] sm:$0x1] %vm504_vm2, %v2647_v4 }
  0x62   : > { %516 = vst.msk [vmem:[#allocation2 + $0x29] sm:$0x1] %vm504_vm2, %v2647_v4 }
  0x63   : > { %517 = vst.msk [vmem:[#allocation2 + $0x41] sm:$0x1] %vm504_vm2, %v2647_v4 }
  0x64   : > { %518 = vst.msk [vmem:[#allocation2 + $0x59] sm:$0x1] %vm504_vm2, %v2647_v4 }
  0x65   : > { %519 = vst.msk [vmem:[#allocation2 + $0x71] sm:$0x1] %vm504_vm2, %v2647_v4 }
  0x66   : > { %520 = vst.msk [vmem:[#allocation2 + $0x89] sm:$0x1] %vm504_vm2, %v2647_v4 }
  0x67   : > { %521 = vst.msk [vmem:[#allocation2 + $0xa1] sm:$0x1] %vm504_vm2, %v2647_v4 }
  0x68   : > { %522 = vst.msk [vmem:[#allocation2 + $0xb9] sm:$0x1] %vm504_vm2, %v2647_v4 }
  0x69   : > { %523 = vst.msk [vmem:[#allocation2 + $0xd1] sm:$0x1] %vm504_vm2, %v2647_v4 }
  0x6a   : > { %524 = vst.msk [vmem:[#allocation2 + $0xe9] sm:$0x1] %vm504_vm2, %v2647_v4 }
  0x6b PF: > { %p2223_p8 = scmp.eq.s32.totalorder %s2627_s23, 0 }
  0x6d   : > { %528 = sbr.rel (%p2223_p8) target bundleno = 118 (0x76), region = 80 }
  0x72   : > { %v530_v5 = vld [vmem:[#allocation2 + $0xc0] sm:$0xff]  ;;  %vm533_vm3 = vcmask 31744   ;;  %v531_v6 = vld [vmem:[#allocation2 + $0xc8] sm:$0xff]  ;;  %v532_v7 = vld [vmem:[#allocation2 + $0xd0] sm:$0x3]  ;;  %vm536_vm4 = vcmask 25600  }
  0x73   : > { %534 = vst.msk [vmem:[#allocation2] sm:$0xff] %vm533_vm3, %v530_v5 }
  0x74   : > { %535 = vst.msk [vmem:[#allocation2 + $0x8] sm:$0xff] %vm533_vm3, %v531_v6 }
  0x75   : > { %537 = vst.msk [vmem:[#allocation2 + $0x10] sm:$0x3] %vm536_vm4, %v532_v7 }
  0x76 PF: > { %2332 = vmatpush.msra.mxu2 %v2899_v1  ;;  %2333 = vmatpush.msra.mxu3 %v2899_v1  ;;  %v546_v8 = vld [vmem:[%s2877_s12 + $0x40] sm:$0xff]  ;;  %vm554_vm5 = vcmask 130048   ;;  %v547_v12 = vld [vmem:[%s2877_s12 + $0x48] sm:$0xff]  ;;  %v548_v16 = vld [vmem:[%s2877_s12 + $0x50] sm:$0xff]  ;;  %v2976_v24 = vperm.slane %v2904_v2, 0  ;;  %v2979_v25 = vperm.slane %v2909_v3, 0 }
  0x77   : > { %v550_v9 = vld [vmem:[%s2877_s12 + $0x60] sm:$0xff]  ;;  %617 = vmatpush.msra.mxu0 %v2899_v1  ;;  %2331 = vmatpush.msra.mxu1 %v2899_v1  ;;  %v551_v13 = vld [vmem:[%s2877_s12 + $0x68] sm:$0xff]  ;;  %v552_v17 = vld [vmem:[%s2877_s12 + $0x70] sm:$0xff]  ;;  %vm723_vm6 = vcmask 31744   ;;  %p2240_p11 = scmp.ne.s32.totalorder %s2627_s23, 1 }
  0x78   : > { %2335 = vmatpush.msra.mxu2 %v2894_v0  ;;  %2336 = vmatpush.msra.mxu3 %v2894_v0  ;;  %v538_v10 = vld [vmem:[%s2877_s12] sm:$0xff]  ;;  %v539_v14 = vld [vmem:[%s2877_s12 + $0x8] sm:$0xff]  ;;  %v540_v18 = vld [vmem:[%s2877_s12 + $0x10] sm:$0xff] }
  0x79   : > { %v542_v11 = vld [vmem:[%s2877_s12 + $0x20] sm:$0xff]  ;;  %2232 = vmatmul.msk.f32.vlgmr.msra.gmra.mxu2 %vm554_vm5, %v546_v8  ;;  %2236 = vmatmul.msk.f32.vlgmr.msra.gmra.mxu3 %vm554_vm5, %v550_v9  ;;  %v543_v15 = vld [vmem:[%s2877_s12 + $0x28] sm:$0xff]  ;;  %v544_v19 = vld [vmem:[%s2877_s12 + $0x30] sm:$0xff] }
  0x7a   : > { %618 = vmatpush.msra.mxu0 %v2894_v0  ;;  %2334 = vmatpush.msra.mxu1 %v2894_v0  ;;  %v549_v20 = vld [vmem:[%s2877_s12 + $0x58] sm:$0xff] }
  0x7b   : > { %2224 = vmatmul.msk.f32.vlgmr.msra.gmra.mxu0 %vm554_vm5, %v538_v10  ;;  %2228 = vmatmul.msk.f32.vlgmr.msra.gmra.mxu1 %vm554_vm5, %v542_v11  ;;  %v553_v21 = vld [vmem:[%s2877_s12 + $0x78] sm:$0xff] }
  0x7c   : > { %v541_v22 = vld [vmem:[%s2877_s12 + $0x18] sm:$0xff] }
  0x7d   : > { %v545_v23 = vld [vmem:[%s2877_s12 + $0x38] sm:$0xff] }
  0x81   : > { %2233 = vmatmul.msk.f32.gmra.mxu2 %vm554_vm5, %v547_v12  ;;  %2237 = vmatmul.msk.f32.gmra.mxu3 %vm554_vm5, %v551_v13 }
  0x83   : > { %2225 = vmatmul.msk.f32.gmra.mxu0 %vm554_vm5, %v539_v14  ;;  %2229 = vmatmul.msk.f32.gmra.mxu1 %vm554_vm5, %v543_v15 }
  0x89   : > { %2234 = vmatmul.msk.f32.gmra.mxu2 %vm554_vm5, %v548_v16  ;;  %2238 = vmatmul.msk.f32.gmra.mxu3 %vm554_vm5, %v552_v17 }
  0x8b   : > { %2226 = vmatmul.msk.f32.gmra.mxu0 %vm554_vm5, %v540_v18  ;;  %2230 = vmatmul.msk.f32.gmra.mxu1 %vm554_vm5, %v544_v19 }
  0x91   : > { %2235 = vmatmul.msk.f32.gmra.mxu2 %vm554_vm5, %v549_v20  ;;  %2239 = vmatmul.msk.f32.gmra.mxu3 %vm554_vm5, %v553_v21 }
  0x93   : > { %2227 = vmatmul.msk.f32.gmra.mxu0 %vm554_vm5, %v541_v22  ;;  %2231 = vmatmul.msk.f32.gmra.mxu1 %vm554_vm5, %v545_v23 }
  0xf8   : > { %v620_v26 = vpop.f32.mrf.mxu0  ;;  %v632_v27 = vpop.f32.mrf.mxu1 }
  0xf9   : > { %v671_v28 = vmul.f32 %v2976_v24, %v620_v26  ;;  %v675_v29 = vmul.f32 %v2976_v24, %v632_v27 }
  0xfb   : > { %v690_v30 = vadd.f32 %v2979_v25, %v671_v28  ;;  %v694_v31 = vadd.f32 %v2979_v25, %v675_v29 }
  0xfc   : > { %v644_v32 = vpop.f32.mrf.mxu2  ;;  %v656_v33 = vpop.f32.mrf.mxu3 }
  0xfd   : > { %v706_v34 = vmax.f32 %v690_v30, 0.0  ;;  %v710_v35 = vmax.f32 %v694_v31, 0.0  ;;  %v679_v36 = vmul.f32 %v2976_v24, %v644_v32  ;;  %v683_v37 = vmul.f32 %v2976_v24, %v656_v33 }
  0xff   : > { %724 = vst.msk [vmem:[#allocation2 + $0x19] sm:$0xff] %vm723_vm6, %v706_v34  ;;  %v698_v38 = vadd.f32 %v2979_v25, %v679_v36  ;;  %v702_v39 = vadd.f32 %v2979_v25, %v683_v37 }
 0x100   : > { %728 = vst.msk [vmem:[#allocation2 + $0x49] sm:$0xff] %vm723_vm6, %v710_v35  ;;  %v623_v40 = vpop.f32.mrf.mxu0  ;;  %v635_v41 = vpop.f32.mrf.mxu1 }
 0x101   : > { %v714_v42 = vmax.f32 %v698_v38, 0.0  ;;  %v718_v43 = vmax.f32 %v702_v39, 0.0  ;;  %v672_v44 = vmul.f32 %v2976_v24, %v623_v40  ;;  %v676_v45 = vmul.f32 %v2976_v24, %v635_v41 }
 0x103   : > { %732 = vst.msk [vmem:[#allocation2 + $0x79] sm:$0xff] %vm723_vm6, %v714_v42  ;;  %v691_v46 = vadd.f32 %v2979_v25, %v672_v44  ;;  %v695_v47 = vadd.f32 %v2979_v25, %v676_v45 }
 0x104   : > { %736 = vst.msk [vmem:[#allocation2 + $0xa9] sm:$0xff] %vm723_vm6, %v718_v43  ;;  %v647_v48 = vpop.f32.mrf.mxu2  ;;  %v659_v49 = vpop.f32.mrf.mxu3 }
 0x105   : > { %v707_v50 = vmax.f32 %v691_v46, 0.0  ;;  %v711_v51 = vmax.f32 %v695_v47, 0.0  ;;  %v680_v52 = vmul.f32 %v2976_v24, %v647_v48  ;;  %v684_v53 = vmul.f32 %v2976_v24, %v659_v49 }
 0x107   : > { %725 = vst.msk [vmem:[#allocation2 + $0x21] sm:$0xff] %vm723_vm6, %v707_v50  ;;  %v699_v54 = vadd.f32 %v2979_v25, %v680_v52  ;;  %v703_v55 = vadd.f32 %v2979_v25, %v684_v53 }
 0x108   : > { %729 = vst.msk [vmem:[#allocation2 + $0x51] sm:$0xff] %vm723_vm6, %v711_v51  ;;  %v626_v56 = vpop.f32.mrf.mxu0  ;;  %v638_v57 = vpop.f32.mrf.mxu1 }
 0x109   : > { %v715_v58 = vmax.f32 %v699_v54, 0.0  ;;  %v719_v59 = vmax.f32 %v703_v55, 0.0  ;;  %v673_v60 = vmul.f32 %v2976_v24, %v626_v56  ;;  %v677_v61 = vmul.f32 %v2976_v24, %v638_v57 }
 0x10b   : > { %733 = vst.msk [vmem:[#allocation2 + $0x81] sm:$0xff] %vm723_vm6, %v715_v58  ;;  %v692_v62 = vadd.f32 %v2979_v25, %v673_v60  ;;  %v696_v63 = vadd.f32 %v2979_v25, %v677_v61 }
 0x10c   : > { %737 = vst.msk [vmem:[#allocation2 + $0xb1] sm:$0xff] %vm723_vm6, %v719_v59  ;;  %v650_v2 = vpop.f32.mrf.mxu2  ;;  %v662_v3 = vpop.f32.mrf.mxu3 }
 0x10d   : > { %v708_v4 = vmax.f32 %v692_v62, 0.0  ;;  %v712_v5 = vmax.f32 %v696_v63, 0.0  ;;  %v681_v6 = vmul.f32 %v2976_v24, %v650_v2  ;;  %v685_v7 = vmul.f32 %v2976_v24, %v662_v3 }
 0x10f   : > { %726 = vst.msk [vmem:[#allocation2 + $0x31] sm:$0xff] %vm723_vm6, %v708_v4  ;;  %v700_v8 = vadd.f32 %v2979_v25, %v681_v6  ;;  %v704_v9 = vadd.f32 %v2979_v25, %v685_v7 }
 0x110   : > { %730 = vst.msk [vmem:[#allocation2 + $0x61] sm:$0xff] %vm723_vm6, %v712_v5  ;;  %v629_v10 = vpop.f32.mrf.mxu0  ;;  %v641_v11 = vpop.f32.mrf.mxu1 }
 0x111   : > { %v716_v12 = vmax.f32 %v700_v8, 0.0  ;;  %v720_v13 = vmax.f32 %v704_v9, 0.0  ;;  %v674_v14 = vmul.f32 %v2976_v24, %v629_v10  ;;  %v678_v15 = vmul.f32 %v2976_v24, %v641_v11 }
 0x113   : > { %734 = vst.msk [vmem:[#allocation2 + $0x91] sm:$0xff] %vm723_vm6, %v716_v12  ;;  %v693_v16 = vadd.f32 %v2979_v25, %v674_v14  ;;  %v697_v17 = vadd.f32 %v2979_v25, %v678_v15 }
 0x114   : > { %738 = vst.msk [vmem:[#allocation2 + $0xc1] sm:$0xff] %vm723_vm6, %v720_v13  ;;  %v653_v18 = vpop.f32.mrf.mxu2  ;;  %v665_v19 = vpop.f32.mrf.mxu3 }
 0x115   : > { %v709_v20 = vmax.f32 %v693_v16, 0.0  ;;  %v713_v21 = vmax.f32 %v697_v17, 0.0  ;;  %v682_v22 = vmul.f32 %v2976_v24, %v653_v18  ;;  %v686_v23 = vmul.f32 %v2976_v24, %v665_v19 }
 0x117   : > { %727 = vst.msk [vmem:[#allocation2 + $0x39] sm:$0xff] %vm723_vm6, %v709_v20  ;;  %v701_v26 = vadd.f32 %v2979_v25, %v682_v22  ;;  %v705_v27 = vadd.f32 %v2979_v25, %v686_v23 }
 0x118   : > { %731 = vst.msk [vmem:[#allocation2 + $0x69] sm:$0xff] %vm723_vm6, %v713_v21  ;;  %742 = sbr.rel (%p2240_p11) target bundleno = 288 (0x120), region = 84 }
 0x119   : > { %v717_v28 = vmax.f32 %v701_v26, 0.0  ;;  %v721_v29 = vmax.f32 %v705_v27, 0.0 }
 0x11b   : > { %735 = vst.msk [vmem:[#allocation2 + $0x99] sm:$0xff] %vm723_vm6, %v717_v28 }
 0x11c   : > { %739 = vst.msk [vmem:[#allocation2 + $0xc9] sm:$0xff] %vm723_vm6, %v721_v29 }
 0x11d   : > { %v2648_v30 = vmov 0.0  }
 0x11e   : > { %744 = vst.msk [vmem:[#allocation2 + $0xd9] sm:$0xff] %vm723_vm6, %v2648_v30 }
 0x11f   : > { %745 = vst.msk [vmem:[#allocation2 + $0xe1] sm:$0xff] %vm723_vm6, %v2648_v30 }
 0x120 PF: > { %p2241_p1 = scmp.eq.s32.totalorder %s2627_s23, 1 }
 0x122   : > { %749 = sbr.rel (%p2241_p1) target bundleno = 432 (0x1b0), region = 88 }
 0x127   : > { %772 = vmatpush.msra.mxu0 %v2899_v1  ;;  %2337 = vmatpush.msra.mxu1 %v2899_v1  ;;  %v750_v31 = vld [vmem:[%s439_s5] sm:$0xff]  ;;  %v751_v32 = vld [vmem:[%s439_s5 + $0x8] sm:$0xff] }
 0x129   : > { %773 = vmatpush.msra.mxu0 %v2894_v0  ;;  %2338 = vmatpush.msra.mxu1 %v2894_v0 }
 0x12a   : > { %2242 = vmatmul.msk.f32.vlgmr.msra.gmra.mxu0 %vm554_vm5, %v750_v31  ;;  %2243 = vmatmul.msk.f32.vlgmr.msra.gmra.mxu1 %vm554_vm5, %v751_v32 }
 0x1a7   : > { %v775_v33 = vpop.f32.mrf.mxu0  ;;  %v778_v34 = vpop.f32.mrf.mxu1 }
 0x1a8   : > { %v781_v35 = vmul.f32 %v775_v33, %v2976_v24  ;;  %v782_v36 = vmul.f32 %v778_v34, %v2976_v24 }
 0x1aa   : > { %v783_v1 = vadd.f32 %v781_v35, %v2979_v25  ;;  %v784_v37 = vadd.f32 %v782_v36, %v2979_v25 }
 0x1ac   : > { %v785_v38 = vmax.f32 %v783_v1, 0.0  ;;  %v786_v39 = vmax.f32 %v784_v37, 0.0 }
 0x1ae   : > { %788 = vst.msk [vmem:[#allocation2 + $0xd9] sm:$0xff] %vm723_vm6, %v785_v38 }
 0x1af   : > { %789 = vst.msk [vmem:[#allocation2 + $0xe1] sm:$0xff] %vm723_vm6, %v786_v39 }
 0x1b0 PF: > { %v1463_v0 = vld [vmem:[#allocation2 + $0x31] sm:$0xff]  ;;  %v806_v40 = vld [vmem:[#allocation2 + $0x1] sm:$0xff]  ;;  %s2649_s9 = smov 4   ;;  %s2650_s15 = smov 8   ;;  %v1017_v25 = vld [vmem:[#allocation2 + $0x19] sm:$0xff]  ;;  %vm1261_vm7 = vcmask 1043456  }
 0x1b1   : > { %1511 = vrot.lane.b32.xlu0 %v1463_v0, %s2649_s9  ;;  %854 = vrot.lane.b32.xlu1 %v806_v40, %s2649_s9  ;;  %v822_v41 = vld [vmem:[#allocation2 + $0x2] sm:$0xff]  ;;  %v1479_v24 = vld [vmem:[#allocation2 + $0x32] sm:$0xff]  ;;  %v1033_v42 = vld [vmem:[#allocation2 + $0x1a] sm:$0xff]  ;;  %s3729_s25 = sld [smem:[#allocation22_spill]]  ;;  %vm982_vm8 = vcmask 64512   ;;  %vm1212_vm9 = vcmask 97280  }
 0x1b2   : > { %918 = vrot.lane.b32.xlu2 %v822_v41, %s2650_s15  ;;  %v1464_v43 = vld [vmem:[#allocation2 + $0x39] sm:$0xff]  ;;  %v807_v45 = vld [vmem:[#allocation2 + $0x9] sm:$0xff]  ;;  %v1018_v46 = vld [vmem:[#allocation2 + $0x21] sm:$0xff]  ;;  %s3731_s30 = sld [smem:[#allocation25_spill]]  ;;  %s2330_s10 = sshll.u32 %s2627_s23, 4 }
 0x1b3   : > { %v1480_v44 = vld [vmem:[#allocation2 + $0x3a] sm:$0xff]  ;;  %v823_v47 = vld [vmem:[#allocation2 + $0xa] sm:$0xff]  ;;  %v1034_v48 = vld [vmem:[#allocation2 + $0x22] sm:$0xff]  ;;  %s3732_s22 = sld [smem:[#allocation23_spill]]  ;;  %s2083_s16 = sshll.u32 %s2911_s8, 4  ;;  %s2084_s16 = int_to_ptr.vmem [resolvable:$true] %s2083_s16 }
 0x1b4   : > { %v1465_v49 = vld [vmem:[#allocation2 + $0x49] sm:$0xff]  ;;  %v1466_v51 = vld [vmem:[#allocation2 + $0x51] sm:$0xff]  ;;  %v3073_v53 = vld [vmem:[#allocation2 + $0x61] sm:$0xff]  ;;  %s3733_s13 = sld [smem:[#allocation24_spill]] }
 0x1b5   : > { %v1481_v50 = vld [vmem:[#allocation2 + $0x4a] sm:$0xff]  ;;  %v1482_v52 = vld [vmem:[#allocation2 + $0x52] sm:$0xff]  ;;  %v3075_v54 = vld [vmem:[#allocation2 + $0x62] sm:$0xff]  ;;  %s3734_s20 = sld [smem:[#allocation26_spill]] }
 0x1b6   : > { %v3085_v55 = vld [vmem:[#allocation2 + $0x69] sm:$0xff]  ;;  %v3118_v2 = vld [vmem:[#allocation2 + $0x79] sm:$0xff]  ;;  %v3132_v6 = vld [vmem:[#allocation2 + $0x81] sm:$0xff]  ;;  %s3735_s7 = sld [smem:[#allocation27_spill]] }
 0x1b7   : > { %v3087_v56 = vld [vmem:[#allocation2 + $0x6a] sm:$0xff]  ;;  %s3730_s28 = smov %s3729_s25  ;;  %v3120_v3 = vld [vmem:[#allocation2 + $0x7a] sm:$0xff]  ;;  %v3134_v7 = vld [vmem:[#allocation2 + $0x82] sm:$0xff]  ;;  %s3736_s11 = sld [smem:[#allocation14_spill]] }
 0x1b8   : > { %v1000_v57 = vld [vmem:[%s3729_s25 + $0x8] sm:$0xf]  ;;  %v999_v58 = vld [vmem:[%s3730_s28] sm:$0xff]  ;;  %v2245_v60 = vld [vmem:[%s3730_s28 + $0x18] sm:$0xf]  ;;  %s3737_s5 = sld [smem:[#allocation28_spill]] }
 0x1b9   : > { %1575 = vrot.lane.b32.xlu0 %v1479_v24, %s2650_s15  ;;  %1065 = vrot.lane.b32.xlu1 %v1017_v25, %s2649_s9  ;;  %v2281_v59 = vld [vmem:[%s3730_s28 + $0x28] sm:$0xf]  ;;  %v2280_v61 = vld [vmem:[%s3730_s28 + $0x20] sm:$0xff]  ;;  %v3144_v14 = vld [vmem:[#allocation2 + $0x30] sm:$0xff] }
 0x1ba   : > { %1129 = vrot.lane.b32.xlu2 %v1033_v42, %s2650_s15  ;;  %2263 = vmatpush.msk.msra.mxu1 %vm1261_vm7, %v1000_v57  ;;  %v2244_v62 = vld [vmem:[%s3730_s28 + $0x10] sm:$0xff]  ;;  %v790_v8 = vld [vmem:[#allocation2] sm:$0xff]  ;;  %v1001_v15 = vld [vmem:[#allocation2 + $0x18] sm:$0xff] }
 0x1bb   : > { %2282 = vmatpush.msk.msra.mxu2 %vm1261_vm7, %v2281_v59  ;;  %2246 = vmatpush.msk.msra.mxu0 %vm1261_vm7, %v2245_v60  ;;  %v3158_v23 = vld [vmem:[#allocation2 + $0x91] sm:$0xff]  ;;  %v791_v33 = vld [vmem:[#allocation2 + $0x8] sm:$0xff]  ;;  %v1002_v34 = vld [vmem:[#allocation2 + $0x20] sm:$0xff] }
 0x1bc   : > { %1396 = vmatpush.msra.mxu1 %v999_v58  ;;  %v3160_v26 = vld [vmem:[#allocation2 + $0x92] sm:$0xff]  ;;  %v3188_v41 = vld [vmem:[#allocation2 + $0x9a] sm:$0xff] }
 0x1bd   : > { %1724 = vmatpush.msra.mxu2 %v2280_v61  ;;  %1280 = vmatpush.msra.mxu0 %v2244_v62  ;;  %v3166_v27 = vld [vmem:[#allocation2 + $0x38] sm:$0xff] }
 0x1be   : > { %v3186_v40 = vld [vmem:[#allocation2 + $0x99] sm:$0xff] }
 0x1c1   : > { %1513 = vrot.lane.b32.xlu0 %v1464_v43, %s2649_s9  ;;  %1577 = vrot.lane.b32.xlu1 %v1480_v44, %s2650_s15 }
 0x1c2   : > { %856 = vrot.lane.b32.xlu2 %v807_v45, %s2649_s9 }
 0x1c9   : > { %1067 = vrot.lane.b32.xlu0 %v1018_v46, %s2649_s9  ;;  %920 = vrot.lane.b32.xlu1 %v823_v47, %s2650_s15 }
 0x1ca   : > { %1131 = vrot.lane.b32.xlu2 %v1034_v48, %s2650_s15 }
 0x1d1   : > { %1515 = vrot.lane.b32.xlu0 %v1465_v49, %s2649_s9  ;;  %1579 = vrot.lane.b32.xlu1 %v1481_v50, %s2650_s15 }
 0x1d2   : > { %858 = vrot.lane.b32.xlu2 %v1017_v25, %s2649_s9 }
 0x1d9   : > { %1069 = vrot.lane.b32.xlu0 %v1463_v0, %s2649_s9  ;;  %922 = vrot.lane.b32.xlu1 %v1033_v42, %s2650_s15 }
 0x1da   : > { %1133 = vrot.lane.b32.xlu2 %v1479_v24, %s2650_s15 }
 0x1e1   : > { %1517 = vrot.lane.b32.xlu0 %v1466_v51, %s2649_s9  ;;  %1581 = vrot.lane.b32.xlu1 %v1482_v52, %s2650_s15 }
 0x1e2   : > { %860 = vrot.lane.b32.xlu2 %v1018_v46, %s2649_s9 }
 0x1e9   : > { %1071 = vrot.lane.b32.xlu0 %v1464_v43, %s2649_s9  ;;  %924 = vrot.lane.b32.xlu1 %v1034_v48, %s2650_s15 }
 0x1ea   : > { %1135 = vrot.lane.b32.xlu2 %v1480_v44, %s2650_s15 }
 0x1f1   : > { %1519 = vrot.lane.b32.xlu0 %v3073_v53, %s2649_s9  ;;  %1583 = vrot.lane.b32.xlu1 %v3075_v54, %s2650_s15 }
 0x1f2   : > { %862 = vrot.lane.b32.xlu2 %v1463_v0, %s2649_s9 }
 0x1f9   : > { %1073 = vrot.lane.b32.xlu0 %v1465_v49, %s2649_s9  ;;  %926 = vrot.lane.b32.xlu1 %v1479_v24, %s2650_s15  ;;  %v3194_v24 = vld [vmem:[#allocation2 + $0x48] sm:$0xff] }
 0x1fa   : > { %1137 = vrot.lane.b32.xlu2 %v1481_v50, %s2650_s15 }
 0x201   : > { %1521 = vrot.lane.b32.xlu0 %v3085_v55, %s2649_s9  ;;  %1585 = vrot.lane.b32.xlu1 %v3087_v56, %s2650_s15 }
 0x202   : > { %864 = vrot.lane.b32.xlu2 %v1464_v43, %s2649_s9 }
 0x209   : > { %1075 = vrot.lane.b32.xlu0 %v1466_v51, %s2649_s9  ;;  %928 = vrot.lane.b32.xlu1 %v1480_v44, %s2650_s15 }
 0x20a   : > { %1139 = vrot.lane.b32.xlu2 %v1482_v52, %s2650_s15 }
 0x20c   : > { %v919_v63 = vpop.permute.xlu2 %918 }
 0x211   : > { %1523 = vrot.lane.b32.xlu0 %v3118_v2, %s2649_s9  ;;  %1587 = vrot.lane.b32.xlu1 %v3120_v3, %s2650_s15 }
 0x212   : > { %866 = vrot.lane.b32.xlu2 %v1465_v49, %s2649_s9 }
 0x214   : > { %v1130_v4 = vpop.permute.xlu2 %1129 }
 0x219   : > { %1077 = vrot.lane.b32.xlu0 %v3073_v53, %s2649_s9  ;;  %930 = vrot.lane.b32.xlu1 %v1481_v50, %s2650_s15 }
 0x21a   : > { %1141 = vrot.lane.b32.xlu2 %v3075_v54, %s2650_s15 }
 0x21c   : > { %v857_v5 = vpop.permute.xlu2 %856 }
 0x21d   : > { %v967_v35 = vsel %vm723_vm6, %v791_v33, %v857_v5 }
 0x221   : > { %1525 = vrot.lane.b32.xlu0 %v3132_v6, %s2649_s9  ;;  %1589 = vrot.lane.b32.xlu1 %v3134_v7, %s2650_s15 }
 0x222   : > { %868 = vrot.lane.b32.xlu2 %v1466_v51, %s2649_s9 }
 0x223   : > { %v1512_v9 = vpop.permute.xlu0 %1511  ;;  %v855_v10 = vpop.permute.xlu1 %854 }
 0x224   : > { %v966_v11 = vsel %vm723_vm6, %v790_v8, %v855_v10  ;;  %v1132_v13 = vpop.permute.xlu2 %1131  ;;  %v1623_v16 = vsel %vm723_vm6, %v3144_v14, %v1512_v9  ;;  %v3246_v9 = vld [vmem:[#allocation2 + $0xb2] sm:$0xff]  ;;  %v3252_v10 = vld [vmem:[#allocation2 + $0x60] sm:$0xff] }
 0x225   : > { %v983_v12 = vsel %vm982_vm8, %v966_v11, %v919_v63 }
 0x226   : > { %2264 = vmatmul.msk.f32.vlgmr.msra.gmra.mxu1 %vm1212_vm9, %v983_v12 }
 0x229   : > { %1079 = vrot.lane.b32.xlu0 %v3085_v55, %s2649_s9  ;;  %932 = vrot.lane.b32.xlu1 %v1482_v52, %s2650_s15 }
 0x22a   : > { %1143 = vrot.lane.b32.xlu2 %v3087_v56, %s2650_s15 }
 0x22b   : > { %v1576_v17 = vpop.permute.xlu0 %1575  ;;  %v1066_v18 = vpop.permute.xlu1 %1065 }
 0x22c   : > { %v1177_v19 = vsel %vm723_vm6, %v1001_v15, %v1066_v18  ;;  %v1639_v20 = vsel %vm982_vm8, %v1623_v16, %v1576_v17  ;;  %v859_v22 = vpop.permute.xlu2 %858 }
 0x22d   : > { %2283 = vmatmul.msk.f32.vlgmr.msra.gmra.mxu2 %vm1212_vm9, %v1639_v20  ;;  %v1193_v21 = vsel %vm982_vm8, %v1177_v19, %v1130_v4  ;;  %v968_v46 = vsel %vm723_vm6, %v1001_v15, %v859_v22 }
 0x22e   : > { %2247 = vmatmul.msk.f32.vlgmr.msra.gmra.mxu0 %vm1212_vm9, %v1193_v21 }
 0x231   : > { %1527 = vrot.lane.b32.xlu0 %v3158_v23, %s2649_s9  ;;  %1591 = vrot.lane.b32.xlu1 %v3160_v26, %s2650_s15 }
 0x232   : > { %870 = vrot.lane.b32.xlu2 %v3073_v53, %s2649_s9  ;;  %v3215_v53 = vld [vmem:[#allocation2 + $0xa9] sm:$0xff] }
 0x233   : > { %v1514_v28 = vpop.permute.xlu0 %1513  ;;  %v1578_v29 = vpop.permute.xlu1 %1577 }
 0x234   : > { %v1624_v30 = vsel %vm723_vm6, %v3166_v27, %v1514_v28  ;;  %v1134_v32 = vpop.permute.xlu2 %1133  ;;  %v3274_v28 = vld [vmem:[#allocation2 + $0xc2] sm:$0xff] }
 0x235   : > { %v1640_v31 = vsel %vm982_vm8, %v1624_v30, %v1578_v29 }
 0x236   : > { %2284 = vmatmul.msk.f32.gmra.mxu2 %vm1212_vm9, %v1640_v31 }
 0x239   : > { %1081 = vrot.lane.b32.xlu0 %v3118_v2, %s2649_s9  ;;  %934 = vrot.lane.b32.xlu1 %v3075_v54, %s2650_s15  ;;  %v3217_v54 = vld [vmem:[#allocation2 + $0xaa] sm:$0xff] }
 0x23a   : > { %1145 = vrot.lane.b32.xlu2 %v3120_v3, %s2650_s15 }
 0x23b   : > { %v1068_v36 = vpop.permute.xlu0 %1067  ;;  %v921_v1 = vpop.permute.xlu1 %920 }
 0x23c   : > { %v1178_v37 = vsel %vm723_vm6, %v1002_v34, %v1068_v36  ;;  %v984_v38 = vsel %vm982_vm8, %v967_v35, %v921_v1  ;;  %v861_v0 = vpop.permute.xlu2 %860 }
 0x23d   : > { %2265 = vmatmul.msk.f32.gmra.mxu1 %vm1212_vm9, %v984_v38  ;;  %v1194_v39 = vsel %vm982_vm8, %v1178_v37, %v1132_v13  ;;  %v969_v61 = vsel %vm723_vm6, %v1002_v34, %v861_v0 }
 0x23e   : > { %2248 = vmatmul.msk.f32.gmra.mxu0 %vm1212_vm9, %v1194_v39  ;;  %v3301_v39 = vld [vmem:[#allocation2 + $0xca] sm:$0xff] }
 0x241   : > { %1529 = vrot.lane.b32.xlu0 %v3186_v40, %s2649_s9  ;;  %1593 = vrot.lane.b32.xlu1 %v3188_v41, %s2650_s15 }
 0x242   : > { %872 = vrot.lane.b32.xlu2 %v3085_v55, %s2649_s9  ;;  %v3223_v55 = vld [vmem:[#allocation2 + $0x50] sm:$0xff] }
 0x243   : > { %v1516_v25 = vpop.permute.xlu0 %1515  ;;  %v1580_v42 = vpop.permute.xlu1 %1579 }
 0x244   : > { %v1625_v43 = vsel %vm723_vm6, %v3194_v24, %v1516_v25  ;;  %v1136_v45 = vpop.permute.xlu2 %1135 }
 0x245   : > { %v1641_v44 = vsel %vm982_vm8, %v1625_v43, %v1580_v42 }
 0x246   : > { %2285 = vmatmul.msk.f32.gmra.mxu2 %vm1212_vm9, %v1641_v44 }
 0x249   : > { %1083 = vrot.lane.b32.xlu0 %v3132_v6, %s2649_s9  ;;  %936 = vrot.lane.b32.xlu1 %v3087_v56, %s2650_s15 }
 0x24a   : > { %1147 = vrot.lane.b32.xlu2 %v3134_v7, %s2650_s15 }
 0x24b   : > { %v1070_v47 = vpop.permute.xlu0 %1069  ;;  %v923_v48 = vpop.permute.xlu1 %922 }
 0x24c   : > { %v1179_v49 = vsel %vm723_vm6, %v3144_v14, %v1070_v47  ;;  %v985_v50 = vsel %vm982_vm8, %v968_v46, %v923_v48  ;;  %v863_v52 = vpop.permute.xlu2 %862 }
 0x24d   : > { %2266 = vmatmul.msk.f32.gmra.mxu1 %vm1212_vm9, %v985_v50  ;;  %v1195_v51 = vsel %vm982_vm8, %v1179_v49, %v1134_v32  ;;  %v970_v17 = vsel %vm723_vm6, %v3144_v14, %v863_v52  ;;  %v3279_v14 = vld [vmem:[#allocation2 + $0x68] sm:$0xff] }
 0x24e   : > { %2249 = vmatmul.msk.f32.gmra.mxu0 %vm1212_vm9, %v1195_v51  ;;  %v1493_v51 = vld [vmem:[#allocation2 + $0xda] sm:$0xff] }
 0x251   : > { %1531 = vrot.lane.b32.xlu0 %v3215_v53, %s2649_s9  ;;  %1595 = vrot.lane.b32.xlu1 %v3217_v54, %s2650_s15 }
 0x252   : > { %874 = vrot.lane.b32.xlu2 %v3118_v2, %s2649_s9 }
 0x253   : > { %v1518_v56 = vpop.permute.xlu0 %1517  ;;  %v1582_v57 = vpop.permute.xlu1 %1581 }
 0x254   : > { %v1626_v58 = vsel %vm723_vm6, %v3223_v55, %v1518_v56  ;;  %v1138_v60 = vpop.permute.xlu2 %1137 }
 0x255   : > { %v1642_v59 = vsel %vm982_vm8, %v1626_v58, %v1582_v57 }
 0x256   : > { %2286 = vmatmul.msk.f32.gmra.mxu2 %vm1212_vm9, %v1642_v59 }
 0x259   : > { %1085 = vrot.lane.b32.xlu0 %v3158_v23, %s2649_s9  ;;  %938 = vrot.lane.b32.xlu1 %v3120_v3, %s2650_s15  ;;  %v3244_v3 = vld [vmem:[#allocation2 + $0xb1] sm:$0xff] }
 0x25a   : > { %1149 = vrot.lane.b32.xlu2 %v3160_v26, %s2650_s15 }
 0x25b   : > { %v1072_v62 = vpop.permute.xlu0 %1071  ;;  %v925_v63 = vpop.permute.xlu1 %924 }
 0x25c   : > { %v1180_v2 = vsel %vm723_vm6, %v3166_v27, %v1072_v62  ;;  %v986_v4 = vsel %vm982_vm8, %v969_v61, %v925_v63  ;;  %v865_v8 = vpop.permute.xlu2 %864 }
 0x25d   : > { %2267 = vmatmul.msk.f32.gmra.mxu1 %vm1212_vm9, %v986_v4  ;;  %v1196_v5 = vsel %vm982_vm8, %v1180_v2, %v1136_v45  ;;  %v971_v34 = vsel %vm723_vm6, %v3166_v27, %v865_v8  ;;  %v3306_v27 = vld [vmem:[#allocation2 + $0x78] sm:$0xff]  ;;  %v1494_v8 = vld [vmem:[#allocation2 + $0xe2] sm:$0xff] }
 0x25e   : > { %2250 = vmatmul.msk.f32.gmra.mxu0 %vm1212_vm9, %v1196_v5 }
 0x261   : > { %1533 = vrot.lane.b32.xlu0 %v3244_v3, %s2649_s9  ;;  %1597 = vrot.lane.b32.xlu1 %v3246_v9, %s2650_s15 }
 0x262   : > { %876 = vrot.lane.b32.xlu2 %v3132_v6, %s2649_s9 }
 0x263   : > { %v1520_v11 = vpop.permute.xlu0 %1519  ;;  %v1584_v12 = vpop.permute.xlu1 %1583 }
 0x264   : > { %v1627_v13 = vsel %vm723_vm6, %v3252_v10, %v1520_v11  ;;  %v1140_v16 = vpop.permute.xlu2 %1139 }
 0x265   : > { %v1643_v15 = vsel %vm982_vm8, %v1627_v13, %v1584_v12 }
 0x266   : > { %2287 = vmatmul.msk.f32.gmra.mxu2 %vm1212_vm9, %v1643_v15 }
 0x269   : > { %1087 = vrot.lane.b32.xlu0 %v3186_v40, %s2649_s9  ;;  %940 = vrot.lane.b32.xlu1 %v3134_v7, %s2650_s15  ;;  %v1475_v7 = vld [vmem:[#allocation2 + $0xc1] sm:$0xff] }
 0x26a   : > { %1151 = vrot.lane.b32.xlu2 %v3188_v41, %s2650_s15 }
 0x26b   : > { %v1074_v18 = vpop.permute.xlu0 %1073  ;;  %v927_v19 = vpop.permute.xlu1 %926 }
 0x26c   : > { %v1181_v6 = vsel %vm723_vm6, %v3194_v24, %v1074_v18  ;;  %v987_v20 = vsel %vm982_vm8, %v970_v17, %v927_v19  ;;  %v867_v22 = vpop.permute.xlu2 %866 }
 0x26d   : > { %2268 = vmatmul.msk.f32.gmra.mxu1 %vm1212_vm9, %v987_v20  ;;  %v1197_v21 = vsel %vm982_vm8, %v1181_v6, %v1138_v60  ;;  %v972_v45 = vsel %vm723_vm6, %v3194_v24, %v867_v22  ;;  %v3330_v24 = vld [vmem:[#allocation2 + $0x80] sm:$0xff] }
 0x26e   : > { %2251 = vmatmul.msk.f32.gmra.mxu0 %vm1212_vm9, %v1197_v21  ;;  %v1846_v60 = vld [vmem:[%s3731_s30] sm:$0xf]  ;;  %s2319_s30 = sshll.u32 %s3736_s11, 5  ;;  %s2537_s11 = scalar_lea.hbm %s3737_s5, 512 }
 0x26f   : > { %2299 = vmatpush.msk.msra.mxu3 %vm1261_vm7, %v1846_v60 }
 0x271   : > { %1535 = vrot.lane.b32.xlu0 %v1475_v7, %s2649_s9  ;;  %1599 = vrot.lane.b32.xlu1 %v3274_v28, %s2650_s15 }
 0x272   : > { %878 = vrot.lane.b32.xlu2 %v3158_v23, %s2649_s9 }
 0x273   : > { %v1522_v29 = vpop.permute.xlu0 %1521  ;;  %v1586_v30 = vpop.permute.xlu1 %1585 }
 0x274   : > { %v1628_v31 = vsel %vm723_vm6, %v3279_v14, %v1522_v29  ;;  %v1142_v33 = vpop.permute.xlu2 %1141 }
 0x275   : > { %v1644_v32 = vsel %vm982_vm8, %v1628_v31, %v1586_v30  ;;  %v3383_v30 = vld [vmem:[#allocation2 + $0x98] sm:$0xff]  ;;  %v3388_v31 = vld [vmem:[%s3733_s13] ss:$0 sm:$0xff] }
 0x276   : > { %2288 = vmatmul.msk.f32.gmra.mxu2 %vm1212_vm9, %v1644_v32 }
 0x279   : > { %1089 = vrot.lane.b32.xlu0 %v3215_v53, %s2649_s9  ;;  %942 = vrot.lane.b32.xlu1 %v3160_v26, %s2650_s15  ;;  %v1476_v26 = vld [vmem:[#allocation2 + $0xc9] sm:$0xff] }
 0x27a   : > { %1153 = vrot.lane.b32.xlu2 %v3217_v54, %s2650_s15 }
 0x27b   : > { %v1076_v35 = vpop.permute.xlu0 %1075  ;;  %v929_v36 = vpop.permute.xlu1 %928 }
 0x27c   : > { %v1182_v23 = vsel %vm723_vm6, %v3223_v55, %v1076_v35  ;;  %v988_v1 = vsel %vm982_vm8, %v971_v34, %v929_v36  ;;  %v869_v38 = vpop.permute.xlu2 %868 }
 0x27d   : > { %2269 = vmatmul.msk.f32.gmra.mxu1 %vm1212_vm9, %v988_v1  ;;  %v1198_v37 = vsel %vm982_vm8, %v1182_v23, %v1140_v16 }
 0x27e   : > { %2252 = vmatmul.msk.f32.gmra.mxu0 %vm1212_vm9, %v1198_v37 }
 0x281   : > { %1537 = vrot.lane.b32.xlu0 %v1476_v26, %s2649_s9  ;;  %1601 = vrot.lane.b32.xlu1 %v3301_v39, %s2650_s15 }
 0x282   : > { %880 = vrot.lane.b32.xlu2 %v3186_v40, %s2649_s9 }
 0x283   : > { %v1524_v0 = vpop.permute.xlu0 %1523  ;;  %v1588_v25 = vpop.permute.xlu1 %1587 }
 0x284   : > { %v1629_v42 = vsel %vm723_vm6, %v3306_v27, %v1524_v0  ;;  %v1144_v44 = vpop.permute.xlu2 %1143 }
 0x285   : > { %v1645_v43 = vsel %vm982_vm8, %v1629_v42, %v1588_v25 }
 0x286   : > { %2289 = vmatmul.msk.f32.gmra.mxu2 %vm1212_vm9, %v1645_v43 }
 0x289   : > { %1091 = vrot.lane.b32.xlu0 %v3244_v3, %s2649_s9  ;;  %944 = vrot.lane.b32.xlu1 %v3188_v41, %s2650_s15  ;;  %v1477_v41 = vld [vmem:[#allocation2 + $0xd9] sm:$0xff] }
 0x28a   : > { %1155 = vrot.lane.b32.xlu2 %v3246_v9, %s2650_s15 }
 0x28b   : > { %v1078_v46 = vpop.permute.xlu0 %1077  ;;  %v931_v47 = vpop.permute.xlu1 %930 }
 0x28c   : > { %v1183_v40 = vsel %vm723_vm6, %v3252_v10, %v1078_v46  ;;  %v989_v48 = vsel %vm982_vm8, %v972_v45, %v931_v47  ;;  %v871_v50 = vpop.permute.xlu2 %870 }
 0x28d   : > { %2270 = vmatmul.msk.f32.gmra.mxu1 %vm1212_vm9, %v989_v48  ;;  %v1199_v49 = vsel %vm982_vm8, %v1183_v40, %v1142_v33 }
 0x28e   : > { %2253 = vmatmul.msk.f32.gmra.mxu0 %vm1212_vm9, %v1199_v49  ;;  %v3406_v49 = vld [vmem:[#allocation2 + $0xa8] sm:$0xff] }
 0x291   : > { %1539 = vrot.lane.b32.xlu0 %v1477_v41, %s2649_s9  ;;  %1603 = vrot.lane.b32.xlu1 %v1493_v51, %s2650_s15 }
 0x292   : > { %882 = vrot.lane.b32.xlu2 %v3215_v53, %s2649_s9  ;;  %v973_v53 = vsel %vm723_vm6, %v3223_v55, %v869_v38  ;;  %v3357_v55 = vld [vmem:[#allocation2 + $0x90] sm:$0xff] }
 0x293   : > { %v1526_v52 = vpop.permute.xlu0 %1525  ;;  %v1590_v56 = vpop.permute.xlu1 %1589 }
 0x294   : > { %v1630_v57 = vsel %vm723_vm6, %v3330_v24, %v1526_v52  ;;  %v1146_v59 = vpop.permute.xlu2 %1145 }
 0x295   : > { %v1646_v58 = vsel %vm982_vm8, %v1630_v57, %v1590_v56 }
 0x296   : > { %2290 = vmatmul.msk.f32.gmra.mxu2 %vm1212_vm9, %v1646_v58 }
 0x299   : > { %1093 = vrot.lane.b32.xlu0 %v1475_v7, %s2649_s9  ;;  %946 = vrot.lane.b32.xlu1 %v3217_v54, %s2650_s15  ;;  %v1478_v54 = vld [vmem:[#allocation2 + $0xe1] sm:$0xff] }
 0x29a   : > { %1157 = vrot.lane.b32.xlu2 %v3274_v28, %s2650_s15 }
 0x29b   : > { %v1080_v61 = vpop.permute.xlu0 %1079  ;;  %v933_v62 = vpop.permute.xlu1 %932 }
 0x29c   : > { %v1184_v63 = vsel %vm723_vm6, %v3279_v14, %v1080_v61  ;;  %v990_v2 = vsel %vm982_vm8, %v973_v53, %v933_v62  ;;  %v873_v5 = vpop.permute.xlu2 %872 }
 0x29d   : > { %2271 = vmatmul.msk.f32.gmra.mxu1 %vm1212_vm9, %v990_v2  ;;  %v1200_v4 = vsel %vm982_vm8, %v1184_v63, %v1144_v44  ;;  %v975_v0 = vsel %vm723_vm6, %v3279_v14, %v873_v5 }
 0x29e   : > { %2254 = vmatmul.msk.f32.gmra.mxu0 %vm1212_vm9, %v1200_v4 }
 0x2a1   : > { %1541 = vrot.lane.b32.xlu0 %v1478_v54, %s2649_s9  ;;  %1605 = vrot.lane.b32.xlu1 %v1494_v8, %s2650_s15 }
 0x2a2   : > { %884 = vrot.lane.b32.xlu2 %v3244_v3, %s2649_s9  ;;  %v974_v3 = vsel %vm723_vm6, %v3252_v10, %v871_v50  ;;  %v3381_v10 = vld [vmem:[%s3732_s22] ss:$0 sm:$0xff] }
 0x2a3   : > { %v1528_v11 = vpop.permute.xlu0 %1527  ;;  %v1592_v12 = vpop.permute.xlu1 %1591 }
 0x2a4   : > { %v1631_v13 = vsel %vm723_vm6, %v3357_v55, %v1528_v11  ;;  %v1148_v16 = vpop.permute.xlu2 %1147  ;;  %v1398_v7 = vpop.f32.mrf.mxu1  ;;  %v3423_v11 = vld [vmem:[#allocation2 + $0xb0] sm:$0xff] }
 0x2a5   : > { %v1647_v15 = vsel %vm982_vm8, %v1631_v13, %v1592_v12 }
 0x2a6   : > { %2291 = vmatmul.msk.f32.gmra.mxu2 %vm1212_vm9, %v1647_v15 }
 0x2a9   : > { %1095 = vrot.lane.b32.xlu0 %v1476_v26, %s2649_s9  ;;  %948 = vrot.lane.b32.xlu1 %v3246_v9, %s2650_s15  ;;  %s2080_s9 = sadd.s32 %s2330_s10, %s2319_s30 }
 0x2aa   : > { %1159 = vrot.lane.b32.xlu2 %v3301_v39, %s2650_s15  ;;  %s2320_s25 = sshll.u32 %s2080_s9, 3 }
 0x2ab   : > { %v1082_v17 = vpop.permute.xlu0 %1081  ;;  %v1282_v19 = vpop.f32.mrf.mxu0  ;;  %s2082_s24 = scalar_lea.hbm %s3737_s5, %s2320_s25 }
 0x2ac   : > { %v1185_v18 = vsel %vm723_vm6, %v3306_v27, %v1082_v17  ;;  %v935_v6 = vpop.permute.xlu1 %934  ;;  %v875_v22 = vpop.permute.xlu2 %874  ;;  %v1399_v9 = vadd.f32 %v1398_v7, %v1282_v19  ;;  %s2085_s23 = sshll.u32 %s2082_s24, 4  ;;  %s2086_s23 = int_to_ptr.hbm [resolvable:$true] %s2085_s23 }
 0x2ad   : > { %v991_v20 = vsel %vm982_vm8, %v974_v3, %v935_v6  ;;  %v1201_v21 = vsel %vm982_vm8, %v1185_v18, %v1146_v59  ;;  %v976_v53 = vsel %vm723_vm6, %v3306_v27, %v875_v22  ;;  %s2531_s14 = sshra.s32 %s2086_s23, 4  ;;  %s2532_s14 = int_to_ptr.hbm [resolvable:$true] %s2531_s14 }
 0x2ae   : > { %2272 = vmatmul.msk.f32.gmra.mxu1 %vm1212_vm9, %v991_v20  ;;  %2255 = vmatmul.msk.f32.gmra.mxu0 %vm1212_vm9, %v1201_v21  ;;  %s2533_s17 = scalar_lea.hbm %s2532_s14, 128  ;;  %p2538_p13 = scmp.lt.s32.totalorder %s2532_s14, %s3737_s5 }
 0x2af   : > { %p2534_p6 = scmp.ne.s32.totalorder %s2532_s14, %s2533_s17  ;;  %p2539_p0 = scmp.lt.s32.totalorder %s2537_s11, %s2533_s17 }
 0x2b0   : > { %v1726_v28 = vpop.f32.mrf.mxu2 }
 0x2b1   : > { %v1774_v29 = vadd.f32 %v1726_v28, %v1399_v9  ;;  %p2535_p7 = pnand %p2534_p6, %p2798_p9  ;;  %p2540_p3 = por %p2539_p0, %p2538_p13 }
 0x2b3   : > { %v1794_v32 = vmul.f32 %v3381_v10, %v1774_v29  ;;  %v1530_v33 = vpop.permute.xlu0 %1529  ;;  %p2536_p12 = pneg %p2535_p7 }
 0x2b4   : > { %v1632_v34 = vsel %vm723_vm6, %v3383_v30, %v1530_v33  ;;  %v1594_v35 = vpop.permute.xlu1 %1593  ;;  %v1150_v1 = vpop.permute.xlu2 %1149 }
 0x2b5   : > { %v1648_v36 = vsel %vm982_vm8, %v1632_v34, %v1594_v35  ;;  %v1814_v23 = vadd.f32 %v3388_v31, %v1794_v32  ;;  %v3440_v35 = vld [vmem:[#allocation2 + $0xc0] sm:$0xff]  ;;  %p2541_p2 = pnand %p2540_p3, %p2536_p12 }
 0x2b6   : > { %2292 = vmatmul.msk.f32.gmra.mxu2 %vm1212_vm9, %v1648_v36 }
 0x2b7   : > { %v1830_v37 = vmax.f32 %v1814_v23, 0.0 }
 0x2b9   : > { %2300 = vmatmul.msk.f32.vlgmr.msra.gmra.mxu3 %vm723_vm6, %v1830_v37  ;;  %v1729_v44 = vpop.f32.mrf.mxu2 }
 0x2ba   : > { %v1401_v38 = vpop.f32.mrf.mxu1 }
 0x2bb   : > { %v1084_v26 = vpop.permute.xlu0 %1083  ;;  %v1285_v39 = vpop.f32.mrf.mxu0 }
 0x2bc   : > { %v1186_v25 = vsel %vm723_vm6, %v3330_v24, %v1084_v26  ;;  %v1402_v42 = vadd.f32 %v1401_v38, %v1285_v39  ;;  %v937_v43 = vpop.permute.xlu1 %936  ;;  %v877_v48 = vpop.permute.xlu2 %876 }
 0x2bd   : > { %v992_v45 = vsel %vm982_vm8, %v975_v0, %v937_v43  ;;  %v1202_v46 = vsel %vm982_vm8, %v1186_v25, %v1148_v16  ;;  %v977_v20 = vsel %vm723_vm6, %v3330_v24, %v877_v48 }
 0x2be   : > { %v1775_v47 = vadd.f32 %v1729_v44, %v1402_v42  ;;  %2273 = vmatmul.msk.f32.gmra.mxu1 %vm1212_vm9, %v992_v45  ;;  %2256 = vmatmul.msk.f32.gmra.mxu0 %vm1212_vm9, %v1202_v46 }
 0x2c0   : > { %v1795_v40 = vmul.f32 %v3381_v10, %v1775_v47 }
 0x2c2   : > { %v1815_v14 = vadd.f32 %v3388_v31, %v1795_v40 }
 0x2c3   : > { %v1532_v50 = vpop.permute.xlu0 %1531 }
 0x2c4   : > { %v1633_v41 = vsel %vm723_vm6, %v3406_v49, %v1532_v50  ;;  %v1596_v51 = vpop.permute.xlu1 %1595  ;;  %v1831_v52 = vmax.f32 %v1815_v14, 0.0  ;;  %v1152_v58 = vpop.permute.xlu2 %1151  ;;  %v3457_v50 = vld [vmem:[#allocation2 + $0xc8] sm:$0xff] }
 0x2c5   : > { %v1649_v56 = vsel %vm982_vm8, %v1633_v41, %v1596_v51 }
 0x2c6   : > { %2293 = vmatmul.msk.f32.gmra.mxu2 %vm1212_vm9, %v1649_v56  ;;  %2301 = vmatmul.msk.f32.gmra.mxu3 %vm723_vm6, %v1831_v52 }
 0x2c9   : > { %v1732_v2 = vpop.f32.mrf.mxu2 }
 0x2ca   : > { %v1404_v57 = vpop.f32.mrf.mxu1 }
 0x2cb   : > { %v1086_v59 = vpop.permute.xlu0 %1085  ;;  %v1288_v60 = vpop.f32.mrf.mxu0 }
 0x2cc   : > { %v1187_v61 = vsel %vm723_vm6, %v3357_v55, %v1086_v59  ;;  %v1405_v62 = vadd.f32 %v1404_v57, %v1288_v60  ;;  %v939_v63 = vpop.permute.xlu1 %938  ;;  %v879_v17 = vpop.permute.xlu2 %878 }
 0x2cd   : > { %v993_v4 = vsel %vm982_vm8, %v976_v53, %v939_v63  ;;  %v1203_v5 = vsel %vm982_vm8, %v1187_v61, %v1150_v1  ;;  %v978_v42 = vsel %vm723_vm6, %v3357_v55, %v879_v17 }
 0x2ce   : > { %v1776_v54 = vadd.f32 %v1732_v2, %v1405_v62  ;;  %2274 = vmatmul.msk.f32.gmra.mxu1 %vm1212_vm9, %v993_v4  ;;  %2257 = vmatmul.msk.f32.gmra.mxu0 %vm1212_vm9, %v1203_v5 }
 0x2d0   : > { %v1796_v8 = vmul.f32 %v3381_v10, %v1776_v54 }
 0x2d2   : > { %v1816_v27 = vadd.f32 %v3388_v31, %v1796_v8 }
 0x2d3   : > { %v1534_v12 = vpop.permute.xlu0 %1533 }
 0x2d4   : > { %v1634_v13 = vsel %vm723_vm6, %v3423_v11, %v1534_v12  ;;  %v1598_v15 = vpop.permute.xlu1 %1597  ;;  %v1832_v16 = vmax.f32 %v1816_v27, 0.0  ;;  %v1154_v33 = vpop.permute.xlu2 %1153 }
 0x2d5   : > { %v1650_v3 = vsel %vm982_vm8, %v1634_v13, %v1598_v15  ;;  %v1461_v13 = vld [vmem:[#allocation2 + $0xd8] sm:$0xff] }
 0x2d6   : > { %2294 = vmatmul.msk.f32.gmra.mxu2 %vm1212_vm9, %v1650_v3  ;;  %2302 = vmatmul.msk.f32.gmra.mxu3 %vm723_vm6, %v1832_v16 }
 0x2d9   : > { %v1735_v9 = vpop.f32.mrf.mxu2 }
 0x2da   : > { %v1407_v18 = vpop.f32.mrf.mxu1 }
 0x2db   : > { %v1088_v19 = vpop.permute.xlu0 %1087  ;;  %v1291_v6 = vpop.f32.mrf.mxu0 }
 0x2dc   : > { %v1188_v21 = vsel %vm723_vm6, %v3383_v30, %v1088_v19  ;;  %v1408_v22 = vadd.f32 %v1407_v18, %v1291_v6  ;;  %v941_v7 = vpop.permute.xlu1 %940  ;;  %v881_v26 = vpop.permute.xlu2 %880 }
 0x2dd   : > { %v994_v28 = vsel %vm982_vm8, %v977_v20, %v941_v7  ;;  %v1204_v29 = vsel %vm982_vm8, %v1188_v21, %v1152_v58  ;;  %v979_v61 = vsel %vm723_vm6, %v3383_v30, %v881_v26 }
 0x2de   : > { %v1777_v32 = vadd.f32 %v1735_v9, %v1408_v22  ;;  %2275 = vmatmul.msk.f32.gmra.mxu1 %vm1212_vm9, %v994_v28  ;;  %2258 = vmatmul.msk.f32.gmra.mxu0 %vm1212_vm9, %v1204_v29 }
 0x2e0   : > { %v1797_v34 = vmul.f32 %v3381_v10, %v1777_v32 }
 0x2e2   : > { %v1817_v24 = vadd.f32 %v3388_v31, %v1797_v34 }
 0x2e3   : > { %v1536_v36 = vpop.permute.xlu0 %1535 }
 0x2e4   : > { %v1635_v23 = vsel %vm723_vm6, %v3440_v35, %v1536_v36  ;;  %v1600_v1 = vpop.permute.xlu1 %1599  ;;  %v1833_v37 = vmax.f32 %v1817_v24, 0.0  ;;  %v1156_v41 = vpop.permute.xlu2 %1155 }
 0x2e5   : > { %v1651_v38 = vsel %vm982_vm8, %v1635_v23, %v1600_v1  ;;  %v1462_v23 = vld [vmem:[#allocation2 + $0xe0] sm:$0xff] }
 0x2e6   : > { %2295 = vmatmul.msk.f32.gmra.mxu2 %vm1212_vm9, %v1651_v38  ;;  %2303 = vmatmul.msk.f32.gmra.mxu3 %vm723_vm6, %v1833_v37 }
 0x2e9   : > { %v1738_v46 = vpop.f32.mrf.mxu2 }
 0x2ea   : > { %v1410_v39 = vpop.f32.mrf.mxu1 }
 0x2eb   : > { %v1090_v0 = vpop.permute.xlu0 %1089  ;;  %v1294_v25 = vpop.f32.mrf.mxu0 }
 0x2ec   : > { %v1189_v43 = vsel %vm723_vm6, %v3406_v49, %v1090_v0  ;;  %v1411_v44 = vadd.f32 %v1410_v39, %v1294_v25  ;;  %v943_v45 = vpop.permute.xlu1 %942  ;;  %v883_v4 = vpop.permute.xlu2 %882 }
 0x2ed   : > { %v995_v47 = vsel %vm982_vm8, %v978_v42, %v943_v45  ;;  %v1205_v40 = vsel %vm982_vm8, %v1189_v43, %v1154_v33  ;;  %v980_v22 = vsel %vm723_vm6, %v3406_v49, %v883_v4 }
 0x2ee   : > { %v1778_v48 = vadd.f32 %v1738_v46, %v1411_v44  ;;  %2276 = vmatmul.msk.f32.gmra.mxu1 %vm1212_vm9, %v995_v47  ;;  %2259 = vmatmul.msk.f32.gmra.mxu0 %vm1212_vm9, %v1205_v40 }
 0x2f0   : > { %v1798_v14 = vmul.f32 %v3381_v10, %v1778_v48 }
 0x2f2   : > { %v1818_v55 = vadd.f32 %v3388_v31, %v1798_v14 }
 0x2f3   : > { %v1538_v51 = vpop.permute.xlu0 %1537 }
 0x2f4   : > { %v1636_v52 = vsel %vm723_vm6, %v3457_v50, %v1538_v51  ;;  %v1602_v56 = vpop.permute.xlu1 %1601  ;;  %v1834_v57 = vmax.f32 %v1818_v55, 0.0  ;;  %v1158_v19 = vpop.permute.xlu2 %1157 }
 0x2f5   : > { %v1652_v58 = vsel %vm982_vm8, %v1636_v52, %v1602_v56 }
 0x2f6   : > { %2296 = vmatmul.msk.f32.gmra.mxu2 %vm1212_vm9, %v1652_v58  ;;  %2304 = vmatmul.msk.f32.gmra.mxu3 %vm723_vm6, %v1834_v57 }
 0x2f9   : > { %v1741_v5 = vpop.f32.mrf.mxu2 }
 0x2fa   : > { %v1413_v59 = vpop.f32.mrf.mxu1 }
 0x2fb   : > { %v1092_v60 = vpop.permute.xlu0 %1091  ;;  %v1297_v53 = vpop.f32.mrf.mxu0 }
 0x2fc   : > { %v1190_v62 = vsel %vm723_vm6, %v3423_v11, %v1092_v60  ;;  %v1414_v63 = vadd.f32 %v1413_v59, %v1297_v53  ;;  %v945_v2 = vpop.permute.xlu1 %944  ;;  %v885_v24 = vpop.permute.xlu2 %884  ;;  %v3510_v53 = vld [vmem:[%s3734_s20] ss:$0 sm:$0xff]  ;;  %s2068_s20 = scalar_lea.sflag [#allocation5], %s2873_s0 }
 0x2fd   : > { %v996_v54 = vsel %vm982_vm8, %v979_v61, %v945_v2  ;;  %v1206_v8 = vsel %vm982_vm8, %v1190_v62, %v1156_v41  ;;  %v981_v43 = vsel %vm723_vm6, %v3423_v11, %v885_v24 }
 0x2fe   : > { %v1779_v27 = vadd.f32 %v1741_v5, %v1414_v63  ;;  %2277 = vmatmul.msk.f32.gmra.mxu1 %vm1212_vm9, %v996_v54  ;;  %2260 = vmatmul.msk.f32.gmra.mxu0 %vm1212_vm9, %v1206_v8  ;;  %v3515_v63 = vld [vmem:[%s3735_s7] ss:$0 sm:$0xff] }
 0x300   : > { %v1799_v12 = vmul.f32 %v3381_v10, %v1779_v27  ;;  %v2003_v27 = vld [vmem:[%s2877_s12] sm:$0xff] }
 0x302   : > { %v1819_v30 = vadd.f32 %v3388_v31, %v1799_v12 }
 0x303   : > { %v1540_v15 = vpop.permute.xlu0 %1539 }
 0x304   : > { %v1637_v16 = vsel %vm723_vm6, %v1461_v13, %v1540_v15  ;;  %v1604_v17 = vpop.permute.xlu1 %1603  ;;  %v1835_v3 = vmax.f32 %v1819_v30, 0.0  ;;  %v1160_v0 = vpop.permute.xlu2 %1159 }
 0x305   : > { %v1653_v18 = vsel %vm982_vm8, %v1637_v16, %v1604_v17 }
 0x306   : > { %2297 = vmatmul.msk.f32.gmra.mxu2 %vm1212_vm9, %v1653_v18  ;;  %2305 = vmatmul.msk.f32.gmra.mxu3 %vm723_vm6, %v1835_v3 }
 0x309   : > { %v1744_v29 = vpop.f32.mrf.mxu2 }
 0x30a   : > { %v1416_v6 = vpop.f32.mrf.mxu1 }
 0x30b   : > { %v1094_v20 = vpop.permute.xlu0 %1093  ;;  %v1300_v21 = vpop.f32.mrf.mxu0 }
 0x30c   : > { %v1191_v7 = vsel %vm723_vm6, %v3440_v35, %v1094_v20  ;;  %v1417_v9 = vadd.f32 %v1416_v6, %v1300_v21  ;;  %v947_v28 = vpop.permute.xlu1 %946 }
 0x30d   : > { %v997_v32 = vsel %vm982_vm8, %v980_v22, %v947_v28  ;;  %v1207_v33 = vsel %vm982_vm8, %v1191_v7, %v1158_v19  ;;  %v2004_v19 = vld [vmem:[%s2877_s12 + $0x8] sm:$0xff] }
 0x30e   : > { %v1780_v34 = vadd.f32 %v1744_v29, %v1417_v9  ;;  %2278 = vmatmul.msk.f32.gmra.mxu1 %vm1212_vm9, %v997_v32  ;;  %2261 = vmatmul.msk.f32.gmra.mxu0 %vm1212_vm9, %v1207_v33 }
 0x310   : > { %v1800_v36 = vmul.f32 %v3381_v10, %v1780_v34 }
 0x312   : > { %v1820_v49 = vadd.f32 %v3388_v31, %v1800_v36 }
 0x313   : > { %v1542_v1 = vpop.permute.xlu0 %1541 }
 0x314   : > { %v1638_v35 = vsel %vm723_vm6, %v1462_v23, %v1542_v1  ;;  %v1606_v37 = vpop.permute.xlu1 %1605  ;;  %v1836_v38 = vmax.f32 %v1820_v49, 0.0  ;;  %v2005_v23 = vld [vmem:[%s2877_s12 + $0x10] sm:$0xff] }
 0x315   : > { %v1654_v26 = vsel %vm982_vm8, %v1638_v35, %v1606_v37 }
 0x316   : > { %2298 = vmatmul.msk.f32.gmra.mxu2 %vm1212_vm9, %v1654_v26  ;;  %2306 = vmatmul.msk.f32.gmra.mxu3 %vm723_vm6, %v1836_v38 }
 0x319   : > { %v1747_v47 = vpop.f32.mrf.mxu2 }
 0x31a   : > { %v1419_v39 = vpop.f32.mrf.mxu1 }
 0x31b   : > { %v1096_v25 = vpop.permute.xlu0 %1095  ;;  %v1303_v42 = vpop.f32.mrf.mxu0 }
 0x31c   : > { %v1192_v44 = vsel %vm723_vm6, %v3457_v50, %v1096_v25  ;;  %v1420_v45 = vadd.f32 %v1419_v39, %v1303_v42  ;;  %v949_v46 = vpop.permute.xlu1 %948 }
 0x31d   : > { %v998_v40 = vsel %vm982_vm8, %v981_v43, %v949_v46  ;;  %v1208_v48 = vsel %vm982_vm8, %v1192_v44, %v1160_v0  ;;  %v2006_v46 = vld [vmem:[%s2877_s12 + $0x18] sm:$0xff] }
 0x31e   : > { %v1781_v14 = vadd.f32 %v1747_v47, %v1420_v45  ;;  %2279 = vmatmul.msk.f32.gmra.mxu1 %vm1212_vm9, %v998_v40  ;;  %2262 = vmatmul.msk.f32.gmra.mxu0 %vm1212_vm9, %v1208_v48 }
 0x320   : > { %v1801_v55 = vmul.f32 %v3381_v10, %v1781_v14 }
 0x322   : > { %v1821_v41 = vadd.f32 %v3388_v31, %v1801_v55 }
 0x324   : > { %v1837_v11 = vmax.f32 %v1821_v41, 0.0 }
 0x326   : > { %2307 = vmatmul.msk.f32.gmra.mxu3 %vm723_vm6, %v1837_v11 }
 0x329   : > { %v1750_v56 = vpop.f32.mrf.mxu2 }
 0x32b   : > { %v1422_v50 = vpop.f32.mrf.mxu1  ;;  %v1306_v51 = vpop.f32.mrf.mxu0 }
 0x32c   : > { %v1423_v52 = vadd.f32 %v1422_v50, %v1306_v51 }
 0x32e   : > { %v1782_v57 = vadd.f32 %v1750_v56, %v1423_v52 }
 0x330   : > { %v1802_v58 = vmul.f32 %v3381_v10, %v1782_v57 }
 0x332   : > { %v1822_v59 = vadd.f32 %v3388_v31, %v1802_v58 }
 0x334   : > { %v1838_v60 = vmax.f32 %v1822_v59, 0.0  ;;  %v2007_v59 = vld [vmem:[%s2877_s12 + $0x20] sm:$0xff] }
 0x336   : > { %2308 = vmatmul.msk.f32.gmra.mxu3 %vm723_vm6, %v1838_v60 }
 0x339   : > { %v1753_v5 = vpop.f32.mrf.mxu2 }
 0x33b   : > { %v1425_v61 = vpop.f32.mrf.mxu1  ;;  %v1309_v62 = vpop.f32.mrf.mxu0 }
 0x33c   : > { %v1426_v2 = vadd.f32 %v1425_v61, %v1309_v62  ;;  %v1915_v4 = vpop.f32.mrf.mxu3 }
 0x33d   : > { %v1967_v54 = vmul.f32 %v3510_v53, %v1915_v4 }
 0x33e   : > { %v1783_v8 = vadd.f32 %v1753_v5, %v1426_v2 }
 0x33f   : > { %v1987_v12 = vadd.f32 %v3515_v63, %v1967_v54 }
 0x340   : > { %v1803_v13 = vmul.f32 %v3381_v10, %v1783_v8 }
 0x341   : > { %v2019_v30 = vadd.f32 %v2003_v27, %v1987_v12 }
 0x342   : > { %v1823_v15 = vadd.f32 %v3388_v31, %v1803_v13 }
 0x343   : > { %v2035_v16 = vmax.f32 %v2019_v30, 0.0 }
 0x344   : > { %v1839_v17 = vmax.f32 %v1823_v15, 0.0 }
 0x345   : > { %2051 = vst.msk [vmem:[%s2911_s8] sm:$0xff] %vm554_vm5, %v2035_v16  ;;  %v2008_v16 = vld [vmem:[%s2877_s12 + $0x28] sm:$0xff] }
 0x346   : > { %2309 = vmatmul.msk.f32.gmra.mxu3 %vm723_vm6, %v1839_v17 }
 0x349   : > { %v1918_v3 = vpop.f32.mrf.mxu3  ;;  %v1756_v7 = vpop.f32.mrf.mxu2 }
 0x34a   : > { %v1968_v18 = vmul.f32 %v3510_v53, %v1918_v3 }
 0x34b   : > { %v1428_v6 = vpop.f32.mrf.mxu1  ;;  %v1312_v20 = vpop.f32.mrf.mxu0 }
 0x34c   : > { %v1988_v21 = vadd.f32 %v3515_v63, %v1968_v18  ;;  %v1429_v22 = vadd.f32 %v1428_v6, %v1312_v20 }
 0x34e   : > { %v2020_v9 = vadd.f32 %v2004_v19, %v1988_v21  ;;  %v1784_v28 = vadd.f32 %v1756_v7, %v1429_v22 }
 0x350   : > { %v2036_v29 = vmax.f32 %v2020_v9, 0.0  ;;  %v1804_v32 = vmul.f32 %v3381_v10, %v1784_v28 }
 0x352   : > { %2052 = vst.msk [vmem:[%s2911_s8 + $0x8] sm:$0xff] %vm554_vm5, %v2036_v29  ;;  %v1824_v33 = vadd.f32 %v3388_v31, %v1804_v32 }
 0x354   : > { %v1840_v34 = vmax.f32 %v1824_v33, 0.0  ;;  %v2009_v33 = vld [vmem:[%s2877_s12 + $0x30] sm:$0xff] }
 0x356   : > { %2310 = vmatmul.msk.f32.gmra.mxu3 %vm723_vm6, %v1840_v34 }
 0x359   : > { %v1921_v24 = vpop.f32.mrf.mxu3  ;;  %v1759_v38 = vpop.f32.mrf.mxu2 }
 0x35a   : > { %v1969_v36 = vmul.f32 %v3510_v53, %v1921_v24 }
 0x35b   : > { %v1431_v49 = vpop.f32.mrf.mxu1  ;;  %v1315_v1 = vpop.f32.mrf.mxu0 }
 0x35c   : > { %v1989_v35 = vadd.f32 %v3515_v63, %v1969_v36  ;;  %v1432_v37 = vadd.f32 %v1431_v49, %v1315_v1 }
 0x35e   : > { %v2021_v26 = vadd.f32 %v2005_v23, %v1989_v35  ;;  %v1785_v39 = vadd.f32 %v1759_v38, %v1432_v37 }
 0x360   : > { %v2037_v0 = vmax.f32 %v2021_v26, 0.0  ;;  %v1805_v25 = vmul.f32 %v3381_v10, %v1785_v39 }
 0x362   : > { %2053 = vst.msk [vmem:[%s2911_s8 + $0x10] sm:$0xff] %vm554_vm5, %v2037_v0  ;;  %v1825_v42 = vadd.f32 %v3388_v31, %v1805_v25 }
 0x364   : > { %v1841_v43 = vmax.f32 %v1825_v42, 0.0  ;;  %v2010_v42 = vld [vmem:[%s2877_s12 + $0x38] sm:$0xff] }
 0x366   : > { %2311 = vmatmul.msk.f32.gmra.mxu3 %vm723_vm6, %v1841_v43 }
 0x369   : > { %v1924_v44 = vpop.f32.mrf.mxu3  ;;  %v1762_v55 = vpop.f32.mrf.mxu2 }
 0x36a   : > { %v1970_v45 = vmul.f32 %v3510_v53, %v1924_v44 }
 0x36b   : > { %v1434_v47 = vpop.f32.mrf.mxu1  ;;  %v1318_v40 = vpop.f32.mrf.mxu0 }
 0x36c   : > { %v1990_v48 = vadd.f32 %v3515_v63, %v1970_v45  ;;  %v1435_v14 = vadd.f32 %v1434_v47, %v1318_v40 }
 0x36e   : > { %v2022_v41 = vadd.f32 %v2006_v46, %v1990_v48  ;;  %v1786_v11 = vadd.f32 %v1762_v55, %v1435_v14  ;;  %v2011_v46 = vld [vmem:[%s2877_s12 + $0x40] sm:$0xff] }
 0x370   : > { %v2038_v50 = vmax.f32 %v2022_v41, 0.0  ;;  %v1806_v51 = vmul.f32 %v3381_v10, %v1786_v11  ;;  %v2012_v41 = vld [vmem:[%s2877_s12 + $0x48] sm:$0xff] }
 0x372   : > { %2054 = vst.msk [vmem:[%s2911_s8 + $0x18] sm:$0xff] %vm554_vm5, %v2038_v50  ;;  %v1826_v52 = vadd.f32 %v3388_v31, %v1806_v51 }
 0x374   : > { %v1842_v56 = vmax.f32 %v1826_v52, 0.0 }
 0x376   : > { %2312 = vmatmul.msk.f32.gmra.mxu3 %vm723_vm6, %v1842_v56 }
 0x379   : > { %v1927_v57 = vpop.f32.mrf.mxu3  ;;  %v1765_v4 = vpop.f32.mrf.mxu2 }
 0x37a   : > { %v1971_v58 = vmul.f32 %v3510_v53, %v1927_v57  ;;  %v2013_v57 = vld [vmem:[%s2877_s12 + $0x50] sm:$0xff] }
 0x37b   : > { %v1437_v60 = vpop.f32.mrf.mxu1  ;;  %v1321_v61 = vpop.f32.mrf.mxu0 }
 0x37c   : > { %v1991_v62 = vadd.f32 %v3515_v63, %v1971_v58  ;;  %v1438_v2 = vadd.f32 %v1437_v60, %v1321_v61 }
 0x37e   : > { %v2023_v5 = vadd.f32 %v2007_v59, %v1991_v62  ;;  %v1787_v54 = vadd.f32 %v1765_v4, %v1438_v2  ;;  %v2014_v2 = vld [vmem:[%s2877_s12 + $0x58] sm:$0xff] }
 0x380   : > { %v2039_v8 = vmax.f32 %v2023_v5, 0.0  ;;  %v1807_v27 = vmul.f32 %v3381_v10, %v1787_v54 }
 0x382   : > { %2055 = vst.msk [vmem:[%s2911_s8 + $0x20] sm:$0xff] %vm554_vm5, %v2039_v8  ;;  %v1827_v12 = vadd.f32 %v3388_v31, %v1807_v27 }
 0x384   : > { %v1843_v13 = vmax.f32 %v1827_v12, 0.0  ;;  %v2015_v12 = vld [vmem:[%s2877_s12 + $0x60] sm:$0xff] }
 0x386   : > { %2313 = vmatmul.msk.f32.gmra.mxu3 %vm723_vm6, %v1843_v13 }
 0x389   : > { %v1930_v30 = vpop.f32.mrf.mxu3  ;;  %v1768_v6 = vpop.f32.mrf.mxu2 }
 0x38a   : > { %v1972_v15 = vmul.f32 %v3510_v53, %v1930_v30 }
 0x38b   : > { %v1440_v17 = vpop.f32.mrf.mxu1  ;;  %v1324_v3 = vpop.f32.mrf.mxu0 }
 0x38c   : > { %v1992_v18 = vadd.f32 %v3515_v63, %v1972_v15  ;;  %v1441_v19 = vadd.f32 %v1440_v17, %v1324_v3  ;;  %v2016_v3 = vld [vmem:[%s2877_s12 + $0x68] sm:$0xff] }
 0x38e   : > { %v2024_v20 = vadd.f32 %v2008_v16, %v1992_v18  ;;  %v1788_v21 = vadd.f32 %v1768_v6, %v1441_v19 }
 0x390   : > { %v2040_v22 = vmax.f32 %v2024_v20, 0.0  ;;  %v1808_v7 = vmul.f32 %v3381_v10, %v1788_v21 }
 0x392   : > { %2056 = vst.msk [vmem:[%s2911_s8 + $0x28] sm:$0xff] %vm554_vm5, %v2040_v22  ;;  %v1828_v9 = vadd.f32 %v3388_v31, %v1808_v7  ;;  %v2017_v22 = vld [vmem:[%s2877_s12 + $0x70] sm:$0xff] }
 0x394   : > { %v1844_v28 = vmax.f32 %v1828_v9, 0.0 }
 0x396   : > { %2314 = vmatmul.msk.f32.gmra.mxu3 %vm723_vm6, %v1844_v28 }
 0x399   : > { %v1933_v29 = vpop.f32.mrf.mxu3  ;;  %v1771_v49 = vpop.f32.mrf.mxu2 }
 0x39a   : > { %v1973_v32 = vmul.f32 %v3510_v53, %v1933_v29 }
 0x39b   : > { %v1443_v34 = vpop.f32.mrf.mxu1  ;;  %v1327_v24 = vpop.f32.mrf.mxu0 }
 0x39c   : > { %v1993_v36 = vadd.f32 %v3515_v63, %v1973_v32  ;;  %v1444_v23 = vadd.f32 %v1443_v34, %v1327_v24 }
 0x39e   : > { %v2025_v1 = vadd.f32 %v2009_v33, %v1993_v36  ;;  %v1789_v35 = vadd.f32 %v1771_v49, %v1444_v23  ;;  %v2018_v33 = vld [vmem:[%s2877_s12 + $0x78] sm:$0xff] }
 0x3a0   : > { %v2041_v37 = vmax.f32 %v2025_v1, 0.0  ;;  %v1809_v38 = vmul.f32 %v3381_v10, %v1789_v35 }
 0x3a2   : > { %2057 = vst.msk [vmem:[%s2911_s8 + $0x30] sm:$0xff] %vm554_vm5, %v2041_v37  ;;  %v1829_v26 = vadd.f32 %v3388_v31, %v1809_v38 }
 0x3a4   : > { %v1845_v39 = vmax.f32 %v1829_v26, 0.0 }
 0x3a6   : > { %2315 = vmatmul.msk.f32.gmra.mxu3 %vm723_vm6, %v1845_v39 }
 0x3a9   : > { %v1936_v0 = vpop.f32.mrf.mxu3 }
 0x3aa   : > { %v1974_v25 = vmul.f32 %v3510_v53, %v1936_v0 }
 0x3ac   : > { %v1994_v43 = vadd.f32 %v3515_v63, %v1974_v25 }
 0x3ae   : > { %v2026_v44 = vadd.f32 %v2010_v42, %v1994_v43 }
 0x3b0   : > { %v2042_v45 = vmax.f32 %v2026_v44, 0.0 }
 0x3b2   : > { %2058 = vst.msk [vmem:[%s2911_s8 + $0x38] sm:$0xff] %vm554_vm5, %v2042_v45 }
 0x3b9   : > { %v1939_v10 = vpop.f32.mrf.mxu3 }
 0x3ba   : > { %v1975_v31 = vmul.f32 %v3510_v53, %v1939_v10 }
 0x3bc   : > { %v1995_v47 = vadd.f32 %v3515_v63, %v1975_v31 }
 0x3be   : > { %v2027_v40 = vadd.f32 %v2011_v46, %v1995_v47 }
 0x3c0   : > { %v2043_v48 = vmax.f32 %v2027_v40, 0.0 }
 0x3c2   : > { %2059 = vst.msk [vmem:[%s2911_s8 + $0x40] sm:$0xff] %vm554_vm5, %v2043_v48 }
 0x3c9   : > { %v1942_v14 = vpop.f32.mrf.mxu3 }
 0x3ca   : > { %v1976_v55 = vmul.f32 %v3510_v53, %v1942_v14 }
 0x3cc   : > { %v1996_v11 = vadd.f32 %v3515_v63, %v1976_v55 }
 0x3ce   : > { %v2028_v50 = vadd.f32 %v2012_v41, %v1996_v11 }
 0x3d0   : > { %v2044_v51 = vmax.f32 %v2028_v50, 0.0 }
 0x3d2   : > { %2060 = vst.msk [vmem:[%s2911_s8 + $0x48] sm:$0xff] %vm554_vm5, %v2044_v51 }
 0x3d9   : > { %v1945_v52 = vpop.f32.mrf.mxu3 }
 0x3da   : > { %v1977_v56 = vmul.f32 %v3510_v53, %v1945_v52 }
 0x3dc   : > { %v1997_v58 = vadd.f32 %v3515_v63, %v1977_v56 }
 0x3de   : > { %v2029_v59 = vadd.f32 %v2013_v57, %v1997_v58 }
 0x3e0   : > { %v2045_v60 = vmax.f32 %v2029_v59, 0.0 }
 0x3e2   : > { %2061 = vst.msk [vmem:[%s2911_s8 + $0x50] sm:$0xff] %vm554_vm5, %v2045_v60 }
 0x3e9   : > { %v1948_v61 = vpop.f32.mrf.mxu3 }
 0x3ea   : > { %v1978_v62 = vmul.f32 %v3510_v53, %v1948_v61 }
 0x3ec   : > { %v1998_v4 = vadd.f32 %v3515_v63, %v1978_v62 }
 0x3ee   : > { %v2030_v5 = vadd.f32 %v2014_v2, %v1998_v4 }
 0x3f0   : > { %v2046_v54 = vmax.f32 %v2030_v5, 0.0 }
 0x3f2   : > { %2062 = vst.msk [vmem:[%s2911_s8 + $0x58] sm:$0xff] %vm554_vm5, %v2046_v54 }
 0x3f9   : > { %v1951_v8 = vpop.f32.mrf.mxu3 }
 0x3fa   : > { %v1979_v27 = vmul.f32 %v3510_v53, %v1951_v8 }
 0x3fc   : > { %v1999_v13 = vadd.f32 %v3515_v63, %v1979_v27 }
 0x3fe   : > { %v2031_v30 = vadd.f32 %v2015_v12, %v1999_v13 }
 0x400   : > { %v2047_v15 = vmax.f32 %v2031_v30, 0.0 }
 0x402   : > { %2063 = vst.msk [vmem:[%s2911_s8 + $0x60] sm:$0xff] %vm554_vm5, %v2047_v15 }
 0x409   : > { %v1954_v16 = vpop.f32.mrf.mxu3 }
 0x40a   : > { %v1980_v17 = vmul.f32 %v3510_v53, %v1954_v16 }
 0x40c   : > { %v2000_v18 = vadd.f32 %v3515_v63, %v1980_v17 }
 0x40e   : > { %v2032_v19 = vadd.f32 %v2016_v3, %v2000_v18 }
 0x410   : > { %v2048_v6 = vmax.f32 %v2032_v19, 0.0 }
 0x412   : > { %2064 = vst.msk [vmem:[%s2911_s8 + $0x68] sm:$0xff] %vm554_vm5, %v2048_v6 }
 0x419   : > { %v1957_v20 = vpop.f32.mrf.mxu3 }
 0x41a   : > { %v1981_v21 = vmul.f32 %v3510_v53, %v1957_v20 }
 0x41c   : > { %v2001_v7 = vadd.f32 %v3515_v63, %v1981_v21 }
 0x41e   : > { %v2033_v9 = vadd.f32 %v2017_v22, %v2001_v7 }
 0x420   : > { %v2049_v28 = vmax.f32 %v2033_v9, 0.0 }
 0x422   : > { %2065 = vst.msk [vmem:[%s2911_s8 + $0x70] sm:$0xff] %vm554_vm5, %v2049_v28 }
 0x429   : > { %v1960_v29 = vpop.f32.mrf.mxu3 }
 0x42a   : > { %v1982_v32 = vmul.f32 %v3510_v53, %v1960_v29 }
 0x42c   : > { %v2002_v34 = vadd.f32 %v3515_v63, %v1982_v32 }
 0x42e   : > { %v2034_v24 = vadd.f32 %v2018_v33, %v2002_v34 }
 0x430   : > { %v2050_v36 = vmax.f32 %v2034_v24, 0.0 }
 0x432   : > { %2066 = vst.msk [vmem:[%s2911_s8 + $0x78] sm:$0xff] %vm554_vm5, %v2050_v36 }
 0x433   : > { %2544 = shalt.err (!%p2541_p2)
}
 0x434   : > { %s2651_s0 = smov 128  }
 0x435   : > { %2343 = dma.vmem_to_hbm [thread:$0]  (%p2798_p9), %s2084_s16, 2048, %s2086_s23, %s2068_s20, %s2651_s0, %s2651_s0, %s2650_s15  }
 0x436 PF: > { %s3739_s8 = sld [smem:[#allocation12_spill]]  ;;  %p2357_p4 = scmp.ge.s32.totalorder %s2643_s27, 2 }
 0x438   : > { %p2353_p5 = pnand %p2357_p4, %p2802_p10 }
 0x43a   : > { %p2354_p8 = pneg %p2353_p5 }
 0x43c   : > { %s2100_s25 = sand.u32 1, %s3739_s8  }
 0x43d   : > { %s2101_s22 = scalar_lea.sflag [#allocation5], %s2100_s25 }
 0x43e   : > { %2598 = dma.done.wait (%p2354_p8), %s2101_s22, 2048  }
 0x43f   : > { %2600 = vsyncadd (%p2354_p8), %s2101_s22, 4294965248  ;;  %s30_s27 = sadd.s32 1, %s2643_s27   ;;  %s3741_s15 = sld [smem:[#allocation13_spill]] }
 0x440   : > { %p27_p11 = scmp.ge.s32.totalorder %s30_s27, 6   ;;  %s3742_s22 = sld [smem:[#allocation20_spill]] }
 0x441   : > { %s3743_s23 = sld [smem:[#allocation15_spill]]  ;;  %s3746_s17 = smov %s2607_s18 }
 0x442   : > { %s3744_s25 = sld [smem:[#allocation16_spill]]  ;;  %s3747_s18 = smov %s2611_s19 }
 0x443   : > { %s3745_s6 = sld [smem:[#allocation19_spill]]  ;;  %s3748_s19 = smov %s2858_s29 }
 0x444   : > { %s3749_s20 = smov %s2619_s21  ;;  %s3751_s24 = smov %s2639_s26 }
 0x445   : > { %s3750_s21 = smov %s3741_s15  ;;  %29 = sbr.rel (!%p27_p11) target bundleno = 20 (0x14), region = 145 }
 0x449   : > { %s3752_s26 = smov %s3745_s6 }
 0x44a   :  { %2107 = vsyncpa [#allocation4], 1 }
 0x44b   :  { %2109 = vsyncpa [#allocation4 + $0x1], 1 }
 0x44c   :  { %2110 = vsyncpa [#allocation7], 1 }
 0x44d   :  { %2112 = vsyncpa [#allocation7 + $0x1], 1 }
 0x44e   :  { %2113 = vsyncpa [#allocation5], 1 }
 0x44f   :  { %2115 = vsyncpa [#allocation5 + $0x1], 1 }

// kernel: tpu_custom_call.1
= control target key start
LH: loop header
LB: loop body
LE: loop exit
PB: predicated region body
PF: predicated region fallthrough
CT: control target
= control target key end

     0   :  { %s3673_s0 = inlined_call_operand.hbm [shape: f32[2,16,16,16], index: 0, kind: input, shape index: {}]   ;;  %s3674_s1 = inlined_call_operand.hbm [shape: f32[2,16,16,16], index: 1, kind: input, shape index: {}]   ;;  %s3675_s2 = inlined_call_operand.vmem [shape: f32[16,4], index: 2, kind: input, shape index: {}]   ;;  %s3676_s3 = inlined_call_operand.vmem [shape: f32[1,4], index: 3, kind: input, shape index: {}]   ;;  %s3677_s4 = inlined_call_operand.vmem [shape: f32[1,4], index: 4, kind: input, shape index: {}]   ;;  %s3678_s5 = inlined_call_operand.vmem [shape: f32[3,12,4], index: 5, kind: input, shape index: {}]   ;;  %s3679_s6 = inlined_call_operand.vmem [shape: f32[1,4], index: 6, kind: input, shape index: {}]   ;;  %s3680_s7 = inlined_call_operand.vmem [shape: f32[1,4], index: 7, kind: input, shape index: {}]   ;;  %s3681_s8 = inlined_call_operand.vmem [shape: f32[4,16], index: 8, kind: input, shape index: {}]   ;;  %s3682_s9 = inlined_call_operand.vmem [shape: f32[1,16], index: 9, kind: input, shape index: {}]   ;;  %s3683_s10 = inlined_call_operand.vmem [shape: f32[1,16], index: 10, kind: input, shape index: {}]   ;;  %s3684_s11 = inlined_call_operand.hbm [shape: f32[2,16,16,16], index: 11, kind: output, shape index: {}]  }
   0x1   :  { %3699 = sst [smem:[#allocation21_spill]] %s3673_s0 }
   0x2   :  { %3700 = sst [smem:[#allocation22_spill]] %s3678_s5 }
   0x3   :  { %3701 = sst [smem:[#allocation23_spill]] %s3679_s6 }
   0x4   :  { %3702 = sst [smem:[#allocation24_spill]] %s3680_s7 }
   0x5   :  { %3703 = sst [smem:[#allocation25_spill]] %s3681_s8 }
   0x6   :  { %3704 = sst [smem:[#allocation26_spill]] %s3682_s9 }
   0x7   :  { %3705 = sst [smem:[#allocation27_spill]] %s3683_s10 }
   0x8   :  { %3706 = sst [smem:[#allocation28_spill]] %s3684_s11 }
   0x9   :  { %16 = vsyncpa [#allocation4], 0 }
   0xa   :  { %18 = vsyncpa [#allocation4 + $0x1], 0 }
   0xb   :  { %19 = vsyncpa [#allocation7], 0 }
   0xc   :  { %21 = vsyncpa [#allocation7 + $0x1], 0 }
   0xd   :  { %22 = vsyncpa [#allocation5], 0 }
   0xe   :  { %24 = vsyncpa [#allocation5 + $0x1], 0  ;;  %s2712_s17 = smov 0   ;;  %s2714_s18 = smov 0  }
   0xf   :  { %s2716_s19 = smov 0   ;;  %s2718_s20 = smov 0  }
  0x10   :  { %s2720_s21 = smov 0   ;;  %s2722_s22 = smov 0  }
  0x11   :  { %s2724_s23 = smov 0   ;;  %s2726_s24 = smov 0  }
  0x12   :  { %s2728_s25 = smov 0   ;;  %s2730_s26 = smov 0  }
  0x13   :  { %s2732_s27 = smov 0  }
  0x14 LB: > { %3707 = sst [smem:[#allocation12_spill]] %s2615_s20  ;;  %s2202_s28 = sadd.s32 4294967295, %s2643_s27   ;;  %s2643_s27 = sphi %s2732_s27, %s30_s27   ;;  %s2639_s26 = sphi %s2730_s26, %s3752_s26   ;;  %s2635_s25 = sphi %s2728_s25, %s3744_s25   ;;  %s2631_s24 = sphi %s2726_s24, %s3751_s24   ;;  %s2627_s23 = sphi %s2724_s23, %s3743_s23   ;;  %s2623_s22 = sphi %s2722_s22, %s3742_s22   ;;  %s2619_s21 = sphi %s2720_s21, %s3750_s21   ;;  %s2615_s20 = sphi %s2718_s20, %s3749_s20   ;;  %s2611_s19 = sphi %s2716_s19, %s3748_s19   ;;  %s2607_s18 = sphi %s2714_s18, %s3747_s18   ;;  %s2603_s17 = sphi %s2712_s17, %s3746_s17  }
  0x15   : > { %3708 = sst [smem:[#allocation13_spill]] %s2623_s22  ;;  %s2203_s29 = sadd.s32 4294967294, %s2643_s27  }
  0x16   : > { %3709 = sst [smem:[#allocation14_spill]] %s2631_s24  ;;  %s39_s30 = sadd.s32 1, %s2635_s25 }
  0x17   : > { %3710 = sst [smem:[#allocation15_spill]] %s2635_s25  ;;  %s42_s12 = sadd.s32 1, %s2639_s26 }
  0x18   : > { %p40_p0 = scmp.ge.s32.totalorder %s39_s30, 2  ;;  %p58_p1 = scmp.ne.s32.totalorder %s2623_s22, %s2619_s21 }
  0x19   : > { %p59_p2 = scmp.eq.s32.totalorder %s2643_s27, 0  ;;  %p64_p4 = scmp.ne.s32.totalorder %s2619_s21, %s2615_s20 }
  0x1a   : > { %s3754_s30 = smov (%p40_p0, %s39_s30), 0  ;;  %s3756_s12 = smov (!%p40_p0, %s42_s12), %s2639_s26 }
  0x1b   : > { %3711 = sst [smem:[#allocation16_spill]] %s3754_s30  ;;  %p2782_p3 = por %p59_p2, %p58_p1 }
  0x1c   : > { %p2788_p5 = scmp.eq.s32.totalorder %s2202_s28, 0  ;;  %p315_p6 = scmp.eq.s32.totalorder %s2202_s28, 3 }
  0x1d   : > { %p321_p7 = scmp.eq.s32.totalorder %s2203_s29, 3  ;;  %p3693_p11 = scmp.lt.s32.totalorder %s2643_s27, 4 }
  0x1e   : > { %p2794_p8 = por %p2788_p5, %p64_p4  ;;  %p2798_p9 = por %p315_p6, %p58_p1 }
  0x1f   : > { %p2802_p10 = por %p321_p7, %p64_p4  ;;  %s368_s11 = sand.u32 1, %s2623_s22  }
  0x20   : > { %s3715_s13 = scalar_select %p2798_p9, 1, 0 }
  0x21   : > { %s3717_s20 = scalar_select %p2802_p10, 1, 0 }
  0x22   : > { %3716 = sst [smem:[#allocation17_spill]] %s3715_s13  ;;  %s2327_s28 = sshll.u32 %s2635_s25, 4 }
  0x23   : > { %3718 = sst [smem:[#allocation18_spill]] %s3717_s20  ;;  %s2208_s24 = sshll.u32 %s368_s11, 7 }
  0x24   : > { %s3691_s29 = sshll.u32 %s2639_s26, 5  ;;  %s372_s9 = scalar_lea.vmem [#allocation3], %s2208_s24 }
  0x25   : > { %s378_s10 = sadd.s32 %s2327_s28, %s3691_s29  ;;  %s383_s7 = sshll.u32 %s372_s9, 4  ;;  %s384_s7 = int_to_ptr.vmem [resolvable:$true] %s383_s7 }
  0x26   : > { %s2212_s13 = sshll.u32 %s378_s10, 3  ;;  %s3719_s0 = sld [smem:[#allocation21_spill]] }
  0x27   : > { %p2346_p12 = pnand %p3693_p11, %p2782_p3  ;;  %p2218_p13 = scmp.ge.s32.totalorder %s2643_s27, 1 }
  0x28   : > { %s369_s24 = scalar_lea.sflag [#allocation4], %s368_s11  ;;  %s3692_s28 = smov 128  }
  0x29   : > { %s3694_s29 = smov 8   ;;  %p419_p0 = scmp.lt.s32.totalorder %s2643_s27, 5 }
  0x2a   : > { %p44_p3 = scmp.ge.s32.totalorder %s3756_s12, 2  ;;  %s47_s8 = ssub.s32 %s2635_s25, %s3754_s30 }
  0x2b   : > { %p2824_p1 = pnand %p2218_p13, %p419_p0  ;;  %s2323_s9 = sshll.u32 %s2635_s25, 3 }
  0x2c   : > { %s380_s20 = scalar_lea.hbm %s3719_s0, %s2212_s13  ;;  %s2325_s10 = sshll.u32 %s3754_s30, 3 }
  0x2d   : > { %s381_s5 = sshll.u32 %s380_s20, 4  ;;  %s3758_s12 = smov (%p44_p3, %s3756_s12), 0  ;;  %s382_s5 = int_to_ptr.hbm [resolvable:$true] %s381_s5 }
  0x2e   : > { %2348 = dma.hbm_to_vmem [thread:$0]  (!%p2346_p12), %s382_s5, 2048, %s384_s7, %s369_s24, %s3692_s28, %s3692_s28, %s3694_s29  }
  0x2f   : > { %3721 = sst [smem:[#allocation19_spill]] %s3758_s12  ;;  %s2324_s5 = sadd.s32 8, %s2323_s9 }
  0x30   : > { %s2326_s7 = sadd.s32 8, %s2325_s10  ;;  %s46_s11 = ssub.s32 %s2639_s26, %s3758_s12 }
  0x31   : > { %p76_p4 = scmp.lt.s32.totalorder %s2324_s5, 15  ;;  %s48_s20 = sor.u32 %s47_s8, %s46_s11 }
  0x32   : > { %p80_p6 = scmp.lt.s32.totalorder %s2326_s7, 15  ;;  %p49_p7 = scmp.eq.s32.totalorder %s48_s20, 0 }
  0x33   : > { %s87_s13 = sadd.s32 1, %s2611_s19  ;;  %s3760_s5 = smov (!%p76_p4, %s2324_s5), 15 }
  0x34   : > { %s3722_s14 = sadd.s32 1, %s2623_s22  ;;  %s3762_s7 = smov (!%p80_p6, %s2326_s7), 15 }
  0x35   : > { %s2842_s24 = scalar_select %p49_p7, %s2623_s22, %s3722_s14  }
  0x36   : > { %p94_p12 = scmp.ne.s32.totalorder %s2611_s19, %s2607_s18  ;;  %p100_p13 = scmp.ne.s32.totalorder %s2607_s18, %s2603_s17 }
  0x37   : > { %3723 = sst [smem:[#allocation20_spill]] %s2842_s24  ;;  %s83_s9 = ssub.s32 %s3760_s5, %s3762_s7 }
  0x38   : > { %s393_s28 = sand.u32 1, %s2611_s19   ;;  %s84_s10 = sor.u32 %s83_s9, %s46_s11 }
  0x39   : > { %p96_p0 = por %p94_p12, %p59_p2  ;;  %p85_p3 = scmp.eq.s32.totalorder %s84_s10, 0 }
  0x3a   : > { %p2853_p11 = por %p100_p13, %p2788_p5  ;;  %s2213_s20 = sshll.u32 %s393_s28, 4 }
  0x3b   : > { %s2858_s29 = scalar_select %p85_p3, %s2611_s19, %s87_s13  }
  0x3c   : > { %s2215_s14 = sshll.u32 %s3760_s5, 1  ;;  %s3725_s0 = sshll.u32 %s2639_s26, 5 }
  0x3d   : > { %s406_s12 = sadd.s32 %s2215_s14, %s3725_s0  ;;  %s397_s30 = scalar_lea.vmem [#allocation6], %s2213_s20 }
  0x3e   : > { %s411_s17 = sshll.u32 %s397_s30, 4  ;;  %s2217_s25 = sshll.u32 %s406_s12, 3  ;;  %s412_s17 = int_to_ptr.vmem [resolvable:$true] %s411_s17 }
  0x3f   : > { %s408_s9 = scalar_lea.hbm %s3674_s1, %s2217_s25  ;;  %p3726_p2 = scmp.lt.s32.totalorder %s2643_s27, 4 }
  0x40   : > { %s409_s15 = sshll.u32 %s408_s9, 4  ;;  %s394_s10 = scalar_lea.sflag [#allocation7], %s393_s28  ;;  %s410_s15 = int_to_ptr.hbm [resolvable:$true] %s409_s15 }
  0x41   : > { %p2349_p4 = pnand %p3726_p2, %p96_p0  ;;  %s3727_s24 = smov 8  }
  0x42   : > { %s3728_s22 = smov 128   ;;  %423 = sbr.rel (%p2824_p1) target bundleno = 1078 (0x436), region = 64 }
  0x43   : > { %2351 = dma.hbm_to_vmem [thread:$0]  (!%p2349_p4), %s410_s15, 256, %s412_s17, %s394_s10, %s3728_s22, %s3728_s22, %s3727_s24  }
  0x44   : > { %s2873_s0 = sand.u32 (!%p2824_p1), 1, %s2619_s21  }
  0x45   : > { %s2219_s30 = sshll.u32 (!%p2824_p1), %s2873_s0, 7  ;;  %s426_s25 = scalar_lea.sflag (!%p2824_p1), [#allocation4], %s2873_s0 }
  0x46   : > { %s2877_s12 = scalar_lea.vmem (!%p2824_p1), [#allocation3], %s2219_s30 }
  0x47   : > { %2590 = dma.done.wait (%p2794_p8), %s426_s25, 2048  }
  0x48   : > { %2592 = vsyncadd (%p2794_p8), %s426_s25, 4294965248  ;;  %s435_s22 = sand.u32 1, %s2607_s18  }
  0x49   : > { %s2884_s28 = sshll.u32 %s435_s22, 4  ;;  %s436_s6 = scalar_lea.sflag [#allocation7], %s435_s22 }
  0x4a   : > { %s439_s5 = scalar_lea.vmem [#allocation6], %s2884_s28 }
  0x4b   : > { %2594 = dma.done.wait (%p2853_p11), %s436_s6, 256  }
  0x4c   : > { %2596 = vsyncadd (%p2853_p11), %s436_s6, 4294967040  ;;  %v2894_v0 = vld [vmem:[%s3675_s2] sm:$0xff]  ;;  %v2899_v1 = vld [vmem:[%s3675_s2 + $0x8] sm:$0xff]  ;;  %s2911_s8 = scalar_lea.vmem [#allocation8], %s2219_s30  ;;  %p2222_p5 = scmp.ne.s32.totalorder %s2627_s23, 0 }
  0x4d   : > { %v2904_v2 = vld [vmem:[%s3676_s3] sm:$0x1] }
  0x4e   : > { %v2909_v3 = vld [vmem:[%s3677_s4] sm:$0x1]  ;;  %498 = sbr.rel (%p2222_p5) target bundleno = 107 (0x6b), region = 76 }
  0x53   : > { %vm499_vm0 = vcmask 31744   ;;  %vm502_vm1 = vcmask 25600   ;;  %v2647_v4 = vmov 0.0   ;;  %vm504_vm2 = vcmask 24576  }
  0x54   : > { %500 = vst.msk [vmem:[#allocation2] sm:$0xff] %vm499_vm0, %v2647_v4 }
  0x55   : > { %501 = vst.msk [vmem:[#allocation2 + $0x8] sm:$0xff] %vm499_vm0, %v2647_v4 }
  0x56   : > { %503 = vst.msk [vmem:[#allocation2 + $0x10] sm:$0x3] %vm502_vm1, %v2647_v4 }
  0x57   : > { %505 = vst.msk [vmem:[#allocation2] sm:$0x1] %vm504_vm2, %v2647_v4 }
  0x58   : > { %506 = vst.msk [vmem:[#allocation2 + $0x18] sm:$0x1] %vm504_vm2, %v2647_v4 }
  0x59   : > { %507 = vst.msk [vmem:[#allocation2 + $0x30] sm:$0x1] %vm504_vm2, %v2647_v4 }
  0x5a   : > { %508 = vst.msk [vmem:[#allocation2 + $0x48] sm:$0x1] %vm504_vm2, %v2647_v4 }
  0x5b   : > { %509 = vst.msk [vmem:[#allocation2 + $0x60] sm:$0x1] %vm504_vm2, %v2647_v4 }
  0x5c   : > { %510 = vst.msk [vmem:[#allocation2 + $0x78] sm:$0x1] %vm504_vm2, %v2647_v4 }
  0x5d   : > { %511 = vst.msk [vmem:[#allocation2 + $0x90] sm:$0x1] %vm504_vm2, %v2647_v4 }
  0x5e   : > { %512 = vst.msk [vmem:[#allocation2 + $0xa8] sm:$0x1] %vm504_vm2, %v2647_v4 }
  0x5f   : > { %513 = vst.msk [vmem:[#allocation2 + $0xc0] sm:$0x1] %vm504_vm2, %v2647_v4 }
  0x60   : > { %514 = vst.msk [vmem:[#allocation2 + $0xd8] sm:$0x1] %vm504_vm2, %v2647_v4 }
  0x61   : > { %515 = vst.msk [vmem:[#allocation2 + $0x11] sm:$0x1] %vm504_vm2, %v2647_v4 }
  0x62   : > { %516 = vst.msk [vmem:[#allocation2 + $0x29] sm:$0x1] %vm504_vm2, %v2647_v4 }
  0x63   : > { %517 = vst.msk [vmem:[#allocation2 + $0x41] sm:$0x1] %vm504_vm2, %v2647_v4 }
  0x64   : > { %518 = vst.msk [vmem:[#allocation2 + $0x59] sm:$0x1] %vm504_vm2, %v2647_v4 }
  0x65   : > { %519 = vst.msk [vmem:[#allocation2 + $0x71] sm:$0x1] %vm504_vm2, %v2647_v4 }
  0x66   : > { %520 = vst.msk [vmem:[#allocation2 + $0x89] sm:$0x1] %vm504_vm2, %v2647_v4 }
  0x67   : > { %521 = vst.msk [vmem:[#allocation2 + $0xa1] sm:$0x1] %vm504_vm2, %v2647_v4 }
  0x68   : > { %522 = vst.msk [vmem:[#allocation2 + $0xb9] sm:$0x1] %vm504_vm2, %v2647_v4 }
  0x69   : > { %523 = vst.msk [vmem:[#allocation2 + $0xd1] sm:$0x1] %vm504_vm2, %v2647_v4 }
  0x6a   : > { %524 = vst.msk [vmem:[#allocation2 + $0xe9] sm:$0x1] %vm504_vm2, %v2647_v4 }
  0x6b PF: > { %p2223_p8 = scmp.eq.s32.totalorder %s2627_s23, 0 }
  0x6d   : > { %528 = sbr.rel (%p2223_p8) target bundleno = 118 (0x76), region = 80 }
  0x72   : > { %v530_v5 = vld [vmem:[#allocation2 + $0xc0] sm:$0xff]  ;;  %vm533_vm3 = vcmask 31744   ;;  %v531_v6 = vld [vmem:[#allocation2 + $0xc8] sm:$0xff]  ;;  %v532_v7 = vld [vmem:[#allocation2 + $0xd0] sm:$0x3]  ;;  %vm536_vm4 = vcmask 25600  }
  0x73   : > { %534 = vst.msk [vmem:[#allocation2] sm:$0xff] %vm533_vm3, %v530_v5 }
  0x74   : > { %535 = vst.msk [vmem:[#allocation2 + $0x8] sm:$0xff] %vm533_vm3, %v531_v6 }
  0x75   : > { %537 = vst.msk [vmem:[#allocation2 + $0x10] sm:$0x3] %vm536_vm4, %v532_v7 }
  0x76 PF: > { %2332 = vmatpush.msra.mxu2 %v2899_v1  ;;  %2333 = vmatpush.msra.mxu3 %v2899_v1  ;;  %v546_v8 = vld [vmem:[%s2877_s12 + $0x40] sm:$0xff]  ;;  %vm554_vm5 = vcmask 130048   ;;  %v547_v12 = vld [vmem:[%s2877_s12 + $0x48] sm:$0xff]  ;;  %v548_v16 = vld [vmem:[%s2877_s12 + $0x50] sm:$0xff]  ;;  %v2976_v24 = vperm.slane %v2904_v2, 0  ;;  %v2979_v25 = vperm.slane %v2909_v3, 0 }
  0x77   : > { %v550_v9 = vld [vmem:[%s2877_s12 + $0x60] sm:$0xff]  ;;  %617 = vmatpush.msra.mxu0 %v2899_v1  ;;  %2331 = vmatpush.msra.mxu1 %v2899_v1  ;;  %v551_v13 = vld [vmem:[%s2877_s12 + $0x68] sm:$0xff]  ;;  %v552_v17 = vld [vmem:[%s2877_s12 + $0x70] sm:$0xff]  ;;  %vm723_vm6 = vcmask 31744   ;;  %p2240_p11 = scmp.ne.s32.totalorder %s2627_s23, 1 }
  0x78   : > { %2335 = vmatpush.msra.mxu2 %v2894_v0  ;;  %2336 = vmatpush.msra.mxu3 %v2894_v0  ;;  %v538_v10 = vld [vmem:[%s2877_s12] sm:$0xff]  ;;  %v539_v14 = vld [vmem:[%s2877_s12 + $0x8] sm:$0xff]  ;;  %v540_v18 = vld [vmem:[%s2877_s12 + $0x10] sm:$0xff] }
  0x79   : > { %v542_v11 = vld [vmem:[%s2877_s12 + $0x20] sm:$0xff]  ;;  %2232 = vmatmul.msk.f32.vlgmr.msra.gmra.mxu2 %vm554_vm5, %v546_v8  ;;  %2236 = vmatmul.msk.f32.vlgmr.msra.gmra.mxu3 %vm554_vm5, %v550_v9  ;;  %v543_v15 = vld [vmem:[%s2877_s12 + $0x28] sm:$0xff]  ;;  %v544_v19 = vld [vmem:[%s2877_s12 + $0x30] sm:$0xff] }
  0x7a   : > { %618 = vmatpush.msra.mxu0 %v2894_v0  ;;  %2334 = vmatpush.msra.mxu1 %v2894_v0  ;;  %v549_v20 = vld [vmem:[%s2877_s12 + $0x58] sm:$0xff] }
  0x7b   : > { %2224 = vmatmul.msk.f32.vlgmr.msra.gmra.mxu0 %vm554_vm5, %v538_v10  ;;  %2228 = vmatmul.msk.f32.vlgmr.msra.gmra.mxu1 %vm554_vm5, %v542_v11  ;;  %v553_v21 = vld [vmem:[%s2877_s12 + $0x78] sm:$0xff] }
  0x7c   : > { %v541_v22 = vld [vmem:[%s2877_s12 + $0x18] sm:$0xff] }
  0x7d   : > { %v545_v23 = vld [vmem:[%s2877_s12 + $0x38] sm:$0xff] }
  0x81   : > { %2233 = vmatmul.msk.f32.gmra.mxu2 %vm554_vm5, %v547_v12  ;;  %2237 = vmatmul.msk.f32.gmra.mxu3 %vm554_vm5, %v551_v13 }
  0x83   : > { %2225 = vmatmul.msk.f32.gmra.mxu0 %vm554_vm5, %v539_v14  ;;  %2229 = vmatmul.msk.f32.gmra.mxu1 %vm554_vm5, %v543_v15 }
  0x89   : > { %2234 = vmatmul.msk.f32.gmra.mxu2 %vm554_vm5, %v548_v16  ;;  %2238 = vmatmul.msk.f32.gmra.mxu3 %vm554_vm5, %v552_v17 }
  0x8b   : > { %2226 = vmatmul.msk.f32.gmra.mxu0 %vm554_vm5, %v540_v18  ;;  %2230 = vmatmul.msk.f32.gmra.mxu1 %vm554_vm5, %v544_v19 }
  0x91   : > { %2235 = vmatmul.msk.f32.gmra.mxu2 %vm554_vm5, %v549_v20  ;;  %2239 = vmatmul.msk.f32.gmra.mxu3 %vm554_vm5, %v553_v21 }
  0x93   : > { %2227 = vmatmul.msk.f32.gmra.mxu0 %vm554_vm5, %v541_v22  ;;  %2231 = vmatmul.msk.f32.gmra.mxu1 %vm554_vm5, %v545_v23 }
  0xf8   : > { %v620_v26 = vpop.f32.mrf.mxu0  ;;  %v632_v27 = vpop.f32.mrf.mxu1 }
  0xf9   : > { %v671_v28 = vmul.f32 %v2976_v24, %v620_v26  ;;  %v675_v29 = vmul.f32 %v2976_v24, %v632_v27 }
  0xfb   : > { %v690_v30 = vadd.f32 %v2979_v25, %v671_v28  ;;  %v694_v31 = vadd.f32 %v2979_v25, %v675_v29 }
  0xfc   : > { %v644_v32 = vpop.f32.mrf.mxu2  ;;  %v656_v33 = vpop.f32.mrf.mxu3 }
  0xfd   : > { %v706_v34 = vmax.f32 %v690_v30, 0.0  ;;  %v710_v35 = vmax.f32 %v694_v31, 0.0  ;;  %v679_v36 = vmul.f32 %v2976_v24, %v644_v32  ;;  %v683_v37 = vmul.f32 %v2976_v24, %v656_v33 }
  0xff   : > { %724 = vst.msk [vmem:[#allocation2 + $0x19] sm:$0xff] %vm723_vm6, %v706_v34  ;;  %v698_v38 = vadd.f32 %v2979_v25, %v679_v36  ;;  %v702_v39 = vadd.f32 %v2979_v25, %v683_v37 }
 0x100   : > { %728 = vst.msk [vmem:[#allocation2 + $0x49] sm:$0xff] %vm723_vm6, %v710_v35  ;;  %v623_v40 = vpop.f32.mrf.mxu0  ;;  %v635_v41 = vpop.f32.mrf.mxu1 }
 0x101   : > { %v714_v42 = vmax.f32 %v698_v38, 0.0  ;;  %v718_v43 = vmax.f32 %v702_v39, 0.0  ;;  %v672_v44 = vmul.f32 %v2976_v24, %v623_v40  ;;  %v676_v45 = vmul.f32 %v2976_v24, %v635_v41 }
 0x103   : > { %732 = vst.msk [vmem:[#allocation2 + $0x79] sm:$0xff] %vm723_vm6, %v714_v42  ;;  %v691_v46 = vadd.f32 %v2979_v25, %v672_v44  ;;  %v695_v47 = vadd.f32 %v2979_v25, %v676_v45 }
 0x104   : > { %736 = vst.msk [vmem:[#allocation2 + $0xa9] sm:$0xff] %vm723_vm6, %v718_v43  ;;  %v647_v48 = vpop.f32.mrf.mxu2  ;;  %v659_v49 = vpop.f32.mrf.mxu3 }
 0x105   : > { %v707_v50 = vmax.f32 %v691_v46, 0.0  ;;  %v711_v51 = vmax.f32 %v695_v47, 0.0  ;;  %v680_v52 = vmul.f32 %v2976_v24, %v647_v48  ;;  %v684_v53 = vmul.f32 %v2976_v24, %v659_v49 }
 0x107   : > { %725 = vst.msk [vmem:[#allocation2 + $0x21] sm:$0xff] %vm723_vm6, %v707_v50  ;;  %v699_v54 = vadd.f32 %v2979_v25, %v680_v52  ;;  %v703_v55 = vadd.f32 %v2979_v25, %v684_v53 }
 0x108   : > { %729 = vst.msk [vmem:[#allocation2 + $0x51] sm:$0xff] %vm723_vm6, %v711_v51  ;;  %v626_v56 = vpop.f32.mrf.mxu0  ;;  %v638_v57 = vpop.f32.mrf.mxu1 }
 0x109   : > { %v715_v58 = vmax.f32 %v699_v54, 0.0  ;;  %v719_v59 = vmax.f32 %v703_v55, 0.0  ;;  %v673_v60 = vmul.f32 %v2976_v24, %v626_v56  ;;  %v677_v61 = vmul.f32 %v2976_v24, %v638_v57 }
 0x10b   : > { %733 = vst.msk [vmem:[#allocation2 + $0x81] sm:$0xff] %vm723_vm6, %v715_v58  ;;  %v692_v62 = vadd.f32 %v2979_v25, %v673_v60  ;;  %v696_v63 = vadd.f32 %v2979_v25, %v677_v61 }
 0x10c   : > { %737 = vst.msk [vmem:[#allocation2 + $0xb1] sm:$0xff] %vm723_vm6, %v719_v59  ;;  %v650_v2 = vpop.f32.mrf.mxu2  ;;  %v662_v3 = vpop.f32.mrf.mxu3 }
 0x10d   : > { %v708_v4 = vmax.f32 %v692_v62, 0.0  ;;  %v712_v5 = vmax.f32 %v696_v63, 0.0  ;;  %v681_v6 = vmul.f32 %v2976_v24, %v650_v2  ;;  %v685_v7 = vmul.f32 %v2976_v24, %v662_v3 }
 0x10f   : > { %726 = vst.msk [vmem:[#allocation2 + $0x31] sm:$0xff] %vm723_vm6, %v708_v4  ;;  %v700_v8 = vadd.f32 %v2979_v25, %v681_v6  ;;  %v704_v9 = vadd.f32 %v2979_v25, %v685_v7 }
 0x110   : > { %730 = vst.msk [vmem:[#allocation2 + $0x61] sm:$0xff] %vm723_vm6, %v712_v5  ;;  %v629_v10 = vpop.f32.mrf.mxu0  ;;  %v641_v11 = vpop.f32.mrf.mxu1 }
 0x111   : > { %v716_v12 = vmax.f32 %v700_v8, 0.0  ;;  %v720_v13 = vmax.f32 %v704_v9, 0.0  ;;  %v674_v14 = vmul.f32 %v2976_v24, %v629_v10  ;;  %v678_v15 = vmul.f32 %v2976_v24, %v641_v11 }
 0x113   : > { %734 = vst.msk [vmem:[#allocation2 + $0x91] sm:$0xff] %vm723_vm6, %v716_v12  ;;  %v693_v16 = vadd.f32 %v2979_v25, %v674_v14  ;;  %v697_v17 = vadd.f32 %v2979_v25, %v678_v15 }
 0x114   : > { %738 = vst.msk [vmem:[#allocation2 + $0xc1] sm:$0xff] %vm723_vm6, %v720_v13  ;;  %v653_v18 = vpop.f32.mrf.mxu2  ;;  %v665_v19 = vpop.f32.mrf.mxu3 }
 0x115   : > { %v709_v20 = vmax.f32 %v693_v16, 0.0  ;;  %v713_v21 = vmax.f32 %v697_v17, 0.0  ;;  %v682_v22 = vmul.f32 %v2976_v24, %v653_v18  ;;  %v686_v23 = vmul.f32 %v2976_v24, %v665_v19 }
 0x117   : > { %727 = vst.msk [vmem:[#allocation2 + $0x39] sm:$0xff] %vm723_vm6, %v709_v20  ;;  %v701_v26 = vadd.f32 %v2979_v25, %v682_v22  ;;  %v705_v27 = vadd.f32 %v2979_v25, %v686_v23 }
 0x118   : > { %731 = vst.msk [vmem:[#allocation2 + $0x69] sm:$0xff] %vm723_vm6, %v713_v21  ;;  %742 = sbr.rel (%p2240_p11) target bundleno = 288 (0x120), region = 84 }
 0x119   : > { %v717_v28 = vmax.f32 %v701_v26, 0.0  ;;  %v721_v29 = vmax.f32 %v705_v27, 0.0 }
 0x11b   : > { %735 = vst.msk [vmem:[#allocation2 + $0x99] sm:$0xff] %vm723_vm6, %v717_v28 }
 0x11c   : > { %739 = vst.msk [vmem:[#allocation2 + $0xc9] sm:$0xff] %vm723_vm6, %v721_v29 }
 0x11d   : > { %v2648_v30 = vmov 0.0  }
 0x11e   : > { %744 = vst.msk [vmem:[#allocation2 + $0xd9] sm:$0xff] %vm723_vm6, %v2648_v30 }
 0x11f   : > { %745 = vst.msk [vmem:[#allocation2 + $0xe1] sm:$0xff] %vm723_vm6, %v2648_v30 }
 0x120 PF: > { %p2241_p1 = scmp.eq.s32.totalorder %s2627_s23, 1 }
 0x122   : > { %749 = sbr.rel (%p2241_p1) target bundleno = 432 (0x1b0), region = 88 }
 0x127   : > { %772 = vmatpush.msra.mxu0 %v2899_v1  ;;  %2337 = vmatpush.msra.mxu1 %v2899_v1  ;;  %v750_v31 = vld [vmem:[%s439_s5] sm:$0xff]  ;;  %v751_v32 = vld [vmem:[%s439_s5 + $0x8] sm:$0xff] }
 0x129   : > { %773 = vmatpush.msra.mxu0 %v2894_v0  ;;  %2338 = vmatpush.msra.mxu1 %v2894_v0 }
 0x12a   : > { %2242 = vmatmul.msk.f32.vlgmr.msra.gmra.mxu0 %vm554_vm5, %v750_v31  ;;  %2243 = vmatmul.msk.f32.vlgmr.msra.gmra.mxu1 %vm554_vm5, %v751_v32 }
 0x1a7   : > { %v775_v33 = vpop.f32.mrf.mxu0  ;;  %v778_v34 = vpop.f32.mrf.mxu1 }
 0x1a8   : > { %v781_v35 = vmul.f32 %v775_v33, %v2976_v24  ;;  %v782_v36 = vmul.f32 %v778_v34, %v2976_v24 }
 0x1aa   : > { %v783_v1 = vadd.f32 %v781_v35, %v2979_v25  ;;  %v784_v37 = vadd.f32 %v782_v36, %v2979_v25 }
 0x1ac   : > { %v785_v38 = vmax.f32 %v783_v1, 0.0  ;;  %v786_v39 = vmax.f32 %v784_v37, 0.0 }
 0x1ae   : > { %788 = vst.msk [vmem:[#allocation2 + $0xd9] sm:$0xff] %vm723_vm6, %v785_v38 }
 0x1af   : > { %789 = vst.msk [vmem:[#allocation2 + $0xe1] sm:$0xff] %vm723_vm6, %v786_v39 }
 0x1b0 PF: > { %v1463_v0 = vld [vmem:[#allocation2 + $0x31] sm:$0xff]  ;;  %v806_v40 = vld [vmem:[#allocation2 + $0x1] sm:$0xff]  ;;  %s2649_s9 = smov 4   ;;  %s2650_s15 = smov 8   ;;  %v1017_v25 = vld [vmem:[#allocation2 + $0x19] sm:$0xff]  ;;  %vm1261_vm7 = vcmask 1043456  }
 0x1b1   : > { %1511 = vrot.lane.b32.xlu0 %v1463_v0, %s2649_s9  ;;  %854 = vrot.lane.b32.xlu1 %v806_v40, %s2649_s9  ;;  %v822_v41 = vld [vmem:[#allocation2 + $0x2] sm:$0xff]  ;;  %v1479_v24 = vld [vmem:[#allocation2 + $0x32] sm:$0xff]  ;;  %v1033_v42 = vld [vmem:[#allocation2 + $0x1a] sm:$0xff]  ;;  %s3729_s25 = sld [smem:[#allocation22_spill]]  ;;  %vm982_vm8 = vcmask 64512   ;;  %vm1212_vm9 = vcmask 97280  }
 0x1b2   : > { %918 = vrot.lane.b32.xlu2 %v822_v41, %s2650_s15  ;;  %v1464_v43 = vld [vmem:[#allocation2 + $0x39] sm:$0xff]  ;;  %v807_v45 = vld [vmem:[#allocation2 + $0x9] sm:$0xff]  ;;  %v1018_v46 = vld [vmem:[#allocation2 + $0x21] sm:$0xff]  ;;  %s3731_s30 = sld [smem:[#allocation25_spill]]  ;;  %s2330_s10 = sshll.u32 %s2627_s23, 4 }
 0x1b3   : > { %v1480_v44 = vld [vmem:[#allocation2 + $0x3a] sm:$0xff]  ;;  %v823_v47 = vld [vmem:[#allocation2 + $0xa] sm:$0xff]  ;;  %v1034_v48 = vld [vmem:[#allocation2 + $0x22] sm:$0xff]  ;;  %s3732_s22 = sld [smem:[#allocation23_spill]]  ;;  %s2083_s16 = sshll.u32 %s2911_s8, 4  ;;  %s2084_s16 = int_to_ptr.vmem [resolvable:$true] %s2083_s16 }
 0x1b4   : > { %v1465_v49 = vld [vmem:[#allocation2 + $0x49] sm:$0xff]  ;;  %v1466_v51 = vld [vmem:[#allocation2 + $0x51] sm:$0xff]  ;;  %v3073_v53 = vld [vmem:[#allocation2 + $0x61] sm:$0xff]  ;;  %s3733_s13 = sld [smem:[#allocation24_spill]] }
 0x1b5   : > { %v1481_v50 = vld [vmem:[#allocation2 + $0x4a] sm:$0xff]  ;;  %v1482_v52 = vld [vmem:[#allocation2 + $0x52] sm:$0xff]  ;;  %v3075_v54 = vld [vmem:[#allocation2 + $0x62] sm:$0xff]  ;;  %s3734_s20 = sld [smem:[#allocation26_spill]] }
 0x1b6   : > { %v3085_v55 = vld [vmem:[#allocation2 + $0x69] sm:$0xff]  ;;  %v3118_v2 = vld [vmem:[#allocation2 + $0x79] sm:$0xff]  ;;  %v3132_v6 = vld [vmem:[#allocation2 + $0x81] sm:$0xff]  ;;  %s3735_s7 = sld [smem:[#allocation27_spill]] }
 0x1b7   : > { %v3087_v56 = vld [vmem:[#allocation2 + $0x6a] sm:$0xff]  ;;  %s3730_s28 = smov %s3729_s25  ;;  %v3120_v3 = vld [vmem:[#allocation2 + $0x7a] sm:$0xff]  ;;  %v3134_v7 = vld [vmem:[#allocation2 + $0x82] sm:$0xff]  ;;  %s3736_s11 = sld [smem:[#allocation14_spill]] }
 0x1b8   : > { %v1000_v57 = vld [vmem:[%s3729_s25 + $0x8] sm:$0xf]  ;;  %v999_v58 = vld [vmem:[%s3730_s28] sm:$0xff]  ;;  %v2245_v60 = vld [vmem:[%s3730_s28 + $0x18] sm:$0xf]  ;;  %s3737_s5 = sld [smem:[#allocation28_spill]] }
 0x1b9   : > { %1575 = vrot.lane.b32.xlu0 %v1479_v24, %s2650_s15  ;;  %1065 = vrot.lane.b32.xlu1 %v1017_v25, %s2649_s9  ;;  %v2281_v59 = vld [vmem:[%s3730_s28 + $0x28] sm:$0xf]  ;;  %v2280_v61 = vld [vmem:[%s3730_s28 + $0x20] sm:$0xff]  ;;  %v3144_v14 = vld [vmem:[#allocation2 + $0x30] sm:$0xff] }
 0x1ba   : > { %1129 = vrot.lane.b32.xlu2 %v1033_v42, %s2650_s15  ;;  %2263 = vmatpush.msk.msra.mxu1 %vm1261_vm7, %v1000_v57  ;;  %v2244_v62 = vld [vmem:[%s3730_s28 + $0x10] sm:$0xff]  ;;  %v790_v8 = vld [vmem:[#allocation2] sm:$0xff]  ;;  %v1001_v15 = vld [vmem:[#allocation2 + $0x18] sm:$0xff] }
 0x1bb   : > { %2282 = vmatpush.msk.msra.mxu2 %vm1261_vm7, %v2281_v59  ;;  %2246 = vmatpush.msk.msra.mxu0 %vm1261_vm7, %v2245_v60  ;;  %v3158_v23 = vld [vmem:[#allocation2 + $0x91] sm:$0xff]  ;;  %v791_v33 = vld [vmem:[#allocation2 + $0x8] sm:$0xff]  ;;  %v1002_v34 = vld [vmem:[#allocation2 + $0x20] sm:$0xff] }
 0x1bc   : > { %1396 = vmatpush.msra.mxu1 %v999_v58  ;;  %v3160_v26 = vld [vmem:[#allocation2 + $0x92] sm:$0xff]  ;;  %v3188_v41 = vld [vmem:[#allocation2 + $0x9a] sm:$0xff] }
 0x1bd   : > { %1724 = vmatpush.msra.mxu2 %v2280_v61  ;;  %1280 = vmatpush.msra.mxu0 %v2244_v62  ;;  %v3166_v27 = vld [vmem:[#allocation2 + $0x38] sm:$0xff] }
 0x1be   : > { %v3186_v40 = vld [vmem:[#allocation2 + $0x99] sm:$0xff] }
 0x1c1   : > { %1513 = vrot.lane.b32.xlu0 %v1464_v43, %s2649_s9  ;;  %1577 = vrot.lane.b32.xlu1 %v1480_v44, %s2650_s15 }
 0x1c2   : > { %856 = vrot.lane.b32.xlu2 %v807_v45, %s2649_s9 }
 0x1c9   : > { %1067 = vrot.lane.b32.xlu0 %v1018_v46, %s2649_s9  ;;  %920 = vrot.lane.b32.xlu1 %v823_v47, %s2650_s15 }
 0x1ca   : > { %1131 = vrot.lane.b32.xlu2 %v1034_v48, %s2650_s15 }
 0x1d1   : > { %1515 = vrot.lane.b32.xlu0 %v1465_v49, %s2649_s9  ;;  %1579 = vrot.lane.b32.xlu1 %v1481_v50, %s2650_s15 }
 0x1d2   : > { %858 = vrot.lane.b32.xlu2 %v1017_v25, %s2649_s9 }
 0x1d9   : > { %1069 = vrot.lane.b32.xlu0 %v1463_v0, %s2649_s9  ;;  %922 = vrot.lane.b32.xlu1 %v1033_v42, %s2650_s15 }
 0x1da   : > { %1133 = vrot.lane.b32.xlu2 %v1479_v24, %s2650_s15 }
 0x1e1   : > { %1517 = vrot.lane.b32.xlu0 %v1466_v51, %s2649_s9  ;;  %1581 = vrot.lane.b32.xlu1 %v1482_v52, %s2650_s15 }
 0x1e2   : > { %860 = vrot.lane.b32.xlu2 %v1018_v46, %s2649_s9 }
 0x1e9   : > { %1071 = vrot.lane.b32.xlu0 %v1464_v43, %s2649_s9  ;;  %924 = vrot.lane.b32.xlu1 %v1034_v48, %s2650_s15 }
 0x1ea   : > { %1135 = vrot.lane.b32.xlu2 %v1480_v44, %s2650_s15 }
 0x1f1   : > { %1519 = vrot.lane.b32.xlu0 %v3073_v53, %s2649_s9  ;;  %1583 = vrot.lane.b32.xlu1 %v3075_v54, %s2650_s15 }
 0x1f2   : > { %862 = vrot.lane.b32.xlu2 %v1463_v0, %s2649_s9 }
 0x1f9   : > { %1073 = vrot.lane.b32.xlu0 %v1465_v49, %s2649_s9  ;;  %926 = vrot.lane.b32.xlu1 %v1479_v24, %s2650_s15  ;;  %v3194_v24 = vld [vmem:[#allocation2 + $0x48] sm:$0xff] }
 0x1fa   : > { %1137 = vrot.lane.b32.xlu2 %v1481_v50, %s2650_s15 }
 0x201   : > { %1521 = vrot.lane.b32.xlu0 %v3085_v55, %s2649_s9  ;;  %1585 = vrot.lane.b32.xlu1 %v3087_v56, %s2650_s15 }
 0x202   : > { %864 = vrot.lane.b32.xlu2 %v1464_v43, %s2649_s9 }
 0x209   : > { %1075 = vrot.lane.b32.xlu0 %v1466_v51, %s2649_s9  ;;  %928 = vrot.lane.b32.xlu1 %v1480_v44, %s2650_s15 }
 0x20a   : > { %1139 = vrot.lane.b32.xlu2 %v1482_v52, %s2650_s15 }
 0x20c   : > { %v919_v63 = vpop.permute.xlu2 %918 }
 0x211   : > { %1523 = vrot.lane.b32.xlu0 %v3118_v2, %s2649_s9  ;;  %1587 = vrot.lane.b32.xlu1 %v3120_v3, %s2650_s15 }
 0x212   : > { %866 = vrot.lane.b32.xlu2 %v1465_v49, %s2649_s9 }
 0x214   : > { %v1130_v4 = vpop.permute.xlu2 %1129 }
 0x219   : > { %1077 = vrot.lane.b32.xlu0 %v3073_v53, %s2649_s9  ;;  %930 = vrot.lane.b32.xlu1 %v1481_v50, %s2650_s15 }
 0x21a   : > { %1141 = vrot.lane.b32.xlu2 %v3075_v54, %s2650_s15 }
 0x21c   : > { %v857_v5 = vpop.permute.xlu2 %856 }
 0x21d   : > { %v967_v35 = vsel %vm723_vm6, %v791_v33, %v857_v5 }
 0x221   : > { %1525 = vrot.lane.b32.xlu0 %v3132_v6, %s2649_s9  ;;  %1589 = vrot.lane.b32.xlu1 %v3134_v7, %s2650_s15 }
 0x222   : > { %868 = vrot.lane.b32.xlu2 %v1466_v51, %s2649_s9 }
 0x223   : > { %v1512_v9 = vpop.permute.xlu0 %1511  ;;  %v855_v10 = vpop.permute.xlu1 %854 }
 0x224   : > { %v966_v11 = vsel %vm723_vm6, %v790_v8, %v855_v10  ;;  %v1132_v13 = vpop.permute.xlu2 %1131  ;;  %v1623_v16 = vsel %vm723_vm6, %v3144_v14, %v1512_v9  ;;  %v3246_v9 = vld [vmem:[#allocation2 + $0xb2] sm:$0xff]  ;;  %v3252_v10 = vld [vmem:[#allocation2 + $0x60] sm:$0xff] }
 0x225   : > { %v983_v12 = vsel %vm982_vm8, %v966_v11, %v919_v63 }
 0x226   : > { %2264 = vmatmul.msk.f32.vlgmr.msra.gmra.mxu1 %vm1212_vm9, %v983_v12 }
 0x229   : > { %1079 = vrot.lane.b32.xlu0 %v3085_v55, %s2649_s9  ;;  %932 = vrot.lane.b32.xlu1 %v1482_v52, %s2650_s15 }
 0x22a   : > { %1143 = vrot.lane.b32.xlu2 %v3087_v56, %s2650_s15 }
 0x22b   : > { %v1576_v17 = vpop.permute.xlu0 %1575  ;;  %v1066_v18 = vpop.permute.xlu1 %1065 }
 0x22c   : > { %v1177_v19 = vsel %vm723_vm6, %v1001_v15, %v1066_v18  ;;  %v1639_v20 = vsel %vm982_vm8, %v1623_v16, %v1576_v17  ;;  %v859_v22 = vpop.permute.xlu2 %858 }
 0x22d   : > { %2283 = vmatmul.msk.f32.vlgmr.msra.gmra.mxu2 %vm1212_vm9, %v1639_v20  ;;  %v1193_v21 = vsel %vm982_vm8, %v1177_v19, %v1130_v4  ;;  %v968_v46 = vsel %vm723_vm6, %v1001_v15, %v859_v22 }
 0x22e   : > { %2247 = vmatmul.msk.f32.vlgmr.msra.gmra.mxu0 %vm1212_vm9, %v1193_v21 }
 0x231   : > { %1527 = vrot.lane.b32.xlu0 %v3158_v23, %s2649_s9  ;;  %1591 = vrot.lane.b32.xlu1 %v3160_v26, %s2650_s15 }
 0x232   : > { %870 = vrot.lane.b32.xlu2 %v3073_v53, %s2649_s9  ;;  %v3215_v53 = vld [vmem:[#allocation2 + $0xa9] sm:$0xff] }
 0x233   : > { %v1514_v28 = vpop.permute.xlu0 %1513  ;;  %v1578_v29 = vpop.permute.xlu1 %1577 }
 0x234   : > { %v1624_v30 = vsel %vm723_vm6, %v3166_v27, %v1514_v28  ;;  %v1134_v32 = vpop.permute.xlu2 %1133  ;;  %v3274_v28 = vld [vmem:[#allocation2 + $0xc2] sm:$0xff] }
 0x235   : > { %v1640_v31 = vsel %vm982_vm8, %v1624_v30, %v1578_v29 }
 0x236   : > { %2284 = vmatmul.msk.f32.gmra.mxu2 %vm1212_vm9, %v1640_v31 }
 0x239   : > { %1081 = vrot.lane.b32.xlu0 %v3118_v2, %s2649_s9  ;;  %934 = vrot.lane.b32.xlu1 %v3075_v54, %s2650_s15  ;;  %v3217_v54 = vld [vmem:[#allocation2 + $0xaa] sm:$0xff] }
 0x23a   : > { %1145 = vrot.lane.b32.xlu2 %v3120_v3, %s2650_s15 }
 0x23b   : > { %v1068_v36 = vpop.permute.xlu0 %1067  ;;  %v921_v1 = vpop.permute.xlu1 %920 }
 0x23c   : > { %v1178_v37 = vsel %vm723_vm6, %v1002_v34, %v1068_v36  ;;  %v984_v38 = vsel %vm982_vm8, %v967_v35, %v921_v1  ;;  %v861_v0 = vpop.permute.xlu2 %860 }
 0x23d   : > { %2265 = vmatmul.msk.f32.gmra.mxu1 %vm1212_vm9, %v984_v38  ;;  %v1194_v39 = vsel %vm982_vm8, %v1178_v37, %v1132_v13  ;;  %v969_v61 = vsel %vm723_vm6, %v1002_v34, %v861_v0 }
 0x23e   : > { %2248 = vmatmul.msk.f32.gmra.mxu0 %vm1212_vm9, %v1194_v39  ;;  %v3301_v39 = vld [vmem:[#allocation2 + $0xca] sm:$0xff] }
 0x241   : > { %1529 = vrot.lane.b32.xlu0 %v3186_v40, %s2649_s9  ;;  %1593 = vrot.lane.b32.xlu1 %v3188_v41, %s2650_s15 }
 0x242   : > { %872 = vrot.lane.b32.xlu2 %v3085_v55, %s2649_s9  ;;  %v3223_v55 = vld [vmem:[#allocation2 + $0x50] sm:$0xff] }
 0x243   : > { %v1516_v25 = vpop.permute.xlu0 %1515  ;;  %v1580_v42 = vpop.permute.xlu1 %1579 }
 0x244   : > { %v1625_v43 = vsel %vm723_vm6, %v3194_v24, %v1516_v25  ;;  %v1136_v45 = vpop.permute.xlu2 %1135 }
 0x245   : > { %v1641_v44 = vsel %vm982_vm8, %v1625_v43, %v1580_v42 }
 0x246   : > { %2285 = vmatmul.msk.f32.gmra.mxu2 %vm1212_vm9, %v1641_v44 }
 0x249   : > { %1083 = vrot.lane.b32.xlu0 %v3132_v6, %s2649_s9  ;;  %936 = vrot.lane.b32.xlu1 %v3087_v56, %s2650_s15 }
 0x24a   : > { %1147 = vrot.lane.b32.xlu2 %v3134_v7, %s2650_s15 }
 0x24b   : > { %v1070_v47 = vpop.permute.xlu0 %1069  ;;  %v923_v48 = vpop.permute.xlu1 %922 }
 0x24c   : > { %v1179_v49 = vsel %vm723_vm6, %v3144_v14, %v1070_v47  ;;  %v985_v50 = vsel %vm982_vm8, %v968_v46, %v923_v48  ;;  %v863_v52 = vpop.permute.xlu2 %862 }
 0x24d   : > { %2266 = vmatmul.msk.f32.gmra.mxu1 %vm1212_vm9, %v985_v50  ;;  %v1195_v51 = vsel %vm982_vm8, %v1179_v49, %v1134_v32  ;;  %v970_v17 = vsel %vm723_vm6, %v3144_v14, %v863_v52  ;;  %v3279_v14 = vld [vmem:[#allocation2 + $0x68] sm:$0xff] }
 0x24e   : > { %2249 = vmatmul.msk.f32.gmra.mxu0 %vm1212_vm9, %v1195_v51  ;;  %v1493_v51 = vld [vmem:[#allocation2 + $0xda] sm:$0xff] }
 0x251   : > { %1531 = vrot.lane.b32.xlu0 %v3215_v53, %s2649_s9  ;;  %1595 = vrot.lane.b32.xlu1 %v3217_v54, %s2650_s15 }
 0x252   : > { %874 = vrot.lane.b32.xlu2 %v3118_v2, %s2649_s9 }
 0x253   : > { %v1518_v56 = vpop.permute.xlu0 %1517  ;;  %v1582_v57 = vpop.permute.xlu1 %1581 }
 0x254   : > { %v1626_v58 = vsel %vm723_vm6, %v3223_v55, %v1518_v56  ;;  %v1138_v60 = vpop.permute.xlu2 %1137 }
 0x255   : > { %v1642_v59 = vsel %vm982_vm8, %v1626_v58, %v1582_v57 }
 0x256   : > { %2286 = vmatmul.msk.f32.gmra.mxu2 %vm1212_vm9, %v1642_v59 }
 0x259   : > { %1085 = vrot.lane.b32.xlu0 %v3158_v23, %s2649_s9  ;;  %938 = vrot.lane.b32.xlu1 %v3120_v3, %s2650_s15  ;;  %v3244_v3 = vld [vmem:[#allocation2 + $0xb1] sm:$0xff] }
 0x25a   : > { %1149 = vrot.lane.b32.xlu2 %v3160_v26, %s2650_s15 }
 0x25b   : > { %v1072_v62 = vpop.permute.xlu0 %1071  ;;  %v925_v63 = vpop.permute.xlu1 %924 }
 0x25c   : > { %v1180_v2 = vsel %vm723_vm6, %v3166_v27, %v1072_v62  ;;  %v986_v4 = vsel %vm982_vm8, %v969_v61, %v925_v63  ;;  %v865_v8 = vpop.permute.xlu2 %864 }
 0x25d   : > { %2267 = vmatmul.msk.f32.gmra.mxu1 %vm1212_vm9, %v986_v4  ;;  %v1196_v5 = vsel %vm982_vm8, %v1180_v2, %v1136_v45  ;;  %v971_v34 = vsel %vm723_vm6, %v3166_v27, %v865_v8  ;;  %v3306_v27 = vld [vmem:[#allocation2 + $0x78] sm:$0xff]  ;;  %v1494_v8 = vld [vmem:[#allocation2 + $0xe2] sm:$0xff] }
 0x25e   : > { %2250 = vmatmul.msk.f32.gmra.mxu0 %vm1212_vm9, %v1196_v5 }
 0x261   : > { %1533 = vrot.lane.b32.xlu0 %v3244_v3, %s2649_s9  ;;  %1597 = vrot.lane.b32.xlu1 %v3246_v9, %s2650_s15 }
 0x262   : > { %876 = vrot.lane.b32.xlu2 %v3132_v6, %s2649_s9 }
 0x263   : > { %v1520_v11 = vpop.permute.xlu0 %1519  ;;  %v1584_v12 = vpop.permute.xlu1 %1583 }
 0x264   : > { %v1627_v13 = vsel %vm723_vm6, %v3252_v10, %v1520_v11  ;;  %v1140_v16 = vpop.permute.xlu2 %1139 }
 0x265   : > { %v1643_v15 = vsel %vm982_vm8, %v1627_v13, %v1584_v12 }
 0x266   : > { %2287 = vmatmul.msk.f32.gmra.mxu2 %vm1212_vm9, %v1643_v15 }
 0x269   : > { %1087 = vrot.lane.b32.xlu0 %v3186_v40, %s2649_s9  ;;  %940 = vrot.lane.b32.xlu1 %v3134_v7, %s2650_s15  ;;  %v1475_v7 = vld [vmem:[#allocation2 + $0xc1] sm:$0xff] }
 0x26a   : > { %1151 = vrot.lane.b32.xlu2 %v3188_v41, %s2650_s15 }
 0x26b   : > { %v1074_v18 = vpop.permute.xlu0 %1073  ;;  %v927_v19 = vpop.permute.xlu1 %926 }
 0x26c   : > { %v1181_v6 = vsel %vm723_vm6, %v3194_v24, %v1074_v18  ;;  %v987_v20 = vsel %vm982_vm8, %v970_v17, %v927_v19  ;;  %v867_v22 = vpop.permute.xlu2 %866 }
 0x26d   : > { %2268 = vmatmul.msk.f32.gmra.mxu1 %vm1212_vm9, %v987_v20  ;;  %v1197_v21 = vsel %vm982_vm8, %v1181_v6, %v1138_v60  ;;  %v972_v45 = vsel %vm723_vm6, %v3194_v24, %v867_v22  ;;  %v3330_v24 = vld [vmem:[#allocation2 + $0x80] sm:$0xff] }
 0x26e   : > { %2251 = vmatmul.msk.f32.gmra.mxu0 %vm1212_vm9, %v1197_v21  ;;  %v1846_v60 = vld [vmem:[%s3731_s30] sm:$0xf]  ;;  %s2319_s30 = sshll.u32 %s3736_s11, 5  ;;  %s2537_s11 = scalar_lea.hbm %s3737_s5, 512 }
 0x26f   : > { %2299 = vmatpush.msk.msra.mxu3 %vm1261_vm7, %v1846_v60 }
 0x271   : > { %1535 = vrot.lane.b32.xlu0 %v1475_v7, %s2649_s9  ;;  %1599 = vrot.lane.b32.xlu1 %v3274_v28, %s2650_s15 }
 0x272   : > { %878 = vrot.lane.b32.xlu2 %v3158_v23, %s2649_s9 }
 0x273   : > { %v1522_v29 = vpop.permute.xlu0 %1521  ;;  %v1586_v30 = vpop.permute.xlu1 %1585 }
 0x274   : > { %v1628_v31 = vsel %vm723_vm6, %v3279_v14, %v1522_v29  ;;  %v1142_v33 = vpop.permute.xlu2 %1141 }
 0x275   : > { %v1644_v32 = vsel %vm982_vm8, %v1628_v31, %v1586_v30  ;;  %v3383_v30 = vld [vmem:[#allocation2 + $0x98] sm:$0xff]  ;;  %v3388_v31 = vld [vmem:[%s3733_s13] ss:$0 sm:$0xff] }
 0x276   : > { %2288 = vmatmul.msk.f32.gmra.mxu2 %vm1212_vm9, %v1644_v32 }
 0x279   : > { %1089 = vrot.lane.b32.xlu0 %v3215_v53, %s2649_s9  ;;  %942 = vrot.lane.b32.xlu1 %v3160_v26, %s2650_s15  ;;  %v1476_v26 = vld [vmem:[#allocation2 + $0xc9] sm:$0xff] }
 0x27a   : > { %1153 = vrot.lane.b32.xlu2 %v3217_v54, %s2650_s15 }
 0x27b   : > { %v1076_v35 = vpop.permute.xlu0 %1075  ;;  %v929_v36 = vpop.permute.xlu1 %928 }
 0x27c   : > { %v1182_v23 = vsel %vm723_vm6, %v3223_v55, %v1076_v35  ;;  %v988_v1 = vsel %vm982_vm8, %v971_v34, %v929_v36  ;;  %v869_v38 = vpop.permute.xlu2 %868 }
 0x27d   : > { %2269 = vmatmul.msk.f32.gmra.mxu1 %vm1212_vm9, %v988_v1  ;;  %v1198_v37 = vsel %vm982_vm8, %v1182_v23, %v1140_v16 }
 0x27e   : > { %2252 = vmatmul.msk.f32.gmra.mxu0 %vm1212_vm9, %v1198_v37 }
 0x281   : > { %1537 = vrot.lane.b32.xlu0 %v1476_v26, %s2649_s9  ;;  %1601 = vrot.lane.b32.xlu1 %v3301_v39, %s2650_s15 }
 0x282   : > { %880 = vrot.lane.b32.xlu2 %v3186_v40, %s2649_s9 }
 0x283   : > { %v1524_v0 = vpop.permute.xlu0 %1523  ;;  %v1588_v25 = vpop.permute.xlu1 %1587 }
 0x284   : > { %v1629_v42 = vsel %vm723_vm6, %v3306_v27, %v1524_v0  ;;  %v1144_v44 = vpop.permute.xlu2 %1143 }
 0x285   : > { %v1645_v43 = vsel %vm982_vm8, %v1629_v42, %v1588_v25 }
 0x286   : > { %2289 = vmatmul.msk.f32.gmra.mxu2 %vm1212_vm9, %v1645_v43 }
 0x289   : > { %1091 = vrot.lane.b32.xlu0 %v3244_v3, %s2649_s9  ;;  %944 = vrot.lane.b32.xlu1 %v3188_v41, %s2650_s15  ;;  %v1477_v41 = vld [vmem:[#allocation2 + $0xd9] sm:$0xff] }
 0x28a   : > { %1155 = vrot.lane.b32.xlu2 %v3246_v9, %s2650_s15 }
 0x28b   : > { %v1078_v46 = vpop.permute.xlu0 %1077  ;;  %v931_v47 = vpop.permute.xlu1 %930 }
 0x28c   : > { %v1183_v40 = vsel %vm723_vm6, %v3252_v10, %v1078_v46  ;;  %v989_v48 = vsel %vm982_vm8, %v972_v45, %v931_v47  ;;  %v871_v50 = vpop.permute.xlu2 %870 }
 0x28d   : > { %2270 = vmatmul.msk.f32.gmra.mxu1 %vm1212_vm9, %v989_v48  ;;  %v1199_v49 = vsel %vm982_vm8, %v1183_v40, %v1142_v33 }
 0x28e   : > { %2253 = vmatmul.msk.f32.gmra.mxu0 %vm1212_vm9, %v1199_v49  ;;  %v3406_v49 = vld [vmem:[#allocation2 + $0xa8] sm:$0xff] }
 0x291   : > { %1539 = vrot.lane.b32.xlu0 %v1477_v41, %s2649_s9  ;;  %1603 = vrot.lane.b32.xlu1 %v1493_v51, %s2650_s15 }
 0x292   : > { %882 = vrot.lane.b32.xlu2 %v3215_v53, %s2649_s9  ;;  %v973_v53 = vsel %vm723_vm6, %v3223_v55, %v869_v38  ;;  %v3357_v55 = vld [vmem:[#allocation2 + $0x90] sm:$0xff] }
 0x293   : > { %v1526_v52 = vpop.permute.xlu0 %1525  ;;  %v1590_v56 = vpop.permute.xlu1 %1589 }
 0x294   : > { %v1630_v57 = vsel %vm723_vm6, %v3330_v24, %v1526_v52  ;;  %v1146_v59 = vpop.permute.xlu2 %1145 }
 0x295   : > { %v1646_v58 = vsel %vm982_vm8, %v1630_v57, %v1590_v56 }
 0x296   : > { %2290 = vmatmul.msk.f32.gmra.mxu2 %vm1212_vm9, %v1646_v58 }
 0x299   : > { %1093 = vrot.lane.b32.xlu0 %v1475_v7, %s2649_s9  ;;  %946 = vrot.lane.b32.xlu1 %v3217_v54, %s2650_s15  ;;  %v1478_v54 = vld [vmem:[#allocation2 + $0xe1] sm:$0xff] }
 0x29a   : > { %1157 = vrot.lane.b32.xlu2 %v3274_v28, %s2650_s15 }
 0x29b   : > { %v1080_v61 = vpop.permute.xlu0 %1079  ;;  %v933_v62 = vpop.permute.xlu1 %932 }
 0x29c   : > { %v1184_v63 = vsel %vm723_vm6, %v3279_v14, %v1080_v61  ;;  %v990_v2 = vsel %vm982_vm8, %v973_v53, %v933_v62  ;;  %v873_v5 = vpop.permute.xlu2 %872 }
 0x29d   : > { %2271 = vmatmul.msk.f32.gmra.mxu1 %vm1212_vm9, %v990_v2  ;;  %v1200_v4 = vsel %vm982_vm8, %v1184_v63, %v1144_v44  ;;  %v975_v0 = vsel %vm723_vm6, %v3279_v14, %v873_v5 }
 0x29e   : > { %2254 = vmatmul.msk.f32.gmra.mxu0 %vm1212_vm9, %v1200_v4 }
 0x2a1   : > { %1541 = vrot.lane.b32.xlu0 %v1478_v54, %s2649_s9  ;;  %1605 = vrot.lane.b32.xlu1 %v1494_v8, %s2650_s15 }
 0x2a2   : > { %884 = vrot.lane.b32.xlu2 %v3244_v3, %s2649_s9  ;;  %v974_v3 = vsel %vm723_vm6, %v3252_v10, %v871_v50  ;;  %v3381_v10 = vld [vmem:[%s3732_s22] ss:$0 sm:$0xff] }
 0x2a3   : > { %v1528_v11 = vpop.permute.xlu0 %1527  ;;  %v1592_v12 = vpop.permute.xlu1 %1591 }
 0x2a4   : > { %v1631_v13 = vsel %vm723_vm6, %v3357_v55, %v1528_v11  ;;  %v1148_v16 = vpop.permute.xlu2 %1147  ;;  %v1398_v7 = vpop.f32.mrf.mxu1  ;;  %v3423_v11 = vld [vmem:[#allocation2 + $0xb0] sm:$0xff] }
 0x2a5   : > { %v1647_v15 = vsel %vm982_vm8, %v1631_v13, %v1592_v12 }
 0x2a6   : > { %2291 = vmatmul.msk.f32.gmra.mxu2 %vm1212_vm9, %v1647_v15 }
 0x2a9   : > { %1095 = vrot.lane.b32.xlu0 %v1476_v26, %s2649_s9  ;;  %948 = vrot.lane.b32.xlu1 %v3246_v9, %s2650_s15  ;;  %s2080_s9 = sadd.s32 %s2330_s10, %s2319_s30 }
 0x2aa   : > { %1159 = vrot.lane.b32.xlu2 %v3301_v39, %s2650_s15  ;;  %s2320_s25 = sshll.u32 %s2080_s9, 3 }
 0x2ab   : > { %v1082_v17 = vpop.permute.xlu0 %1081  ;;  %v1282_v19 = vpop.f32.mrf.mxu0  ;;  %s2082_s24 = scalar_lea.hbm %s3737_s5, %s2320_s25 }
 0x2ac   : > { %v1185_v18 = vsel %vm723_vm6, %v3306_v27, %v1082_v17  ;;  %v935_v6 = vpop.permute.xlu1 %934  ;;  %v875_v22 = vpop.permute.xlu2 %874  ;;  %v1399_v9 = vadd.f32 %v1398_v7, %v1282_v19  ;;  %s2085_s23 = sshll.u32 %s2082_s24, 4  ;;  %s2086_s23 = int_to_ptr.hbm [resolvable:$true] %s2085_s23 }
 0x2ad   : > { %v991_v20 = vsel %vm982_vm8, %v974_v3, %v935_v6  ;;  %v1201_v21 = vsel %vm982_vm8, %v1185_v18, %v1146_v59  ;;  %v976_v53 = vsel %vm723_vm6, %v3306_v27, %v875_v22  ;;  %s2531_s14 = sshra.s32 %s2086_s23, 4  ;;  %s2532_s14 = int_to_ptr.hbm [resolvable:$true] %s2531_s14 }
 0x2ae   : > { %2272 = vmatmul.msk.f32.gmra.mxu1 %vm1212_vm9, %v991_v20  ;;  %2255 = vmatmul.msk.f32.gmra.mxu0 %vm1212_vm9, %v1201_v21  ;;  %s2533_s17 = scalar_lea.hbm %s2532_s14, 128  ;;  %p2538_p13 = scmp.lt.s32.totalorder %s2532_s14, %s3737_s5 }
 0x2af   : > { %p2534_p6 = scmp.ne.s32.totalorder %s2532_s14, %s2533_s17  ;;  %p2539_p0 = scmp.lt.s32.totalorder %s2537_s11, %s2533_s17 }
 0x2b0   : > { %v1726_v28 = vpop.f32.mrf.mxu2 }
 0x2b1   : > { %v1774_v29 = vadd.f32 %v1726_v28, %v1399_v9  ;;  %p2535_p7 = pnand %p2534_p6, %p2798_p9  ;;  %p2540_p3 = por %p2539_p0, %p2538_p13 }
 0x2b3   : > { %v1794_v32 = vmul.f32 %v3381_v10, %v1774_v29  ;;  %v1530_v33 = vpop.permute.xlu0 %1529  ;;  %p2536_p12 = pneg %p2535_p7 }
 0x2b4   : > { %v1632_v34 = vsel %vm723_vm6, %v3383_v30, %v1530_v33  ;;  %v1594_v35 = vpop.permute.xlu1 %1593  ;;  %v1150_v1 = vpop.permute.xlu2 %1149 }
 0x2b5   : > { %v1648_v36 = vsel %vm982_vm8, %v1632_v34, %v1594_v35  ;;  %v1814_v23 = vadd.f32 %v3388_v31, %v1794_v32  ;;  %v3440_v35 = vld [vmem:[#allocation2 + $0xc0] sm:$0xff]  ;;  %p2541_p2 = pnand %p2540_p3, %p2536_p12 }
 0x2b6   : > { %2292 = vmatmul.msk.f32.gmra.mxu2 %vm1212_vm9, %v1648_v36 }
 0x2b7   : > { %v1830_v37 = vmax.f32 %v1814_v23, 0.0 }
 0x2b9   : > { %2300 = vmatmul.msk.f32.vlgmr.msra.gmra.mxu3 %vm723_vm6, %v1830_v37  ;;  %v1729_v44 = vpop.f32.mrf.mxu2 }
 0x2ba   : > { %v1401_v38 = vpop.f32.mrf.mxu1 }
 0x2bb   : > { %v1084_v26 = vpop.permute.xlu0 %1083  ;;  %v1285_v39 = vpop.f32.mrf.mxu0 }
 0x2bc   : > { %v1186_v25 = vsel %vm723_vm6, %v3330_v24, %v1084_v26  ;;  %v1402_v42 = vadd.f32 %v1401_v38, %v1285_v39  ;;  %v937_v43 = vpop.permute.xlu1 %936  ;;  %v877_v48 = vpop.permute.xlu2 %876 }
 0x2bd   : > { %v992_v45 = vsel %vm982_vm8, %v975_v0, %v937_v43  ;;  %v1202_v46 = vsel %vm982_vm8, %v1186_v25, %v1148_v16  ;;  %v977_v20 = vsel %vm723_vm6, %v3330_v24, %v877_v48 }
 0x2be   : > { %v1775_v47 = vadd.f32 %v1729_v44, %v1402_v42  ;;  %2273 = vmatmul.msk.f32.gmra.mxu1 %vm1212_vm9, %v992_v45  ;;  %2256 = vmatmul.msk.f32.gmra.mxu0 %vm1212_vm9, %v1202_v46 }
 0x2c0   : > { %v1795_v40 = vmul.f32 %v3381_v10, %v1775_v47 }
 0x2c2   : > { %v1815_v14 = vadd.f32 %v3388_v31, %v1795_v40 }
 0x2c3   : > { %v1532_v50 = vpop.permute.xlu0 %1531 }
 0x2c4   : > { %v1633_v41 = vsel %vm723_vm6, %v3406_v49, %v1532_v50  ;;  %v1596_v51 = vpop.permute.xlu1 %1595  ;;  %v1831_v52 = vmax.f32 %v1815_v14, 0.0  ;;  %v1152_v58 = vpop.permute.xlu2 %1151  ;;  %v3457_v50 = vld [vmem:[#allocation2 + $0xc8] sm:$0xff] }
 0x2c5   : > { %v1649_v56 = vsel %vm982_vm8, %v1633_v41, %v1596_v51 }
 0x2c6   : > { %2293 = vmatmul.msk.f32.gmra.mxu2 %vm1212_vm9, %v1649_v56  ;;  %2301 = vmatmul.msk.f32.gmra.mxu3 %vm723_vm6, %v1831_v52 }
 0x2c9   : > { %v1732_v2 = vpop.f32.mrf.mxu2 }
 0x2ca   : > { %v1404_v57 = vpop.f32.mrf.mxu1 }
 0x2cb   : > { %v1086_v59 = vpop.permute.xlu0 %1085  ;;  %v1288_v60 = vpop.f32.mrf.mxu0 }
 0x2cc   : > { %v1187_v61 = vsel %vm723_vm6, %v3357_v55, %v1086_v59  ;;  %v1405_v62 = vadd.f32 %v1404_v57, %v1288_v60  ;;  %v939_v63 = vpop.permute.xlu1 %938  ;;  %v879_v17 = vpop.permute.xlu2 %878 }
 0x2cd   : > { %v993_v4 = vsel %vm982_vm8, %v976_v53, %v939_v63  ;;  %v1203_v5 = vsel %vm982_vm8, %v1187_v61, %v1150_v1  ;;  %v978_v42 = vsel %vm723_vm6, %v3357_v55, %v879_v17 }
 0x2ce   : > { %v1776_v54 = vadd.f32 %v1732_v2, %v1405_v62  ;;  %2274 = vmatmul.msk.f32.gmra.mxu1 %vm1212_vm9, %v993_v4  ;;  %2257 = vmatmul.msk.f32.gmra.mxu0 %vm1212_vm9, %v1203_v5 }
 0x2d0   : > { %v1796_v8 = vmul.f32 %v3381_v10, %v1776_v54 }
 0x2d2   : > { %v1816_v27 = vadd.f32 %v3388_v31, %v1796_v8 }
 0x2d3   : > { %v1534_v12 = vpop.permute.xlu0 %1533 }
 0x2d4   : > { %v1634_v13 = vsel %vm723_vm6, %v3423_v11, %v1534_v12  ;;  %v1598_v15 = vpop.permute.xlu1 %1597  ;;  %v1832_v16 = vmax.f32 %v1816_v27, 0.0  ;;  %v1154_v33 = vpop.permute.xlu2 %1153 }
 0x2d5   : > { %v1650_v3 = vsel %vm982_vm8, %v1634_v13, %v1598_v15  ;;  %v1461_v13 = vld [vmem:[#allocation2 + $0xd8] sm:$0xff] }
 0x2d6   : > { %2294 = vmatmul.msk.f32.gmra.mxu2 %vm1212_vm9, %v1650_v3  ;;  %2302 = vmatmul.msk.f32.gmra.mxu3 %vm723_vm6, %v1832_v16 }
 0x2d9   : > { %v1735_v9 = vpop.f32.mrf.mxu2 }
 0x2da   : > { %v1407_v18 = vpop.f32.mrf.mxu1 }
 0x2db   : > { %v1088_v19 = vpop.permute.xlu0 %1087  ;;  %v1291_v6 = vpop.f32.mrf.mxu0 }
 0x2dc   : > { %v1188_v21 = vsel %vm723_vm6, %v3383_v30, %v1088_v19  ;;  %v1408_v22 = vadd.f32 %v1407_v18, %v1291_v6  ;;  %v941_v7 = vpop.permute.xlu1 %940  ;;  %v881_v26 = vpop.permute.xlu2 %880 }
 0x2dd   : > { %v994_v28 = vsel %vm982_vm8, %v977_v20, %v941_v7  ;;  %v1204_v29 = vsel %vm982_vm8, %v1188_v21, %v1152_v58  ;;  %v979_v61 = vsel %vm723_vm6, %v3383_v30, %v881_v26 }
 0x2de   : > { %v1777_v32 = vadd.f32 %v1735_v9, %v1408_v22  ;;  %2275 = vmatmul.msk.f32.gmra.mxu1 %vm1212_vm9, %v994_v28  ;;  %2258 = vmatmul.msk.f32.gmra.mxu0 %vm1212_vm9, %v1204_v29 }
 0x2e0   : > { %v1797_v34 = vmul.f32 %v3381_v10, %v1777_v32 }
 0x2e2   : > { %v1817_v24 = vadd.f32 %v3388_v31, %v1797_v34 }
 0x2e3   : > { %v1536_v36 = vpop.permute.xlu0 %1535 }
 0x2e4   : > { %v1635_v23 = vsel %vm723_vm6, %v3440_v35, %v1536_v36  ;;  %v1600_v1 = vpop.permute.xlu1 %1599  ;;  %v1833_v37 = vmax.f32 %v1817_v24, 0.0  ;;  %v1156_v41 = vpop.permute.xlu2 %1155 }
 0x2e5   : > { %v1651_v38 = vsel %vm982_vm8, %v1635_v23, %v1600_v1  ;;  %v1462_v23 = vld [vmem:[#allocation2 + $0xe0] sm:$0xff] }
 0x2e6   : > { %2295 = vmatmul.msk.f32.gmra.mxu2 %vm1212_vm9, %v1651_v38  ;;  %2303 = vmatmul.msk.f32.gmra.mxu3 %vm723_vm6, %v1833_v37 }
 0x2e9   : > { %v1738_v46 = vpop.f32.mrf.mxu2 }
 0x2ea   : > { %v1410_v39 = vpop.f32.mrf.mxu1 }
 0x2eb   : > { %v1090_v0 = vpop.permute.xlu0 %1089  ;;  %v1294_v25 = vpop.f32.mrf.mxu0 }
 0x2ec   : > { %v1189_v43 = vsel %vm723_vm6, %v3406_v49, %v1090_v0  ;;  %v1411_v44 = vadd.f32 %v1410_v39, %v1294_v25  ;;  %v943_v45 = vpop.permute.xlu1 %942  ;;  %v883_v4 = vpop.permute.xlu2 %882 }
 0x2ed   : > { %v995_v47 = vsel %vm982_vm8, %v978_v42, %v943_v45  ;;  %v1205_v40 = vsel %vm982_vm8, %v1189_v43, %v1154_v33  ;;  %v980_v22 = vsel %vm723_vm6, %v3406_v49, %v883_v4 }
 0x2ee   : > { %v1778_v48 = vadd.f32 %v1738_v46, %v1411_v44  ;;  %2276 = vmatmul.msk.f32.gmra.mxu1 %vm1212_vm9, %v995_v47  ;;  %2259 = vmatmul.msk.f32.gmra.mxu0 %vm1212_vm9, %v1205_v40 }
 0x2f0   : > { %v1798_v14 = vmul.f32 %v3381_v10, %v1778_v48 }
 0x2f2   : > { %v1818_v55 = vadd.f32 %v3388_v31, %v1798_v14 }
 0x2f3   : > { %v1538_v51 = vpop.permute.xlu0 %1537 }
 0x2f4   : > { %v1636_v52 = vsel %vm723_vm6, %v3457_v50, %v1538_v51  ;;  %v1602_v56 = vpop.permute.xlu1 %1601  ;;  %v1834_v57 = vmax.f32 %v1818_v55, 0.0  ;;  %v1158_v19 = vpop.permute.xlu2 %1157 }
 0x2f5   : > { %v1652_v58 = vsel %vm982_vm8, %v1636_v52, %v1602_v56 }
 0x2f6   : > { %2296 = vmatmul.msk.f32.gmra.mxu2 %vm1212_vm9, %v1652_v58  ;;  %2304 = vmatmul.msk.f32.gmra.mxu3 %vm723_vm6, %v1834_v57 }
 0x2f9   : > { %v1741_v5 = vpop.f32.mrf.mxu2 }
 0x2fa   : > { %v1413_v59 = vpop.f32.mrf.mxu1 }
 0x2fb   : > { %v1092_v60 = vpop.permute.xlu0 %1091  ;;  %v1297_v53 = vpop.f32.mrf.mxu0 }
 0x2fc   : > { %v1190_v62 = vsel %vm723_vm6, %v3423_v11, %v1092_v60  ;;  %v1414_v63 = vadd.f32 %v1413_v59, %v1297_v53  ;;  %v945_v2 = vpop.permute.xlu1 %944  ;;  %v885_v24 = vpop.permute.xlu2 %884  ;;  %v3510_v53 = vld [vmem:[%s3734_s20] ss:$0 sm:$0xff]  ;;  %s2068_s20 = scalar_lea.sflag [#allocation5], %s2873_s0 }
 0x2fd   : > { %v996_v54 = vsel %vm982_vm8, %v979_v61, %v945_v2  ;;  %v1206_v8 = vsel %vm982_vm8, %v1190_v62, %v1156_v41  ;;  %v981_v43 = vsel %vm723_vm6, %v3423_v11, %v885_v24 }
 0x2fe   : > { %v1779_v27 = vadd.f32 %v1741_v5, %v1414_v63  ;;  %2277 = vmatmul.msk.f32.gmra.mxu1 %vm1212_vm9, %v996_v54  ;;  %2260 = vmatmul.msk.f32.gmra.mxu0 %vm1212_vm9, %v1206_v8  ;;  %v3515_v63 = vld [vmem:[%s3735_s7] ss:$0 sm:$0xff] }
 0x300   : > { %v1799_v12 = vmul.f32 %v3381_v10, %v1779_v27  ;;  %v2003_v27 = vld [vmem:[%s2877_s12] sm:$0xff] }
 0x302   : > { %v1819_v30 = vadd.f32 %v3388_v31, %v1799_v12 }
 0x303   : > { %v1540_v15 = vpop.permute.xlu0 %1539 }
 0x304   : > { %v1637_v16 = vsel %vm723_vm6, %v1461_v13, %v1540_v15  ;;  %v1604_v17 = vpop.permute.xlu1 %1603  ;;  %v1835_v3 = vmax.f32 %v1819_v30, 0.0  ;;  %v1160_v0 = vpop.permute.xlu2 %1159 }
 0x305   : > { %v1653_v18 = vsel %vm982_vm8, %v1637_v16, %v1604_v17 }
 0x306   : > { %2297 = vmatmul.msk.f32.gmra.mxu2 %vm1212_vm9, %v1653_v18  ;;  %2305 = vmatmul.msk.f32.gmra.mxu3 %vm723_vm6, %v1835_v3 }
 0x309   : > { %v1744_v29 = vpop.f32.mrf.mxu2 }
 0x30a   : > { %v1416_v6 = vpop.f32.mrf.mxu1 }
 0x30b   : > { %v1094_v20 = vpop.permute.xlu0 %1093  ;;  %v1300_v21 = vpop.f32.mrf.mxu0 }
 0x30c   : > { %v1191_v7 = vsel %vm723_vm6, %v3440_v35, %v1094_v20  ;;  %v1417_v9 = vadd.f32 %v1416_v6, %v1300_v21  ;;  %v947_v28 = vpop.permute.xlu1 %946 }
 0x30d   : > { %v997_v32 = vsel %vm982_vm8, %v980_v22, %v947_v28  ;;  %v1207_v33 = vsel %vm982_vm8, %v1191_v7, %v1158_v19  ;;  %v2004_v19 = vld [vmem:[%s2877_s12 + $0x8] sm:$0xff] }
 0x30e   : > { %v1780_v34 = vadd.f32 %v1744_v29, %v1417_v9  ;;  %2278 = vmatmul.msk.f32.gmra.mxu1 %vm1212_vm9, %v997_v32  ;;  %2261 = vmatmul.msk.f32.gmra.mxu0 %vm1212_vm9, %v1207_v33 }
 0x310   : > { %v1800_v36 = vmul.f32 %v3381_v10, %v1780_v34 }
 0x312   : > { %v1820_v49 = vadd.f32 %v3388_v31, %v1800_v36 }
 0x313   : > { %v1542_v1 = vpop.permute.xlu0 %1541 }
 0x314   : > { %v1638_v35 = vsel %vm723_vm6, %v1462_v23, %v1542_v1  ;;  %v1606_v37 = vpop.permute.xlu1 %1605  ;;  %v1836_v38 = vmax.f32 %v1820_v49, 0.0  ;;  %v2005_v23 = vld [vmem:[%s2877_s12 + $0x10] sm:$0xff] }
 0x315   : > { %v1654_v26 = vsel %vm982_vm8, %v1638_v35, %v1606_v37 }
 0x316   : > { %2298 = vmatmul.msk.f32.gmra.mxu2 %vm1212_vm9, %v1654_v26  ;;  %2306 = vmatmul.msk.f32.gmra.mxu3 %vm723_vm6, %v1836_v38 }
 0x319   : > { %v1747_v47 = vpop.f32.mrf.mxu2 }
 0x31a   : > { %v1419_v39 = vpop.f32.mrf.mxu1 }
 0x31b   : > { %v1096_v25 = vpop.permute.xlu0 %1095  ;;  %v1303_v42 = vpop.f32.mrf.mxu0 }
 0x31c   : > { %v1192_v44 = vsel %vm723_vm6, %v3457_v50, %v1096_v25  ;;  %v1420_v45 = vadd.f32 %v1419_v39, %v1303_v42  ;;  %v949_v46 = vpop.permute.xlu1 %948 }
 0x31d   : > { %v998_v40 = vsel %vm982_vm8, %v981_v43, %v949_v46  ;;  %v1208_v48 = vsel %vm982_vm8, %v1192_v44, %v1160_v0  ;;  %v2006_v46 = vld [vmem:[%s2877_s12 + $0x18] sm:$0xff] }
 0x31e   : > { %v1781_v14 = vadd.f32 %v1747_v47, %v1420_v45  ;;  %2279 = vmatmul.msk.f32.gmra.mxu1 %vm1212_vm9, %v998_v40  ;;  %2262 = vmatmul.msk.f32.gmra.mxu0 %vm1212_vm9, %v1208_v48 }
 0x320   : > { %v1801_v55 = vmul.f32 %v3381_v10, %v1781_v14 }
 0x322   : > { %v1821_v41 = vadd.f32 %v3388_v31, %v1801_v55 }
 0x324   : > { %v1837_v11 = vmax.f32 %v1821_v41, 0.0 }
 0x326   : > { %2307 = vmatmul.msk.f32.gmra.mxu3 %vm723_vm6, %v1837_v11 }
 0x329   : > { %v1750_v56 = vpop.f32.mrf.mxu2 }
 0x32b   : > { %v1422_v50 = vpop.f32.mrf.mxu1  ;;  %v1306_v51 = vpop.f32.mrf.mxu0 }
 0x32c   : > { %v1423_v52 = vadd.f32 %v1422_v50, %v1306_v51 }
 0x32e   : > { %v1782_v57 = vadd.f32 %v1750_v56, %v1423_v52 }
 0x330   : > { %v1802_v58 = vmul.f32 %v3381_v10, %v1782_v57 }
 0x332   : > { %v1822_v59 = vadd.f32 %v3388_v31, %v1802_v58 }
 0x334   : > { %v1838_v60 = vmax.f32 %v1822_v59, 0.0  ;;  %v2007_v59 = vld [vmem:[%s2877_s12 + $0x20] sm:$0xff] }
 0x336   : > { %2308 = vmatmul.msk.f32.gmra.mxu3 %vm723_vm6, %v1838_v60 }
 0x339   : > { %v1753_v5 = vpop.f32.mrf.mxu2 }
 0x33b   : > { %v1425_v61 = vpop.f32.mrf.mxu1  ;;  %v1309_v62 = vpop.f32.mrf.mxu0 }
 0x33c   : > { %v1426_v2 = vadd.f32 %v1425_v61, %v1309_v62  ;;  %v1915_v4 = vpop.f32.mrf.mxu3 }
 0x33d   : > { %v1967_v54 = vmul.f32 %v3510_v53, %v1915_v4 }
 0x33e   : > { %v1783_v8 = vadd.f32 %v1753_v5, %v1426_v2 }
 0x33f   : > { %v1987_v12 = vadd.f32 %v3515_v63, %v1967_v54 }
 0x340   : > { %v1803_v13 = vmul.f32 %v3381_v10, %v1783_v8 }
 0x341   : > { %v2019_v30 = vadd.f32 %v2003_v27, %v1987_v12 }
 0x342   : > { %v1823_v15 = vadd.f32 %v3388_v31, %v1803_v13 }
 0x343   : > { %v2035_v16 = vmax.f32 %v2019_v30, 0.0 }
 0x344   : > { %v1839_v17 = vmax.f32 %v1823_v15, 0.0 }
 0x345   : > { %2051 = vst.msk [vmem:[%s2911_s8] sm:$0xff] %vm554_vm5, %v2035_v16  ;;  %v2008_v16 = vld [vmem:[%s2877_s12 + $0x28] sm:$0xff] }
 0x346   : > { %2309 = vmatmul.msk.f32.gmra.mxu3 %vm723_vm6, %v1839_v17 }
 0x349   : > { %v1918_v3 = vpop.f32.mrf.mxu3  ;;  %v1756_v7 = vpop.f32.mrf.mxu2 }
 0x34a   : > { %v1968_v18 = vmul.f32 %v3510_v53, %v1918_v3 }
 0x34b   : > { %v1428_v6 = vpop.f32.mrf.mxu1  ;;  %v1312_v20 = vpop.f32.mrf.mxu0 }
 0x34c   : > { %v1988_v21 = vadd.f32 %v3515_v63, %v1968_v18  ;;  %v1429_v22 = vadd.f32 %v1428_v6, %v1312_v20 }
 0x34e   : > { %v2020_v9 = vadd.f32 %v2004_v19, %v1988_v21  ;;  %v1784_v28 = vadd.f32 %v1756_v7, %v1429_v22 }
 0x350   : > { %v2036_v29 = vmax.f32 %v2020_v9, 0.0  ;;  %v1804_v32 = vmul.f32 %v3381_v10, %v1784_v28 }
 0x352   : > { %2052 = vst.msk [vmem:[%s2911_s8 + $0x8] sm:$0xff] %vm554_vm5, %v2036_v29  ;;  %v1824_v33 = vadd.f32 %v3388_v31, %v1804_v32 }
 0x354   : > { %v1840_v34 = vmax.f32 %v1824_v33, 0.0  ;;  %v2009_v33 = vld [vmem:[%s2877_s12 + $0x30] sm:$0xff] }
 0x356   : > { %2310 = vmatmul.msk.f32.gmra.mxu3 %vm723_vm6, %v1840_v34 }
 0x359   : > { %v1921_v24 = vpop.f32.mrf.mxu3  ;;  %v1759_v38 = vpop.f32.mrf.mxu2 }
 0x35a   : > { %v1969_v36 = vmul.f32 %v3510_v53, %v1921_v24 }
 0x35b   : > { %v1431_v49 = vpop.f32.mrf.mxu1  ;;  %v1315_v1 = vpop.f32.mrf.mxu0 }
 0x35c   : > { %v1989_v35 = vadd.f32 %v3515_v63, %v1969_v36  ;;  %v1432_v37 = vadd.f32 %v1431_v49, %v1315_v1 }
 0x35e   : > { %v2021_v26 = vadd.f32 %v2005_v23, %v1989_v35  ;;  %v1785_v39 = vadd.f32 %v1759_v38, %v1432_v37 }
 0x360   : > { %v2037_v0 = vmax.f32 %v2021_v26, 0.0  ;;  %v1805_v25 = vmul.f32 %v3381_v10, %v1785_v39 }
 0x362   : > { %2053 = vst.msk [vmem:[%s2911_s8 + $0x10] sm:$0xff] %vm554_vm5, %v2037_v0  ;;  %v1825_v42 = vadd.f32 %v3388_v31, %v1805_v25 }
 0x364   : > { %v1841_v43 = vmax.f32 %v1825_v42, 0.0  ;;  %v2010_v42 = vld [vmem:[%s2877_s12 + $0x38] sm:$0xff] }
 0x366   : > { %2311 = vmatmul.msk.f32.gmra.mxu3 %vm723_vm6, %v1841_v43 }
 0x369   : > { %v1924_v44 = vpop.f32.mrf.mxu3  ;;  %v1762_v55 = vpop.f32.mrf.mxu2 }
 0x36a   : > { %v1970_v45 = vmul.f32 %v3510_v53, %v1924_v44 }
 0x36b   : > { %v1434_v47 = vpop.f32.mrf.mxu1  ;;  %v1318_v40 = vpop.f32.mrf.mxu0 }
 0x36c   : > { %v1990_v48 = vadd.f32 %v3515_v63, %v1970_v45  ;;  %v1435_v14 = vadd.f32 %v1434_v47, %v1318_v40 }
 0x36e   : > { %v2022_v41 = vadd.f32 %v2006_v46, %v1990_v48  ;;  %v1786_v11 = vadd.f32 %v1762_v55, %v1435_v14  ;;  %v2011_v46 = vld [vmem:[%s2877_s12 + $0x40] sm:$0xff] }
 0x370   : > { %v2038_v50 = vmax.f32 %v2022_v41, 0.0  ;;  %v1806_v51 = vmul.f32 %v3381_v10, %v1786_v11  ;;  %v2012_v41 = vld [vmem:[%s2877_s12 + $0x48] sm:$0xff] }
 0x372   : > { %2054 = vst.msk [vmem:[%s2911_s8 + $0x18] sm:$0xff] %vm554_vm5, %v2038_v50  ;;  %v1826_v52 = vadd.f32 %v3388_v31, %v1806_v51 }
 0x374   : > { %v1842_v56 = vmax.f32 %v1826_v52, 0.0 }
 0x376   : > { %2312 = vmatmul.msk.f32.gmra.mxu3 %vm723_vm6, %v1842_v56 }
 0x379   : > { %v1927_v57 = vpop.f32.mrf.mxu3  ;;  %v1765_v4 = vpop.f32.mrf.mxu2 }
 0x37a   : > { %v1971_v58 = vmul.f32 %v3510_v53, %v1927_v57  ;;  %v2013_v57 = vld [vmem:[%s2877_s12 + $0x50] sm:$0xff] }
 0x37b   : > { %v1437_v60 = vpop.f32.mrf.mxu1  ;;  %v1321_v61 = vpop.f32.mrf.mxu0 }
 0x37c   : > { %v1991_v62 = vadd.f32 %v3515_v63, %v1971_v58  ;;  %v1438_v2 = vadd.f32 %v1437_v60, %v1321_v61 }
 0x37e   : > { %v2023_v5 = vadd.f32 %v2007_v59, %v1991_v62  ;;  %v1787_v54 = vadd.f32 %v1765_v4, %v1438_v2  ;;  %v2014_v2 = vld [vmem:[%s2877_s12 + $0x58] sm:$0xff] }
 0x380   : > { %v2039_v8 = vmax.f32 %v2023_v5, 0.0  ;;  %v1807_v27 = vmul.f32 %v3381_v10, %v1787_v54 }
 0x382   : > { %2055 = vst.msk [vmem:[%s2911_s8 + $0x20] sm:$0xff] %vm554_vm5, %v2039_v8  ;;  %v1827_v12 = vadd.f32 %v3388_v31, %v1807_v27 }
 0x384   : > { %v1843_v13 = vmax.f32 %v1827_v12, 0.0  ;;  %v2015_v12 = vld [vmem:[%s2877_s12 + $0x60] sm:$0xff] }
 0x386   : > { %2313 = vmatmul.msk.f32.gmra.mxu3 %vm723_vm6, %v1843_v13 }
 0x389   : > { %v1930_v30 = vpop.f32.mrf.mxu3  ;;  %v1768_v6 = vpop.f32.mrf.mxu2 }
 0x38a   : > { %v1972_v15 = vmul.f32 %v3510_v53, %v1930_v30 }
 0x38b   : > { %v1440_v17 = vpop.f32.mrf.mxu1  ;;  %v1324_v3 = vpop.f32.mrf.mxu0 }
 0x38c   : > { %v1992_v18 = vadd.f32 %v3515_v63, %v1972_v15  ;;  %v1441_v19 = vadd.f32 %v1440_v17, %v1324_v3  ;;  %v2016_v3 = vld [vmem:[%s2877_s12 + $0x68] sm:$0xff] }
 0x38e   : > { %v2024_v20 = vadd.f32 %v2008_v16, %v1992_v18  ;;  %v1788_v21 = vadd.f32 %v1768_v6, %v1441_v19 }
 0x390   : > { %v2040_v22 = vmax.f32 %v2024_v20, 0.0  ;;  %v1808_v7 = vmul.f32 %v3381_v10, %v1788_v21 }
 0x392   : > { %2056 = vst.msk [vmem:[%s2911_s8 + $0x28] sm:$0xff] %vm554_vm5, %v2040_v22  ;;  %v1828_v9 = vadd.f32 %v3388_v31, %v1808_v7  ;;  %v2017_v22 = vld [vmem:[%s2877_s12 + $0x70] sm:$0xff] }
 0x394   : > { %v1844_v28 = vmax.f32 %v1828_v9, 0.0 }
 0x396   : > { %2314 = vmatmul.msk.f32.gmra.mxu3 %vm723_vm6, %v1844_v28 }
 0x399   : > { %v1933_v29 = vpop.f32.mrf.mxu3  ;;  %v1771_v49 = vpop.f32.mrf.mxu2 }
 0x39a   : > { %v1973_v32 = vmul.f32 %v3510_v53, %v1933_v29 }
 0x39b   : > { %v1443_v34 = vpop.f32.mrf.mxu1  ;;  %v1327_v24 = vpop.f32.mrf.mxu0 }
 0x39c   : > { %v1993_v36 = vadd.f32 %v3515_v63, %v1973_v32  ;;  %v1444_v23 = vadd.f32 %v1443_v34, %v1327_v24 }
 0x39e   : > { %v2025_v1 = vadd.f32 %v2009_v33, %v1993_v36  ;;  %v1789_v35 = vadd.f32 %v1771_v49, %v1444_v23  ;;  %v2018_v33 = vld [vmem:[%s2877_s12 + $0x78] sm:$0xff] }
 0x3a0   : > { %v2041_v37 = vmax.f32 %v2025_v1, 0.0  ;;  %v1809_v38 = vmul.f32 %v3381_v10, %v1789_v35 }
 0x3a2   : > { %2057 = vst.msk [vmem:[%s2911_s8 + $0x30] sm:$0xff] %vm554_vm5, %v2041_v37  ;;  %v1829_v26 = vadd.f32 %v3388_v31, %v1809_v38 }
 0x3a4   : > { %v1845_v39 = vmax.f32 %v1829_v26, 0.0 }
 0x3a6   : > { %2315 = vmatmul.msk.f32.gmra.mxu3 %vm723_vm6, %v1845_v39 }
 0x3a9   : > { %v1936_v0 = vpop.f32.mrf.mxu3 }
 0x3aa   : > { %v1974_v25 = vmul.f32 %v3510_v53, %v1936_v0 }
 0x3ac   : > { %v1994_v43 = vadd.f32 %v3515_v63, %v1974_v25 }
 0x3ae   : > { %v2026_v44 = vadd.f32 %v2010_v42, %v1994_v43 }
 0x3b0   : > { %v2042_v45 = vmax.f32 %v2026_v44, 0.0 }
 0x3b2   : > { %2058 = vst.msk [vmem:[%s2911_s8 + $0x38] sm:$0xff] %vm554_vm5, %v2042_v45 }
 0x3b9   : > { %v1939_v10 = vpop.f32.mrf.mxu3 }
 0x3ba   : > { %v1975_v31 = vmul.f32 %v3510_v53, %v1939_v10 }
 0x3bc   : > { %v1995_v47 = vadd.f32 %v3515_v63, %v1975_v31 }
 0x3be   : > { %v2027_v40 = vadd.f32 %v2011_v46, %v1995_v47 }
 0x3c0   : > { %v2043_v48 = vmax.f32 %v2027_v40, 0.0 }
 0x3c2   : > { %2059 = vst.msk [vmem:[%s2911_s8 + $0x40] sm:$0xff] %vm554_vm5, %v2043_v48 }
 0x3c9   : > { %v1942_v14 = vpop.f32.mrf.mxu3 }
 0x3ca   : > { %v1976_v55 = vmul.f32 %v3510_v53, %v1942_v14 }
 0x3cc   : > { %v1996_v11 = vadd.f32 %v3515_v63, %v1976_v55 }
 0x3ce   : > { %v2028_v50 = vadd.f32 %v2012_v41, %v1996_v11 }
 0x3d0   : > { %v2044_v51 = vmax.f32 %v2028_v50, 0.0 }
 0x3d2   : > { %2060 = vst.msk [vmem:[%s2911_s8 + $0x48] sm:$0xff] %vm554_vm5, %v2044_v51 }
 0x3d9   : > { %v1945_v52 = vpop.f32.mrf.mxu3 }
 0x3da   : > { %v1977_v56 = vmul.f32 %v3510_v53, %v1945_v52 }
 0x3dc   : > { %v1997_v58 = vadd.f32 %v3515_v63, %v1977_v56 }
 0x3de   : > { %v2029_v59 = vadd.f32 %v2013_v57, %v1997_v58 }
 0x3e0   : > { %v2045_v60 = vmax.f32 %v2029_v59, 0.0 }
 0x3e2   : > { %2061 = vst.msk [vmem:[%s2911_s8 + $0x50] sm:$0xff] %vm554_vm5, %v2045_v60 }
 0x3e9   : > { %v1948_v61 = vpop.f32.mrf.mxu3 }
 0x3ea   : > { %v1978_v62 = vmul.f32 %v3510_v53, %v1948_v61 }
 0x3ec   : > { %v1998_v4 = vadd.f32 %v3515_v63, %v1978_v62 }
 0x3ee   : > { %v2030_v5 = vadd.f32 %v2014_v2, %v1998_v4 }
 0x3f0   : > { %v2046_v54 = vmax.f32 %v2030_v5, 0.0 }
 0x3f2   : > { %2062 = vst.msk [vmem:[%s2911_s8 + $0x58] sm:$0xff] %vm554_vm5, %v2046_v54 }
 0x3f9   : > { %v1951_v8 = vpop.f32.mrf.mxu3 }
 0x3fa   : > { %v1979_v27 = vmul.f32 %v3510_v53, %v1951_v8 }
 0x3fc   : > { %v1999_v13 = vadd.f32 %v3515_v63, %v1979_v27 }
 0x3fe   : > { %v2031_v30 = vadd.f32 %v2015_v12, %v1999_v13 }
 0x400   : > { %v2047_v15 = vmax.f32 %v2031_v30, 0.0 }
 0x402   : > { %2063 = vst.msk [vmem:[%s2911_s8 + $0x60] sm:$0xff] %vm554_vm5, %v2047_v15 }
 0x409   : > { %v1954_v16 = vpop.f32.mrf.mxu3 }
 0x40a   : > { %v1980_v17 = vmul.f32 %v3510_v53, %v1954_v16 }
 0x40c   : > { %v2000_v18 = vadd.f32 %v3515_v63, %v1980_v17 }
 0x40e   : > { %v2032_v19 = vadd.f32 %v2016_v3, %v2000_v18 }
 0x410   : > { %v2048_v6 = vmax.f32 %v2032_v19, 0.0 }
 0x412   : > { %2064 = vst.msk [vmem:[%s2911_s8 + $0x68] sm:$0xff] %vm554_vm5, %v2048_v6 }
 0x419   : > { %v1957_v20 = vpop.f32.mrf.mxu3 }
 0x41a   : > { %v1981_v21 = vmul.f32 %v3510_v53, %v1957_v20 }
 0x41c   : > { %v2001_v7 = vadd.f32 %v3515_v63, %v1981_v21 }
 0x41e   : > { %v2033_v9 = vadd.f32 %v2017_v22, %v2001_v7 }
 0x420   : > { %v2049_v28 = vmax.f32 %v2033_v9, 0.0 }
 0x422   : > { %2065 = vst.msk [vmem:[%s2911_s8 + $0x70] sm:$0xff] %vm554_vm5, %v2049_v28 }
 0x429   : > { %v1960_v29 = vpop.f32.mrf.mxu3 }
 0x42a   : > { %v1982_v32 = vmul.f32 %v3510_v53, %v1960_v29 }
 0x42c   : > { %v2002_v34 = vadd.f32 %v3515_v63, %v1982_v32 }
 0x42e   : > { %v2034_v24 = vadd.f32 %v2018_v33, %v2002_v34 }
 0x430   : > { %v2050_v36 = vmax.f32 %v2034_v24, 0.0 }
 0x432   : > { %2066 = vst.msk [vmem:[%s2911_s8 + $0x78] sm:$0xff] %vm554_vm5, %v2050_v36 }
 0x433   : > { %2544 = shalt.err (!%p2541_p2)
}
 0x434   : > { %s2651_s0 = smov 128  }
 0x435   : > { %2343 = dma.vmem_to_hbm [thread:$0]  (%p2798_p9), %s2084_s16, 2048, %s2086_s23, %s2068_s20, %s2651_s0, %s2651_s0, %s2650_s15  }
 0x436 PF: > { %s3739_s8 = sld [smem:[#allocation12_spill]]  ;;  %p2357_p4 = scmp.ge.s32.totalorder %s2643_s27, 2 }
 0x438   : > { %p2353_p5 = pnand %p2357_p4, %p2802_p10 }
 0x43a   : > { %p2354_p8 = pneg %p2353_p5 }
 0x43c   : > { %s2100_s25 = sand.u32 1, %s3739_s8  }
 0x43d   : > { %s2101_s22 = scalar_lea.sflag [#allocation5], %s2100_s25 }
 0x43e   : > { %2598 = dma.done.wait (%p2354_p8), %s2101_s22, 2048  }
 0x43f   : > { %2600 = vsyncadd (%p2354_p8), %s2101_s22, 4294965248  ;;  %s30_s27 = sadd.s32 1, %s2643_s27   ;;  %s3741_s15 = sld [smem:[#allocation13_spill]] }
 0x440   : > { %p27_p11 = scmp.ge.s32.totalorder %s30_s27, 6   ;;  %s3742_s22 = sld [smem:[#allocation20_spill]] }
 0x441   : > { %s3743_s23 = sld [smem:[#allocation15_spill]]  ;;  %s3746_s17 = smov %s2607_s18 }
 0x442   : > { %s3744_s25 = sld [smem:[#allocation16_spill]]  ;;  %s3747_s18 = smov %s2611_s19 }
 0x443   : > { %s3745_s6 = sld [smem:[#allocation19_spill]]  ;;  %s3748_s19 = smov %s2858_s29 }
 0x444   : > { %s3749_s20 = smov %s2619_s21  ;;  %s3751_s24 = smov %s2639_s26 }
 0x445   : > { %s3750_s21 = smov %s3741_s15  ;;  %29 = sbr.rel (!%p27_p11) target bundleno = 20 (0x14), region = 145 }
 0x449   : > { %s3752_s26 = smov %s3745_s6 }
 0x44a   :  { %2107 = vsyncpa [#allocation4], 1 }
 0x44b   :  { %2109 = vsyncpa [#allocation4 + $0x1], 1 }
 0x44c   :  { %2110 = vsyncpa [#allocation7], 1 }
 0x44d   :  { %2112 = vsyncpa [#allocation7 + $0x1], 1 }
 0x44e   :  { %2113 = vsyncpa [#allocation5], 1 }
 0x44f   :  { %2115 = vsyncpa [#allocation5 + $0x1], 1 }

</bundles_post_ra>
